<compile_context>
chip_gen: v5e
topology: v5e:2x2
jax: 0.10.0
libtpu: 0.0.40
codegen_flags: <defaults>
</compile_context>

<pallas_src>
import jax
import jax.numpy as jnp
from jax import lax
from jax.experimental import pallas as pl
from jax.experimental.pallas import tpu as pltpu
from functools import partial

# ---- model config (small, synthetic) ----------------------------------------
MAX_LENGTH  = 8          # sequence length (the module's max_length)
VOCAB       = 64
HIDDEN      = 32
NUM_HEADS   = 4
HEAD_DIM    = HIDDEN // NUM_HEADS
FFN_DIM     = 64
NUM_CLASSES = 2
SCALE       = 1.0 / (HEAD_DIM ** 0.5)

LANES = 128              # lane-padded width of packed slabs and output tile
SEQS_PER_BLOCK = 16      # BB: sequences per grid step -> R = BB*S = 128 rows

# Row offsets of each matmul weight inside the packed (W_ROWS, LANES) bf16 slab.
ROW_TOK = 0
ROW_QKV = ROW_TOK + VOCAB           # 64
ROW_WO  = ROW_QKV + HIDDEN          # 96
ROW_W1  = ROW_WO + HIDDEN           # 128
ROW_W2  = ROW_W1 + HIDDEN           # 160
ROW_WP  = ROW_W2 + FFN_DIM          # 224
ROW_WC  = ROW_WP + HIDDEN           # 256
W_ROWS  = ROW_WC + HIDDEN           # 288

# Row indices of each bias / LN param inside the packed (P_ROWS, LANES) f32 slab.
P_BQKV, P_BO, P_LN1G, P_LN1B, P_B1, P_B2, P_LN2G, P_LN2B, P_BP, P_BC = range(10)
P_ROWS = 16


def _layernorm(x, gamma, beta, eps=1e-12):
    mean = jnp.mean(x, axis=-1, keepdims=True)
    var = jnp.mean((x - mean) ** 2, axis=-1, keepdims=True)
    return (x - mean) * lax.rsqrt(var + eps) * gamma + beta


def _gelu(x):
    # TODO(synk): HF BertForSequenceClassification defaults to exact erf-GELU;
    # the tanh approximation is used here (EUP-friendly, ~1e-3 difference).
    c = 0.7978845608028654  # sqrt(2/pi)
    return 0.5 * x * (1.0 + jnp.tanh(c * (x + 0.044715 * x * x * x)))


# ---- Pallas kernel -----------------------------------------------------------
def bert_block_kernel(ids_ref, am_ref, bd_ref, pos_ref, w_ref, p_ref, out_ref):
    ids = ids_ref[0]                  # (R, 1) int32
    am = am_ref[0]                    # (1, R) f32 attention mask (1 = keep)
    R = ids.shape[0]
    BB = out_ref.shape[1]
    S = R // BB

    p = p_ref[...]
    bo   = p[P_BO:P_BO + 1, :HIDDEN]
    ln1g = p[P_LN1G:P_LN1G + 1, :HIDDEN]
    ln1b = p[P_LN1B:P_LN1B + 1, :HIDDEN]
    b1   = p[P_B1:P_B1 + 1, :FFN_DIM]
    b2   = p[P_B2:P_B2 + 1, :HIDDEN]
    ln2g = p[P_LN2G:P_LN2G + 1, :HIDDEN]
    ln2b = p[P_LN2B:P_LN2B + 1, :HIDDEN]
    bp   = p[P_BP:P_BP + 1, :HIDDEN]
    bc   = p[P_BC:P_BC + 1, :]        # (1, 128); real logits in first NUM_CLASSES lanes

    # --- embedding gather fused into the kernel (one-hot MXU matmul) ----------
    one_hot = (lax.broadcasted_iota(jnp.int32, (R, VOCAB), 1) == ids
               ).astype(jnp.bfloat16)                                       # (R, V)
    emb = jnp.dot(one_hot, w_ref[ROW_TOK:ROW_TOK + VOCAB, :HIDDEN],
                  preferred_element_type=jnp.float32)                       # (R, H)
    x = emb + pos_ref[...]                                                  # (R, H) f32

    # attention mask: resident grid-invariant block-diag + per-key padding mask
    mask_add = bd_ref[...] + (1.0 - am) * (-1e9)                            # (R, R)

    # --- fused QKV projection (full zero-padded 128-lane slab) ----------------
    xb = x.astype(jnp.bfloat16)
    qkv = jnp.dot(xb, w_ref[ROW_QKV:ROW_QKV + HIDDEN, :],
                  preferred_element_type=jnp.float32) + p[P_BQKV:P_BQKV + 1, :]
    q = qkv[:, 0 * HIDDEN:1 * HIDDEN].astype(jnp.bfloat16)
    k = qkv[:, 1 * HIDDEN:2 * HIDDEN].astype(jnp.bfloat16)
    v = qkv[:, 2 * HIDDEN:3 * HIDDEN].astype(jnp.bfloat16)

    # --- multi-head self-attention (bf16 MXU operands, f32 softmax) -----------
    ctx_heads = []
    for h in range(NUM_HEADS):
        lo = h * HEAD_DIM
        s = lax.dot_general(q[:, lo:lo + HEAD_DIM], k[:, lo:lo + HEAD_DIM],
                            (((1,), (1,)), ((), ())),
                            preferred_element_type=jnp.float32) * SCALE     # (R, R)
        s = s + mask_add
        s = s - jnp.max(s, axis=-1, keepdims=True)
        pr = jnp.exp(s)
        pr = pr * pl.reciprocal(jnp.sum(pr, axis=-1, keepdims=True), approx=True)
        ctx_heads.append(jnp.dot(pr.astype(jnp.bfloat16), v[:, lo:lo + HEAD_DIM],
                                 preferred_element_type=jnp.float32))       # (R, dh)
    # lane-concat of head contexts + single output projection
    ctx = jnp.concatenate(ctx_heads, axis=-1)                               # (R, H)
    attn = jnp.dot(ctx.astype(jnp.bfloat16),
                   w_ref[ROW_WO:ROW_WO + HIDDEN, :HIDDEN],
                   preferred_element_type=jnp.float32) + bo
    h1 = _layernorm(x + attn, ln1g, ln1b)

    # --- feed-forward ----------------------------------------------------------
    ff = jnp.dot(h1.astype(jnp.bfloat16), w_ref[ROW_W1:ROW_W1 + HIDDEN, :FFN_DIM],
                 preferred_element_type=jnp.float32) + b1
    ff = _gelu(ff)
    ff = jnp.dot(ff.astype(jnp.bfloat16), w_ref[ROW_W2:ROW_W2 + FFN_DIM, :HIDDEN],
                 preferred_element_type=jnp.float32) + b2
    h2 = _layernorm(h1 + ff, ln2g, ln2b)

    # --- CLS-row gather (tiny selection matmul) + pooler + classifier ---------
    # sel[i, j] = 1 iff j == i*S; picks the CLS row of each of the BB sequences.
    sel = (lax.broadcasted_iota(jnp.int32, (BB, R), 1)
           == lax.broadcasted_iota(jnp.int32, (BB, R), 0) * S).astype(jnp.bfloat16)
    cls = jnp.dot(sel, h2.astype(jnp.bfloat16),
                  preferred_element_type=jnp.float32)                       # (BB, H)
    pooled = jnp.tanh(jnp.dot(cls.astype(jnp.bfloat16),
                              w_ref[ROW_WP:ROW_WP + HIDDEN, :HIDDEN],
                              preferred_element_type=jnp.float32) + bp)
    logits = jnp.dot(pooled.astype(jnp.bfloat16), w_ref[ROW_WC:ROW_WC + HIDDEN, :],
                     preferred_element_type=jnp.float32) + bc               # (BB, 128)
    out_ref[0] = logits


# ---- parameter construction & packing ----------------------------------------
def init_params(key):
    ks = jax.random.split(key, 12)
    std = 0.02
    rnd = lambda k, shape: jax.random.normal(k, shape, jnp.float32) * std
    return {
        "tok_emb": rnd(ks[0], (VOCAB, HIDDEN)),
        "pos_emb": rnd(ks[1], (MAX_LENGTH, HIDDEN)),
        "wqkv": rnd(ks[2], (HIDDEN, 3 * HIDDEN)),
        "bqkv": rnd(ks[3], (1, 3 * HIDDEN)),
        "wo": rnd(ks[4], (HIDDEN, HIDDEN)),
        "bo": rnd(ks[5], (1, HIDDEN)),
        "ln1g": jnp.ones((1, HIDDEN), jnp.float32),
        "ln1b": jnp.zeros((1, HIDDEN), jnp.float32),
        "w1": rnd(ks[6], (HIDDEN, FFN_DIM)),
        "b1": rnd(ks[7], (1, FFN_DIM)),
        "w2": rnd(ks[8], (FFN_DIM, HIDDEN)),
        "b2": rnd(ks[9], (1, HIDDEN)),
        "ln2g": jnp.ones((1, HIDDEN), jnp.float32),
        "ln2b": jnp.zeros((1, HIDDEN), jnp.float32),
        "wp": rnd(ks[10], (HIDDEN, HIDDEN)),
        "bp": jnp.zeros((1, HIDDEN), jnp.float32),
        "wc": rnd(ks[11], (HIDDEN, NUM_CLASSES)),
        "bc": jnp.zeros((1, NUM_CLASSES), jnp.float32),
    }


def pack_params(raw):
    def pad_cols(w):
        return jnp.pad(w, ((0, 0), (0, LANES - w.shape[1])))

    wmat = jnp.concatenate(
        [pad_cols(raw["tok_emb"]), pad_cols(raw["wqkv"]), pad_cols(raw["wo"]),
         pad_cols(raw["w1"]), pad_cols(raw["w2"]), pad_cols(raw["wp"]),
         pad_cols(raw["wc"])],
        axis=0).astype(jnp.bfloat16)                       # (288, 128) bf16
    assert wmat.shape == (W_ROWS, LANES)

    def row(vec):
        vec = vec.reshape(-1)
        return jnp.pad(vec, (0, LANES - vec.shape[0]))

    rows = [raw["bqkv"], raw["bo"], raw["ln1g"], raw["ln1b"], raw["b1"],
            raw["b2"], raw["ln2g"], raw["ln2b"], raw["bp"], raw["bc"]]
    pvec = jnp.zeros((P_ROWS, LANES), jnp.float32)
    pvec = pvec.at[:len(rows)].set(jnp.stack([row(r) for r in rows]))

    return {"pos_emb": raw["pos_emb"], "wmat": wmat, "pvec": pvec}


# ---- forward wrapper (mirrors BertClassifier.forward) --------------------------
@partial(jax.jit, static_argnames=("max_length",))
def bert_classifier_forward(x, packed, max_length=MAX_LENGTH):
    """x = concat(input_ids, attention_mask) along dim 1, like the torch module."""
    B = x.shape[0]
    input_ids = x[:, :max_length].astype(jnp.int32)          # .long() in torch
    attention_mask = x[:, max_length:].astype(jnp.float32)

    # batch BB sequences per grid step (pad the batch to a multiple of BB)
    BB = SEQS_PER_BLOCK
    NB = -(-B // BB)
    B_pad = NB * BB
    if B_pad > B:
        input_ids = jnp.pad(input_ids, ((0, B_pad - B), (0, 0)))
        attention_mask = jnp.pad(attention_mask, ((0, B_pad - B), (0, 0)))
    R = BB * max_length

    ids_blocks = input_ids.reshape(NB, R, 1)                 # (NB, R, 1) int32
    am_blocks = attention_mask.reshape(NB, 1, R)             # (NB, 1, R) f32

    # grid-invariant block-diagonal additive mask (resident, loaded once)
    seq_id = jnp.arange(R, dtype=jnp.int32) // max_length
    blockdiag = jnp.where(seq_id[:, None] == seq_id[None, :],
                          0.0, -1e9).astype(jnp.float32)     # (R, R)

    pos_tiled = jnp.tile(packed["pos_emb"], (BB, 1))         # (R, H) resident

    out = pl.pallas_call(
        bert_block_kernel,
        out_shape=jax.ShapeDtypeStruct((NB, BB, LANES), jnp.float32),
        grid_spec=pltpu.PrefetchScalarGridSpec(
            num_scalar_prefetch=0,
            grid=(NB,),
            in_specs=[
                pl.BlockSpec((1, R, 1), lambda b: (b, 0, 0)),        # input_ids
                pl.BlockSpec((1, 1, R), lambda b: (b, 0, 0)),        # attention mask
                pl.BlockSpec((R, R), lambda b: (0, 0)),              # block-diag mask
                pl.BlockSpec((R, HIDDEN), lambda b: (0, 0)),         # tiled pos emb
                pl.BlockSpec((W_ROWS, LANES), lambda b: (0, 0)),     # packed weights
                pl.BlockSpec((P_ROWS, LANES), lambda b: (0, 0)),     # packed biases/LN
            ],
            out_specs=pl.BlockSpec((1, BB, LANES), lambda b: (b, 0, 0)),
        ),
        compiler_params=pltpu.CompilerParams(
            dimension_semantics=("parallel",)),   # spans both TCs on v7x when NB>=2
    )(ids_blocks, am_blocks, blockdiag, pos_tiled, packed["wmat"], packed["pvec"])

    # one CLS-logits row per sequence; real classes in the first NUM_CLASSES lanes
    logits = out.reshape(B_pad, LANES)[:B, :NUM_CLASSES]
    return logits


# ---- pure-JAX reference (for correctness check) --------------------------------
def reference_forward(x, raw, max_length=MAX_LENGTH):
    ids = x[:, :max_length].astype(jnp.int32)
    am = x[:, max_length:].astype(jnp.float32)
    # kernel stores token embeddings in the bf16 weight slab; mirror that here
    tok = raw["tok_emb"].astype(jnp.bfloat16).astype(jnp.float32)
    h = jnp.take(tok, ids, axis=0) + raw["pos_emb"][None]

    def mm(a, w):
        return jnp.dot(a.astype(jnp.bfloat16), w.astype(jnp.bfloat16),
                       preferred_element_type=jnp.float32)

    qkv = mm(h, raw["wqkv"]) + raw["bqkv"]
    q, k, v = jnp.split(qkv, 3, axis=-1)
    B, S, _ = h.shape
    qh = q.reshape(B, S, NUM_HEADS, HEAD_DIM)
    kh = k.reshape(B, S, NUM_HEADS, HEAD_DIM)
    vh = v.reshape(B, S, NUM_HEADS, HEAD_DIM)
    s = jnp.einsum("bqnd,bknd->bnqk", qh, kh) * SCALE
    s = s + ((1.0 - am) * -1e9)[:, None, None, :]
    p = jax.nn.softmax(s, axis=-1)
    ctx = jnp.einsum("bnqk,bknd->bqnd", p, vh).reshape(B, S, HIDDEN)
    attn = mm(ctx, raw["wo"]) + raw["bo"]
    h1 = _layernorm(h + attn, raw["ln1g"], raw["ln1b"])
    ff = _gelu(mm(h1, raw["w1"]) + raw["b1"])
    ff = mm(ff, raw["w2"]) + raw["b2"]
    h2 = _layernorm(h1 + ff, raw["ln2g"], raw["ln2b"])
    pooled = jnp.tanh(mm(h2[:, 0, :], raw["wp"]) + raw["bp"])
    return mm(pooled, raw["wc"]) + raw["bc"]


if __name__ == "__main__":
    key = jax.random.PRNGKey(0)
    kp, kid = jax.random.split(key)
    raw = init_params(kp)
    packed = pack_params(raw)

    B = 2
    input_ids = jax.random.randint(kid, (B, MAX_LENGTH), 0, VOCAB)
    attention_mask = jnp.ones((B, MAX_LENGTH), jnp.int32)
    attention_mask = attention_mask.at[1, -2:].set(0)   # pad last 2 tokens of seq 1

    # ART-style concatenated float input: [input_ids | attention_mask]
    x = jnp.concatenate([input_ids.astype(jnp.float32),
                         attention_mask.astype(jnp.float32)], axis=1)   # (B, 2*S)

    logits = bert_classifier_forward(x, packed)
    jax.block_until_ready(logits)

    assert logits.shape == (B, NUM_CLASSES)
    assert bool(jnp.all(jnp.isfinite(logits)))

    ref = reference_forward(x, raw)
    assert jnp.allclose(logits, ref, atol=1e-2, rtol=1e-2), (logits, ref)

    print("KERNEL_OK")
</pallas_src>

<mosaic_0001>
module attributes {stable_mosaic.version = 11 : i64} {
  func.func @bert_block_kernel(%arg0: i32, %arg1: memref<1x128x1xi32, #tpu.memory_space<vmem>>, %arg2: memref<1x1x128xf32, #tpu.memory_space<vmem>>, %arg3: memref<128x128xf32, #tpu.memory_space<vmem>>, %arg4: memref<128x32xf32, #tpu.memory_space<vmem>>, %arg5: memref<288x128xbf16, #tpu.memory_space<vmem>>, %arg6: memref<16x128xf32, #tpu.memory_space<vmem>>, %arg7: memref<1x16x128xf32, #tpu.memory_space<vmem>>) attributes {dimension_semantics = [#tpu.dimension_semantics<parallel>], iteration_bounds = array<i64: 1>, scalar_prefetch = 0 : i64, scratch_operands = 0 : i64, tpu.core_type = #tpu.core_type<tc>, window_params = [{transform_indices = @transform_0, window_bounds = array<i64: 1, 128, 1>}, {transform_indices = @transform_1, window_bounds = array<i64: 1, 1, 128>}, {pipeline_mode = #tpu.pipeline_mode<synchronous>, transform_indices = @transform_2, window_bounds = array<i64: 128, 128>}, {pipeline_mode = #tpu.pipeline_mode<synchronous>, transform_indices = @transform_3, window_bounds = array<i64: 128, 32>}, {pipeline_mode = #tpu.pipeline_mode<synchronous>, transform_indices = @transform_4, window_bounds = array<i64: 288, 128>}, {pipeline_mode = #tpu.pipeline_mode<synchronous>, transform_indices = @transform_5, window_bounds = array<i64: 16, 128>}, {transform_indices = @transform_6, window_bounds = array<i64: 1, 16, 128>}]} {
    %c0 = arith.constant 0 : index
    %c0_0 = arith.constant 0 : index
    %c0_1 = arith.constant 0 : index
    %0 = vector.load %arg1[%c0, %c0_0, %c0_1] : memref<1x128x1xi32, #tpu.memory_space<vmem>>, vector<1x128x1xi32>
    %1 = vector.shape_cast %0 : vector<1x128x1xi32> to vector<128x1xi32>
    %c0_2 = arith.constant 0 : index
    %c0_3 = arith.constant 0 : index
    %c0_4 = arith.constant 0 : index
    %2 = vector.load %arg2[%c0_2, %c0_3, %c0_4] : memref<1x1x128xf32, #tpu.memory_space<vmem>>, vector<1x1x128xf32>
    %3 = vector.shape_cast %2 : vector<1x1x128xf32> to vector<1x128xf32>
    %c0_5 = arith.constant 0 : index
    %c0_6 = arith.constant 0 : index
    %4 = vector.load %arg6[%c0_5, %c0_6] : memref<16x128xf32, #tpu.memory_space<vmem>>, vector<16x128xf32>
    %5 = vector.extract_strided_slice %4 {offsets = [1, 0], sizes = [1, 32], strides = [1, 1]} : vector<16x128xf32> to vector<1x32xf32>
    %6 = vector.extract_strided_slice %4 {offsets = [2, 0], sizes = [1, 32], strides = [1, 1]} : vector<16x128xf32> to vector<1x32xf32>
    %7 = vector.extract_strided_slice %4 {offsets = [3, 0], sizes = [1, 32], strides = [1, 1]} : vector<16x128xf32> to vector<1x32xf32>
    %8 = vector.extract_strided_slice %4 {offsets = [4, 0], sizes = [1, 64], strides = [1, 1]} : vector<16x128xf32> to vector<1x64xf32>
    %9 = vector.extract_strided_slice %4 {offsets = [5, 0], sizes = [1, 32], strides = [1, 1]} : vector<16x128xf32> to vector<1x32xf32>
    %10 = vector.extract_strided_slice %4 {offsets = [6, 0], sizes = [1, 32], strides = [1, 1]} : vector<16x128xf32> to vector<1x32xf32>
    %11 = vector.extract_strided_slice %4 {offsets = [7, 0], sizes = [1, 32], strides = [1, 1]} : vector<16x128xf32> to vector<1x32xf32>
    %12 = vector.extract_strided_slice %4 {offsets = [8, 0], sizes = [1, 32], strides = [1, 1]} : vector<16x128xf32> to vector<1x32xf32>
    %13 = vector.extract_strided_slice %4 {offsets = [9, 0], sizes = [1, 128], strides = [1, 1]} : vector<16x128xf32> to vector<1x128xf32>
    %14 = tpu.iota {dimensions = array<i32: 1>} : vector<128x64xi32>
    %15 = vector.broadcast %1 : vector<128x1xi32> to vector<128x64xi32>
    %16 = arith.cmpi eq, %14, %15 : vector<128x64xi32>
    %17 = arith.extui %16 : vector<128x64xi1> to vector<128x64xi32>
    %18 = arith.sitofp %17 : vector<128x64xi32> to vector<128x64xf32>
    %19 = arith.truncf %18 : vector<128x64xf32> to vector<128x64xbf16>
    %c0_7 = arith.constant 0 : index
    %c0_8 = arith.constant 0 : index
    %20 = vector.load %arg5[%c0_7, %c0_8] : memref<288x128xbf16, #tpu.memory_space<vmem>>, vector<64x32xbf16>
    %cst = arith.constant dense<0.000000e+00> : vector<128x32xf32>
    %21 = tpu.matmul %19, %20, %cst {dimension_numbers = #tpu.dot_dimension_numbers<[1], [0], [0], [1], [0, 0, 1, 1], [], []>} : vector<128x64xbf16>, vector<64x32xbf16>, vector<128x32xf32> -> vector<128x32xf32>
    %c0_9 = arith.constant 0 : index
    %c0_10 = arith.constant 0 : index
    %22 = vector.load %arg4[%c0_9, %c0_10] : memref<128x32xf32, #tpu.memory_space<vmem>>, vector<128x32xf32>
    %23 = arith.addf %21, %22 : vector<128x32xf32>
    %c0_11 = arith.constant 0 : index
    %c0_12 = arith.constant 0 : index
    %24 = vector.load %arg3[%c0_11, %c0_12] : memref<128x128xf32, #tpu.memory_space<vmem>>, vector<128x128xf32>
    %cst_13 = arith.constant 1.000000e+00 : f32
    %25 = vector.broadcast %cst_13 : f32 to vector<1x128xf32>
    %26 = arith.subf %25, %3 : vector<1x128xf32>
    %cst_14 = arith.constant -1.000000e+09 : f32
    %27 = vector.broadcast %cst_14 : f32 to vector<1x128xf32>
    %28 = arith.mulf %26, %27 : vector<1x128xf32>
    %29 = vector.broadcast %28 : vector<1x128xf32> to vector<128x128xf32>
    %30 = arith.addf %24, %29 : vector<128x128xf32>
    %31 = arith.truncf %23 : vector<128x32xf32> to vector<128x32xbf16>
    %c64 = arith.constant 64 : index
    %c0_15 = arith.constant 0 : index
    %32 = vector.load %arg5[%c64, %c0_15] : memref<288x128xbf16, #tpu.memory_space<vmem>>, vector<32x128xbf16>
    %cst_16 = arith.constant dense<0.000000e+00> : vector<128x128xf32>
    %33 = tpu.matmul %31, %32, %cst_16 {dimension_numbers = #tpu.dot_dimension_numbers<[1], [0], [0], [1], [0, 0, 1, 1], [], []>} : vector<128x32xbf16>, vector<32x128xbf16>, vector<128x128xf32> -> vector<128x128xf32>
    %34 = vector.extract_strided_slice %4 {offsets = [0, 0], sizes = [1, 128], strides = [1, 1]} : vector<16x128xf32> to vector<1x128xf32>
    %35 = vector.broadcast %34 : vector<1x128xf32> to vector<128x128xf32>
    %36 = arith.addf %33, %35 : vector<128x128xf32>
    %37 = vector.extract_strided_slice %36 {offsets = [0, 0], sizes = [128, 32], strides = [1, 1]} : vector<128x128xf32> to vector<128x32xf32>
    %38 = arith.truncf %37 : vector<128x32xf32> to vector<128x32xbf16>
    %39 = vector.extract_strided_slice %36 {offsets = [0, 32], sizes = [128, 32], strides = [1, 1]} : vector<128x128xf32> to vector<128x32xf32>
    %40 = arith.truncf %39 : vector<128x32xf32> to vector<128x32xbf16>
    %41 = vector.extract_strided_slice %36 {offsets = [0, 64], sizes = [128, 32], strides = [1, 1]} : vector<128x128xf32> to vector<128x32xf32>
    %42 = arith.truncf %41 : vector<128x32xf32> to vector<128x32xbf16>
    %43 = vector.extract_strided_slice %38 {offsets = [0, 0], sizes = [128, 8], strides = [1, 1]} : vector<128x32xbf16> to vector<128x8xbf16>
    %44 = vector.extract_strided_slice %40 {offsets = [0, 0], sizes = [128, 8], strides = [1, 1]} : vector<128x32xbf16> to vector<128x8xbf16>
    %cst_17 = arith.constant dense<0.000000e+00> : vector<128x128xf32>
    %45 = tpu.matmul %43, %44, %cst_17 {dimension_numbers = #tpu.dot_dimension_numbers<[1], [1], [0], [0], [0, 0, 1, 0], [], []>} : vector<128x8xbf16>, vector<128x8xbf16>, vector<128x128xf32> -> vector<128x128xf32>
    %cst_18 = arith.constant 0.353553385 : f32
    %46 = vector.broadcast %cst_18 : f32 to vector<128x128xf32>
    %47 = arith.mulf %45, %46 : vector<128x128xf32>
    %48 = arith.addf %47, %30 : vector<128x128xf32>
    %cst_19 = arith.constant dense<0xFF800000> : vector<128xf32>
    %49 = vector.multi_reduction <maximumf>, %48, %cst_19 [1] : vector<128x128xf32> to vector<128xf32>
    %50 = vector.shape_cast %49 : vector<128xf32> to vector<128x1xf32>
    %51 = vector.broadcast %50 : vector<128x1xf32> to vector<128x128xf32>
    %52 = arith.subf %48, %51 : vector<128x128xf32>
    %53 = math.exp %52 : vector<128x128xf32>
    %cst_20 = arith.constant dense<0.000000e+00> : vector<128xf32>
    %54 = vector.multi_reduction <add>, %53, %cst_20 [1] : vector<128x128xf32> to vector<128xf32>
    %55 = vector.shape_cast %54 : vector<128xf32> to vector<128x1xf32>
    %56 = tpu.reciprocal %55 {approx = true} : vector<128x1xf32> -> vector<128x1xf32>
    %57 = vector.broadcast %56 : vector<128x1xf32> to vector<128x128xf32>
    %58 = arith.mulf %53, %57 : vector<128x128xf32>
    %59 = arith.truncf %58 : vector<128x128xf32> to vector<128x128xbf16>
    %60 = vector.extract_strided_slice %42 {offsets = [0, 0], sizes = [128, 8], strides = [1, 1]} : vector<128x32xbf16> to vector<128x8xbf16>
    %cst_21 = arith.constant dense<0.000000e+00> : vector<128x8xf32>
    %61 = tpu.matmul %59, %60, %cst_21 {dimension_numbers = #tpu.dot_dimension_numbers<[1], [0], [0], [1], [0, 0, 1, 1], [], []>} : vector<128x128xbf16>, vector<128x8xbf16>, vector<128x8xf32> -> vector<128x8xf32>
    %62 = vector.extract_strided_slice %38 {offsets = [0, 8], sizes = [128, 8], strides = [1, 1]} : vector<128x32xbf16> to vector<128x8xbf16>
    %63 = vector.extract_strided_slice %40 {offsets = [0, 8], sizes = [128, 8], strides = [1, 1]} : vector<128x32xbf16> to vector<128x8xbf16>
    %cst_22 = arith.constant dense<0.000000e+00> : vector<128x128xf32>
    %64 = tpu.matmul %62, %63, %cst_22 {dimension_numbers = #tpu.dot_dimension_numbers<[1], [1], [0], [0], [0, 0, 1, 0], [], []>} : vector<128x8xbf16>, vector<128x8xbf16>, vector<128x128xf32> -> vector<128x128xf32>
    %cst_23 = arith.constant 0.353553385 : f32
    %65 = vector.broadcast %cst_23 : f32 to vector<128x128xf32>
    %66 = arith.mulf %64, %65 : vector<128x128xf32>
    %67 = arith.addf %66, %30 : vector<128x128xf32>
    %cst_24 = arith.constant dense<0xFF800000> : vector<128xf32>
    %68 = vector.multi_reduction <maximumf>, %67, %cst_24 [1] : vector<128x128xf32> to vector<128xf32>
    %69 = vector.shape_cast %68 : vector<128xf32> to vector<128x1xf32>
    %70 = vector.broadcast %69 : vector<128x1xf32> to vector<128x128xf32>
    %71 = arith.subf %67, %70 : vector<128x128xf32>
    %72 = math.exp %71 : vector<128x128xf32>
    %cst_25 = arith.constant dense<0.000000e+00> : vector<128xf32>
    %73 = vector.multi_reduction <add>, %72, %cst_25 [1] : vector<128x128xf32> to vector<128xf32>
    %74 = vector.shape_cast %73 : vector<128xf32> to vector<128x1xf32>
    %75 = tpu.reciprocal %74 {approx = true} : vector<128x1xf32> -> vector<128x1xf32>
    %76 = vector.broadcast %75 : vector<128x1xf32> to vector<128x128xf32>
    %77 = arith.mulf %72, %76 : vector<128x128xf32>
    %78 = arith.truncf %77 : vector<128x128xf32> to vector<128x128xbf16>
    %79 = vector.extract_strided_slice %42 {offsets = [0, 8], sizes = [128, 8], strides = [1, 1]} : vector<128x32xbf16> to vector<128x8xbf16>
    %cst_26 = arith.constant dense<0.000000e+00> : vector<128x8xf32>
    %80 = tpu.matmul %78, %79, %cst_26 {dimension_numbers = #tpu.dot_dimension_numbers<[1], [0], [0], [1], [0, 0, 1, 1], [], []>} : vector<128x128xbf16>, vector<128x8xbf16>, vector<128x8xf32> -> vector<128x8xf32>
    %81 = vector.extract_strided_slice %38 {offsets = [0, 16], sizes = [128, 8], strides = [1, 1]} : vector<128x32xbf16> to vector<128x8xbf16>
    %82 = vector.extract_strided_slice %40 {offsets = [0, 16], sizes = [128, 8], strides = [1, 1]} : vector<128x32xbf16> to vector<128x8xbf16>
    %cst_27 = arith.constant dense<0.000000e+00> : vector<128x128xf32>
    %83 = tpu.matmul %81, %82, %cst_27 {dimension_numbers = #tpu.dot_dimension_numbers<[1], [1], [0], [0], [0, 0, 1, 0], [], []>} : vector<128x8xbf16>, vector<128x8xbf16>, vector<128x128xf32> -> vector<128x128xf32>
    %cst_28 = arith.constant 0.353553385 : f32
    %84 = vector.broadcast %cst_28 : f32 to vector<128x128xf32>
    %85 = arith.mulf %83, %84 : vector<128x128xf32>
    %86 = arith.addf %85, %30 : vector<128x128xf32>
    %cst_29 = arith.constant dense<0xFF800000> : vector<128xf32>
    %87 = vector.multi_reduction <maximumf>, %86, %cst_29 [1] : vector<128x128xf32> to vector<128xf32>
    %88 = vector.shape_cast %87 : vector<128xf32> to vector<128x1xf32>
    %89 = vector.broadcast %88 : vector<128x1xf32> to vector<128x128xf32>
    %90 = arith.subf %86, %89 : vector<128x128xf32>
    %91 = math.exp %90 : vector<128x128xf32>
    %cst_30 = arith.constant dense<0.000000e+00> : vector<128xf32>
    %92 = vector.multi_reduction <add>, %91, %cst_30 [1] : vector<128x128xf32> to vector<128xf32>
    %93 = vector.shape_cast %92 : vector<128xf32> to vector<128x1xf32>
    %94 = tpu.reciprocal %93 {approx = true} : vector<128x1xf32> -> vector<128x1xf32>
    %95 = vector.broadcast %94 : vector<128x1xf32> to vector<128x128xf32>
    %96 = arith.mulf %91, %95 : vector<128x128xf32>
    %97 = arith.truncf %96 : vector<128x128xf32> to vector<128x128xbf16>
    %98 = vector.extract_strided_slice %42 {offsets = [0, 16], sizes = [128, 8], strides = [1, 1]} : vector<128x32xbf16> to vector<128x8xbf16>
    %cst_31 = arith.constant dense<0.000000e+00> : vector<128x8xf32>
    %99 = tpu.matmul %97, %98, %cst_31 {dimension_numbers = #tpu.dot_dimension_numbers<[1], [0], [0], [1], [0, 0, 1, 1], [], []>} : vector<128x128xbf16>, vector<128x8xbf16>, vector<128x8xf32> -> vector<128x8xf32>
    %100 = vector.extract_strided_slice %38 {offsets = [0, 24], sizes = [128, 8], strides = [1, 1]} : vector<128x32xbf16> to vector<128x8xbf16>
    %101 = vector.extract_strided_slice %40 {offsets = [0, 24], sizes = [128, 8], strides = [1, 1]} : vector<128x32xbf16> to vector<128x8xbf16>
    %cst_32 = arith.constant dense<0.000000e+00> : vector<128x128xf32>
    %102 = tpu.matmul %100, %101, %cst_32 {dimension_numbers = #tpu.dot_dimension_numbers<[1], [1], [0], [0], [0, 0, 1, 0], [], []>} : vector<128x8xbf16>, vector<128x8xbf16>, vector<128x128xf32> -> vector<128x128xf32>
    %cst_33 = arith.constant 0.353553385 : f32
    %103 = vector.broadcast %cst_33 : f32 to vector<128x128xf32>
    %104 = arith.mulf %102, %103 : vector<128x128xf32>
    %105 = arith.addf %104, %30 : vector<128x128xf32>
    %cst_34 = arith.constant dense<0xFF800000> : vector<128xf32>
    %106 = vector.multi_reduction <maximumf>, %105, %cst_34 [1] : vector<128x128xf32> to vector<128xf32>
    %107 = vector.shape_cast %106 : vector<128xf32> to vector<128x1xf32>
    %108 = vector.broadcast %107 : vector<128x1xf32> to vector<128x128xf32>
    %109 = arith.subf %105, %108 : vector<128x128xf32>
    %110 = math.exp %109 : vector<128x128xf32>
    %cst_35 = arith.constant dense<0.000000e+00> : vector<128xf32>
    %111 = vector.multi_reduction <add>, %110, %cst_35 [1] : vector<128x128xf32> to vector<128xf32>
    %112 = vector.shape_cast %111 : vector<128xf32> to vector<128x1xf32>
    %113 = tpu.reciprocal %112 {approx = true} : vector<128x1xf32> -> vector<128x1xf32>
    %114 = vector.broadcast %113 : vector<128x1xf32> to vector<128x128xf32>
    %115 = arith.mulf %110, %114 : vector<128x128xf32>
    %116 = arith.truncf %115 : vector<128x128xf32> to vector<128x128xbf16>
    %117 = vector.extract_strided_slice %42 {offsets = [0, 24], sizes = [128, 8], strides = [1, 1]} : vector<128x32xbf16> to vector<128x8xbf16>
    %cst_36 = arith.constant dense<0.000000e+00> : vector<128x8xf32>
    %118 = tpu.matmul %116, %117, %cst_36 {dimension_numbers = #tpu.dot_dimension_numbers<[1], [0], [0], [1], [0, 0, 1, 1], [], []>} : vector<128x128xbf16>, vector<128x8xbf16>, vector<128x8xf32> -> vector<128x8xf32>
    %119 = tpu.concatenate %61, %80, %99, %118 in 1 : vector<128x8xf32>, vector<128x8xf32>, vector<128x8xf32>, vector<128x8xf32> -> vector<128x32xf32>
    %120 = arith.truncf %119 : vector<128x32xf32> to vector<128x32xbf16>
    %c96 = arith.constant 96 : index
    %c0_37 = arith.constant 0 : index
    %121 = vector.load %arg5[%c96, %c0_37] : memref<288x128xbf16, #tpu.memory_space<vmem>>, vector<32x32xbf16>
    %cst_38 = arith.constant dense<0.000000e+00> : vector<128x32xf32>
    %122 = tpu.matmul %120, %121, %cst_38 {dimension_numbers = #tpu.dot_dimension_numbers<[1], [0], [0], [1], [0, 0, 1, 1], [], []>} : vector<128x32xbf16>, vector<32x32xbf16>, vector<128x32xf32> -> vector<128x32xf32>
    %123 = vector.broadcast %5 : vector<1x32xf32> to vector<128x32xf32>
    %124 = arith.addf %122, %123 : vector<128x32xf32>
    %125 = arith.addf %23, %124 : vector<128x32xf32>
    %cst_39 = arith.constant dense<0.000000e+00> : vector<128xf32>
    %126 = vector.multi_reduction <add>, %125, %cst_39 [1] : vector<128x32xf32> to vector<128xf32>
    %127 = vector.shape_cast %126 : vector<128xf32> to vector<128x1xf32>
    %cst_40 = arith.constant 3.200000e+01 : f32
    %128 = vector.broadcast %cst_40 : f32 to vector<128x1xf32>
    %129 = arith.divf %127, %128 : vector<128x1xf32>
    %130 = vector.broadcast %129 : vector<128x1xf32> to vector<128x32xf32>
    %131 = arith.subf %125, %130 : vector<128x32xf32>
    %132 = arith.mulf %131, %131 : vector<128x32xf32>
    %cst_41 = arith.constant dense<0.000000e+00> : vector<128xf32>
    %133 = vector.multi_reduction <add>, %132, %cst_41 [1] : vector<128x32xf32> to vector<128xf32>
    %134 = vector.shape_cast %133 : vector<128xf32> to vector<128x1xf32>
    %cst_42 = arith.constant 3.200000e+01 : f32
    %135 = vector.broadcast %cst_42 : f32 to vector<128x1xf32>
    %136 = arith.divf %134, %135 : vector<128x1xf32>
    %137 = vector.broadcast %129 : vector<128x1xf32> to vector<128x32xf32>
    %138 = arith.subf %125, %137 : vector<128x32xf32>
    %cst_43 = arith.constant 9.99999996E-13 : f32
    %139 = vector.broadcast %cst_43 : f32 to vector<128x1xf32>
    %140 = arith.addf %136, %139 : vector<128x1xf32>
    %141 = math.rsqrt %140 : vector<128x1xf32>
    %142 = vector.broadcast %141 : vector<128x1xf32> to vector<128x32xf32>
    %143 = arith.mulf %138, %142 : vector<128x32xf32>
    %144 = vector.broadcast %6 : vector<1x32xf32> to vector<128x32xf32>
    %145 = arith.mulf %143, %144 : vector<128x32xf32>
    %146 = vector.broadcast %7 : vector<1x32xf32> to vector<128x32xf32>
    %147 = arith.addf %145, %146 : vector<128x32xf32>
    %148 = arith.truncf %147 : vector<128x32xf32> to vector<128x32xbf16>
    %c128 = arith.constant 128 : index
    %c0_44 = arith.constant 0 : index
    %149 = vector.load %arg5[%c128, %c0_44] : memref<288x128xbf16, #tpu.memory_space<vmem>>, vector<32x64xbf16>
    %cst_45 = arith.constant dense<0.000000e+00> : vector<128x64xf32>
    %150 = tpu.matmul %148, %149, %cst_45 {dimension_numbers = #tpu.dot_dimension_numbers<[1], [0], [0], [1], [0, 0, 1, 1], [], []>} : vector<128x32xbf16>, vector<32x64xbf16>, vector<128x64xf32> -> vector<128x64xf32>
    %151 = vector.broadcast %8 : vector<1x64xf32> to vector<128x64xf32>
    %152 = arith.addf %150, %151 : vector<128x64xf32>
    %cst_46 = arith.constant 5.000000e-01 : f32
    %153 = vector.broadcast %cst_46 : f32 to vector<128x64xf32>
    %154 = arith.mulf %153, %152 : vector<128x64xf32>
    %cst_47 = arith.constant 4.471500e-02 : f32
    %155 = vector.broadcast %cst_47 : f32 to vector<128x64xf32>
    %156 = arith.mulf %155, %152 : vector<128x64xf32>
    %157 = arith.mulf %156, %152 : vector<128x64xf32>
    %158 = arith.mulf %157, %152 : vector<128x64xf32>
    %159 = arith.addf %152, %158 : vector<128x64xf32>
    %cst_48 = arith.constant 0.797884583 : f32
    %160 = vector.broadcast %cst_48 : f32 to vector<128x64xf32>
    %161 = arith.mulf %160, %159 : vector<128x64xf32>
    %162 = math.tanh %161 : vector<128x64xf32>
    %cst_49 = arith.constant 1.000000e+00 : f32
    %163 = vector.broadcast %cst_49 : f32 to vector<128x64xf32>
    %164 = arith.addf %163, %162 : vector<128x64xf32>
    %165 = arith.mulf %154, %164 : vector<128x64xf32>
    %166 = arith.truncf %165 : vector<128x64xf32> to vector<128x64xbf16>
    %c160 = arith.constant 160 : index
    %c0_50 = arith.constant 0 : index
    %167 = vector.load %arg5[%c160, %c0_50] : memref<288x128xbf16, #tpu.memory_space<vmem>>, vector<64x32xbf16>
    %cst_51 = arith.constant dense<0.000000e+00> : vector<128x32xf32>
    %168 = tpu.matmul %166, %167, %cst_51 {dimension_numbers = #tpu.dot_dimension_numbers<[1], [0], [0], [1], [0, 0, 1, 1], [], []>} : vector<128x64xbf16>, vector<64x32xbf16>, vector<128x32xf32> -> vector<128x32xf32>
    %169 = vector.broadcast %9 : vector<1x32xf32> to vector<128x32xf32>
    %170 = arith.addf %168, %169 : vector<128x32xf32>
    %171 = arith.addf %147, %170 : vector<128x32xf32>
    %cst_52 = arith.constant dense<0.000000e+00> : vector<128xf32>
    %172 = vector.multi_reduction <add>, %171, %cst_52 [1] : vector<128x32xf32> to vector<128xf32>
    %173 = vector.shape_cast %172 : vector<128xf32> to vector<128x1xf32>
    %cst_53 = arith.constant 3.200000e+01 : f32
    %174 = vector.broadcast %cst_53 : f32 to vector<128x1xf32>
    %175 = arith.divf %173, %174 : vector<128x1xf32>
    %176 = vector.broadcast %175 : vector<128x1xf32> to vector<128x32xf32>
    %177 = arith.subf %171, %176 : vector<128x32xf32>
    %178 = arith.mulf %177, %177 : vector<128x32xf32>
    %cst_54 = arith.constant dense<0.000000e+00> : vector<128xf32>
    %179 = vector.multi_reduction <add>, %178, %cst_54 [1] : vector<128x32xf32> to vector<128xf32>
    %180 = vector.shape_cast %179 : vector<128xf32> to vector<128x1xf32>
    %cst_55 = arith.constant 3.200000e+01 : f32
    %181 = vector.broadcast %cst_55 : f32 to vector<128x1xf32>
    %182 = arith.divf %180, %181 : vector<128x1xf32>
    %183 = vector.broadcast %175 : vector<128x1xf32> to vector<128x32xf32>
    %184 = arith.subf %171, %183 : vector<128x32xf32>
    %cst_56 = arith.constant 9.99999996E-13 : f32
    %185 = vector.broadcast %cst_56 : f32 to vector<128x1xf32>
    %186 = arith.addf %182, %185 : vector<128x1xf32>
    %187 = math.rsqrt %186 : vector<128x1xf32>
    %188 = vector.broadcast %187 : vector<128x1xf32> to vector<128x32xf32>
    %189 = arith.mulf %184, %188 : vector<128x32xf32>
    %190 = vector.broadcast %10 : vector<1x32xf32> to vector<128x32xf32>
    %191 = arith.mulf %189, %190 : vector<128x32xf32>
    %192 = vector.broadcast %11 : vector<1x32xf32> to vector<128x32xf32>
    %193 = arith.addf %191, %192 : vector<128x32xf32>
    %194 = tpu.iota {dimensions = array<i32: 1>} : vector<16x128xi32>
    %195 = tpu.iota {dimensions = array<i32: 0>} : vector<16x128xi32>
    %c8_i32 = arith.constant 8 : i32
    %196 = vector.broadcast %c8_i32 : i32 to vector<16x128xi32>
    %197 = arith.muli %195, %196 : vector<16x128xi32>
    %198 = arith.cmpi eq, %194, %197 : vector<16x128xi32>
    %199 = arith.extui %198 : vector<16x128xi1> to vector<16x128xi32>
    %200 = arith.sitofp %199 : vector<16x128xi32> to vector<16x128xf32>
    %201 = arith.truncf %200 : vector<16x128xf32> to vector<16x128xbf16>
    %202 = arith.truncf %193 : vector<128x32xf32> to vector<128x32xbf16>
    %cst_57 = arith.constant dense<0.000000e+00> : vector<16x32xf32>
    %203 = tpu.matmul %201, %202, %cst_57 {dimension_numbers = #tpu.dot_dimension_numbers<[1], [0], [0], [1], [0, 0, 1, 1], [], []>} : vector<16x128xbf16>, vector<128x32xbf16>, vector<16x32xf32> -> vector<16x32xf32>
    %204 = arith.truncf %203 : vector<16x32xf32> to vector<16x32xbf16>
    %c224 = arith.constant 224 : index
    %c0_58 = arith.constant 0 : index
    %205 = vector.load %arg5[%c224, %c0_58] : memref<288x128xbf16, #tpu.memory_space<vmem>>, vector<32x32xbf16>
    %cst_59 = arith.constant dense<0.000000e+00> : vector<16x32xf32>
    %206 = tpu.matmul %204, %205, %cst_59 {dimension_numbers = #tpu.dot_dimension_numbers<[1], [0], [0], [1], [0, 0, 1, 1], [], []>} : vector<16x32xbf16>, vector<32x32xbf16>, vector<16x32xf32> -> vector<16x32xf32>
    %207 = vector.broadcast %12 : vector<1x32xf32> to vector<16x32xf32>
    %208 = arith.addf %206, %207 : vector<16x32xf32>
    %209 = math.tanh %208 : vector<16x32xf32>
    %210 = arith.truncf %209 : vector<16x32xf32> to vector<16x32xbf16>
    %c256 = arith.constant 256 : index
    %c0_60 = arith.constant 0 : index
    %211 = vector.load %arg5[%c256, %c0_60] : memref<288x128xbf16, #tpu.memory_space<vmem>>, vector<32x128xbf16>
    %cst_61 = arith.constant dense<0.000000e+00> : vector<16x128xf32>
    %212 = tpu.matmul %210, %211, %cst_61 {dimension_numbers = #tpu.dot_dimension_numbers<[1], [0], [0], [1], [0, 0, 1, 1], [], []>} : vector<16x32xbf16>, vector<32x128xbf16>, vector<16x128xf32> -> vector<16x128xf32>
    %213 = vector.broadcast %13 : vector<1x128xf32> to vector<16x128xf32>
    %214 = arith.addf %212, %213 : vector<16x128xf32>
    %c0_62 = arith.constant 0 : index
    %c0_63 = arith.constant 0 : index
    %c0_64 = arith.constant 0 : index
    %215 = vector.load %arg7[%c0_62, %c0_63, %c0_64] : memref<1x16x128xf32, #tpu.memory_space<vmem>>, vector<1x16x128xf32>
    %216 = vector.shape_cast %215 : vector<1x16x128xf32> to vector<16x128xf32>
    %217 = vector.shape_cast %214 : vector<16x128xf32> to vector<1x16x128xf32>
    tpu.vector_store %arg7[%c0_62, %c0_63, %c0_64], %217 {strides = array<i32>} : memref<1x16x128xf32, #tpu.memory_space<vmem>>, vector<1x16x128xf32>,
    return
  }
  func.func @transform_0(%arg0: i32) -> (i32, i32, i32) {
    %c0_i32 = arith.constant 0 : i32
    %c0_i32_0 = arith.constant 0 : i32
    %c0_i32_1 = arith.constant 0 : i32
    return %arg0, %c0_i32, %c0_i32_0 : i32, i32, i32
  }
  func.func @transform_1(%arg0: i32) -> (i32, i32, i32) {
    %c0_i32 = arith.constant 0 : i32
    %c0_i32_0 = arith.constant 0 : i32
    %c0_i32_1 = arith.constant 0 : i32
    return %arg0, %c0_i32, %c0_i32_0 : i32, i32, i32
  }
  func.func @transform_2(%arg0: i32) -> (i32, i32) {
    %c0_i32 = arith.constant 0 : i32
    %c0_i32_0 = arith.constant 0 : i32
    %c0_i32_1 = arith.constant 0 : i32
    return %c0_i32, %c0_i32_0 : i32, i32
  }
  func.func @transform_3(%arg0: i32) -> (i32, i32) {
    %c0_i32 = arith.constant 0 : i32
    %c0_i32_0 = arith.constant 0 : i32
    %c0_i32_1 = arith.constant 0 : i32
    return %c0_i32, %c0_i32_0 : i32, i32
  }
  func.func @transform_4(%arg0: i32) -> (i32, i32) {
    %c0_i32 = arith.constant 0 : i32
    %c0_i32_0 = arith.constant 0 : i32
    %c0_i32_1 = arith.constant 0 : i32
    return %c0_i32, %c0_i32_0 : i32, i32
  }
  func.func @transform_5(%arg0: i32) -> (i32, i32) {
    %c0_i32 = arith.constant 0 : i32
    %c0_i32_0 = arith.constant 0 : i32
    %c0_i32_1 = arith.constant 0 : i32
    return %c0_i32, %c0_i32_0 : i32, i32
  }
  func.func @transform_6(%arg0: i32) -> (i32, i32, i32) {
    %c0_i32 = arith.constant 0 : i32
    %c0_i32_0 = arith.constant 0 : i32
    %c0_i32_1 = arith.constant 0 : i32
    return %arg0, %c0_i32, %c0_i32_0 : i32, i32, i32
  }
}

</mosaic_0001>

<bundles_post_ra>
// kernel: bert_classifier_forward.1
= control target key start
LH: loop header
LB: loop body
LE: loop exit
PB: predicated region body
PF: predicated region fallthrough
CT: control target
= control target key end

     0   :  { %v4300_v0 = vmov 0   ;;  %v6901_v21 = vlaneseq  ;;  %v4301_v26 = vmov 0.0   ;;  %vm197_vm2 = vcmask 523264   ;;  %s4303_s25 = smov 88   ;;  %s4304_s26 = smov 120   ;;  %s6894_s0 = inlined_call_operand.vmem [shape: s32[1,128,1], index: 0, kind: input, shape index: {}]   ;;  %s6895_s4 = inlined_call_operand.vmem [shape: bf16[288,128], index: 4, kind: input, shape index: {}]   ;;  %s6896_s3 = inlined_call_operand.vmem [shape: f32[128,32], index: 3, kind: input, shape index: {}]   ;;  %s6897_s5 = inlined_call_operand.vmem [shape: f32[16,128], index: 5, kind: input, shape index: {}]   ;;  %s6898_s1 = inlined_call_operand.vmem [shape: f32[1,1,128], index: 1, kind: input, shape index: {}]   ;;  %s6899_s2 = inlined_call_operand.vmem [shape: f32[128,128], index: 2, kind: input, shape index: {}]   ;;  %s6900_s6 = inlined_call_operand.vmem [shape: f32[1,16,128], index: 6, kind: output, shape index: {}]  }
   0x1   :  { %3818 = vset.pattern.permute.xlu1 %v4300_v0  ;;  %3817 = vset.pattern.permute.xlu0 %v4300_v0  ;;  %v26_v1 = vld [vmem:[%s6894_s0 + $0x10] sm:$0xff]  ;;  %v24_v2 = vld [vmem:[%s6894_s0] sm:$0xff]  ;;  %v27_v4 = vld [vmem:[%s6894_s0 + $0x18] sm:$0xff]  ;;  %s4305_s27 = smov 64   ;;  %s4306_s28 = smov 72  }
   0x2   :  { %52 = vperm.xlu1 %3818, %v26_v1   ;;  %46 = vperm.xlu0 %3817, %v24_v2   ;;  %v28_v3 = vld [vmem:[%s6894_s0 + $0x20] sm:$0xff]  ;;  %v25_v5 = vld [vmem:[%s6894_s0 + $0x8] sm:$0xff]  ;;  %v3780_v7 = vld [vmem:[%s6895_s4 + $0x18] sm:$0xff]  ;;  %v4414_v23 = vand.u32 127, %v6901_v21  ;;  %s4307_s29 = smov 80   ;;  %s4308_s30 = smov 104  }
   0x3   :  { %3819 = vset.pattern.permute.xlu2 %v4300_v0  ;;  %v29_v6 = vld [vmem:[%s6894_s0 + $0x28] sm:$0xff]  ;;  %226 = vmatpush.bf16.msra.mxu0 %v3780_v7  ;;  %v31_v8 = vld [vmem:[%s6894_s0 + $0x38] sm:$0xff]  ;;  %v30_v9 = vld [vmem:[%s6894_s0 + $0x30] sm:$0xff]  ;;  %s4309_s7 = smov 112   ;;  %s4310_s8 = smov 56  }
   0x4   :  { %58 = vperm.xlu2 %3819, %v28_v3   ;;  %v32_v10 = vld [vmem:[%s6894_s0 + $0x40] sm:$0xff]  ;;  %v34_v11 = vld [vmem:[%s6894_s0 + $0x50] sm:$0xff]  ;;  %v33_v12 = vld [vmem:[%s6894_s0 + $0x48] sm:$0xff]  ;;  %6945 = vst [vmem:[#allocation2_spill] sm:$0xff] %v4414_v23  ;;  %s4314_s16 = smov 24   ;;  %s4315_s17 = smov 16  }
   0x5   :  { %v35_v13 = vld [vmem:[%s6894_s0 + $0x58] sm:$0xff]  ;;  %v37_v14 = vld [vmem:[%s6894_s0 + $0x68] sm:$0xff]  ;;  %v36_v15 = vld [vmem:[%s6894_s0 + $0x60] sm:$0xff] }
   0x6   :  { %v38_v16 = vld [vmem:[%s6894_s0 + $0x70] sm:$0xff]  ;;  %v39_v17 = vld [vmem:[%s6894_s0 + $0x78] sm:$0xff]  ;;  %v3778_v19 = vld [vmem:[%s6895_s4 + $0x8] sm:$0xff] }
   0x7   :  { %v3779_v18 = vld [vmem:[%s6895_s4 + $0x10] sm:$0xff]  ;;  %v3777_v20 = vld [vmem:[%s6895_s4] sm:$0xff]  ;;  %v3782_v59 = vld [vmem:[%s6895_s4 + $0x28] sm:$0xff] }
   0x8   :  { %227 = vmatpush.bf16.msra.mxu0 %v3779_v18  ;;  %364 = vmatpush.bf16.msra.mxu1 %v3782_v59  ;;  %v3781_v61 = vld [vmem:[%s6895_s4 + $0x20] sm:$0xff]  ;;  %v162_v18 = vld [vmem:[%s6896_s3 + $0x28] sm:$0xff] }
   0x9   :  { %3795 = vmatpush.bf16.msra.mxu2 %v3782_v59  ;;  %3796 = vmatpush.bf16.msra.mxu3 %v3782_v59  ;;  %v157_v3 = vld [vmem:[%s6896_s3] sm:$0xff] }
   0xa   :  { %55 = vperm.xlu1 %3818, %v27_v4   ;;  %49 = vperm.xlu0 %3817, %v25_v5   ;;  %v158_v4 = vld [vmem:[%s6896_s3 + $0x8] sm:$0xff] }
   0xc   :  { %61 = vperm.xlu2 %3819, %v29_v6   ;;  %228 = vmatpush.bf16.msra.mxu0 %v3778_v19 }
   0xd   :  { %365 = vmatpush.bf16.msra.mxu1 %v3781_v61  ;;  %3797 = vmatpush.bf16.msra.mxu2 %v3781_v61 }
   0xe   :  { %3798 = vmatpush.bf16.msra.mxu3 %v3781_v61 }
  0x10   :  { %229 = vmatpush.bf16.msra.mxu0 %v3777_v20 }
  0x12   :  { %67 = vperm.xlu1 %3818, %v31_v8   ;;  %64 = vperm.xlu0 %3817, %v30_v9  }
  0x14   :  { %70 = vperm.xlu2 %3819, %v32_v10   ;;  %v159_v10 = vld [vmem:[%s6896_s3 + $0x10] sm:$0xff] }
  0x1a   :  { %76 = vperm.xlu1 %3818, %v34_v11   ;;  %73 = vperm.xlu0 %3817, %v33_v12   ;;  %v160_v11 = vld [vmem:[%s6896_s3 + $0x18] sm:$0xff] }
  0x1c   :  { %79 = vperm.xlu2 %3819, %v35_v13  }
  0x22   :  { %85 = vperm.xlu1 %3818, %v37_v14   ;;  %82 = vperm.xlu0 %3817, %v36_v15  }
  0x24   :  { %88 = vperm.xlu2 %3819, %v38_v16  }
  0x2a   :  { %91 = vperm.xlu0 %3817, %v39_v17   ;;  %v161_v17 = vld [vmem:[%s6896_s3 + $0x20] sm:$0xff] }
  0x5e   :  { %v59_v33 = vpop.permute.xlu2 %58 }
  0x5f   :  { %vm97_vm5 = vcmp.eq.s32.totalorder %v4414_v23, %v59_v33  ;;  %v165_v33 = vld [vmem:[%s6896_s3 + $0x40] sm:$0xff] }
  0x60   :  { %v3615_v36 = vsel %vm97_vm5, 1.0, %v4301_v26  ;;  %vm2217_vm5 = vcmask 195584  }
  0x66   :  { %v62_v35 = vpop.permute.xlu2 %61 }
  0x67   :  { %vm98_vm6 = vcmp.eq.s32.totalorder %v4414_v23, %v62_v35 }
  0x68   :  { %v3616_v37 = vsel %vm98_vm6, 1.0, %v4301_v26 }
  0x69   :  { %v143_v38 = vpack.c.bf16 %v3616_v37, %v3615_v36 }
  0x6e   :  { %v71_v45 = vpop.permute.xlu2 %70 }
  0x6f   :  { %vm101_vm9 = vcmp.eq.s32.totalorder %v4414_v23, %v71_v45 }
  0x70   :  { %v3619_v46 = vsel %vm101_vm9, 1.0, %v4301_v26 }
  0x74   :  { %v47_v22 = vpop.permute.xlu0 %46  ;;  %v53_v25 = vpop.permute.xlu1 %52 }
  0x75   :  { %vm93_vm0 = vcmp.eq.s32.totalorder %v4414_v23, %v47_v22  ;;  %vm95_vm3 = vcmp.eq.s32.totalorder %v4414_v23, %v53_v25 }
  0x76   :  { %v3611_v27 = vsel %vm93_vm0, 1.0, %v4301_v26  ;;  %v3613_v31 = vsel %vm95_vm3, 1.0, %v4301_v26  ;;  %v80_v49 = vpop.permute.xlu2 %79  ;;  %vm479_vm3 = vcmask 64512  }
  0x77   :  { %vm104_vm11 = vcmp.eq.s32.totalorder %v4414_v23, %v80_v49 }
  0x78   :  { %v3622_v51 = vsel %vm104_vm11, 1.0, %v4301_v26 }
  0x7c   :  { %v50_v24 = vpop.permute.xlu0 %49  ;;  %v56_v30 = vpop.permute.xlu1 %55 }
  0x7d   :  { %vm94_vm1 = vcmp.eq.s32.totalorder %v4414_v23, %v50_v24  ;;  %vm96_vm4 = vcmp.eq.s32.totalorder %v4414_v23, %v56_v30 }
  0x7e   :  { %v3612_v28 = vsel %vm94_vm1, 1.0, %v4301_v26  ;;  %v3614_v32 = vsel %vm96_vm4, 1.0, %v4301_v26  ;;  %v89_v62 = vpop.permute.xlu2 %88  ;;  %vm333_vm1 = vcmask 261120   ;;  %vm2200_vm4 = vcmask 130048  }
  0x7f   :  { %v141_v29 = vpack.c.bf16 %v3612_v28, %v3611_v27  ;;  %v142_v34 = vpack.c.bf16 %v3614_v32, %v3613_v31  ;;  %vm107_vm0 = vcmp.eq.s32.totalorder %v4414_v23, %v89_v62  ;;  %v164_v27 = vld [vmem:[%s6896_s3 + $0x38] sm:$0xff] }
  0x80   :  { %v3625_v0 = vsel %vm107_vm0, 1.0, %v4301_v26 }
  0x81   :  { %3643 = vmatmul.msk.bf16.vlgmr.msra.gmra.mxu0 %vm197_vm2, %v141_v29 }
  0x84   :  { %v68_v39 = vpop.permute.xlu1 %67  ;;  %v65_v40 = vpop.permute.xlu0 %64 }
  0x85   :  { %vm100_vm7 = vcmp.eq.s32.totalorder %v4414_v23, %v68_v39  ;;  %vm99_vm8 = vcmp.eq.s32.totalorder %v4414_v23, %v65_v40  ;;  %v167_v40 = vld [vmem:[%s6896_s3 + $0x50] sm:$0xff] }
  0x86   :  { %v3618_v41 = vsel %vm100_vm7, 1.0, %v4301_v26  ;;  %v3617_v42 = vsel %vm99_vm8, 1.0, %v4301_v26 }
  0x87   :  { %v144_v43 = vpack.c.bf16 %v3618_v41, %v3617_v42  ;;  %v168_v41 = vld [vmem:[%s6896_s3 + $0x58] sm:$0xff] }
  0x8c   :  { %v74_v44 = vpop.permute.xlu0 %73  ;;  %v77_v50 = vpop.permute.xlu1 %76 }
  0x8d   :  { %vm102_vm10 = vcmp.eq.s32.totalorder %v4414_v23, %v74_v44  ;;  %vm103_vm12 = vcmp.eq.s32.totalorder %v4414_v23, %v77_v50 }
  0x8e   :  { %v3620_v47 = vsel %vm102_vm10, 1.0, %v4301_v26  ;;  %v3621_v52 = vsel %vm103_vm12, 1.0, %v4301_v26 }
  0x8f   :  { %v145_v48 = vpack.c.bf16 %v3620_v47, %v3619_v46  ;;  %v146_v53 = vpack.c.bf16 %v3622_v51, %v3621_v52  ;;  %v169_v47 = vld [vmem:[%s6896_s3 + $0x60] sm:$0xff] }
  0x91   :  { %3644 = vmatmul.msk.bf16.gmra.mxu0 %vm197_vm2, %v142_v34  ;;  %v166_v34 = vld [vmem:[%s6896_s3 + $0x48] sm:$0xff] }
  0x94   :  { %v86_v54 = vpop.permute.xlu1 %85  ;;  %v83_v55 = vpop.permute.xlu0 %82 }
  0x95   :  { %vm106_vm13 = vcmp.eq.s32.totalorder %v4414_v23, %v86_v54  ;;  %vm105_vm14 = vcmp.eq.s32.totalorder %v4414_v23, %v83_v55  ;;  %v171_v54 = vld [vmem:[%s6896_s3 + $0x70] sm:$0xff]  ;;  %v172_v55 = vld [vmem:[%s6896_s3 + $0x78] sm:$0xff] }
  0x96   :  { %v3624_v56 = vsel %vm106_vm13, 1.0, %v4301_v26  ;;  %v3623_v57 = vsel %vm105_vm14, 1.0, %v4301_v26 }
  0x97   :  { %v147_v58 = vpack.c.bf16 %v3624_v56, %v3623_v57 }
  0x9c   :  { %v92_v60 = vpop.permute.xlu0 %91 }
  0x9d   :  { %vm108_vm15 = vcmp.eq.s32.totalorder %v4414_v23, %v92_v60 }
  0x9e   :  { %v3626_v63 = vsel %vm108_vm15, 1.0, %v4301_v26  ;;  %v163_v26 = vld [vmem:[%s6896_s3 + $0x30] sm:$0xff] }
  0x9f   :  { %v148_v1 = vpack.c.bf16 %v3626_v63, %v3625_v0 }
  0xa1   :  { %3645 = vmatmul.msk.bf16.gmra.mxu0 %vm197_vm2, %v143_v38 }
  0xb1   :  { %3646 = vmatmul.msk.bf16.gmra.mxu0 %vm197_vm2, %v144_v43 }
  0xc1   :  { %3647 = vmatmul.msk.bf16.gmra.mxu0 %vm197_vm2, %v145_v48  ;;  %v170_v48 = vld [vmem:[%s6896_s3 + $0x68] sm:$0xff]  ;;  %s4302_s3 = smov 96  }
  0xd1   :  { %3648 = vmatmul.msk.bf16.gmra.mxu0 %vm197_vm2, %v146_v53 }
  0xe1   :  { %3649 = vmatmul.msk.bf16.gmra.mxu0 %vm197_vm2, %v147_v58 }
  0xf1   :  { %3650 = vmatmul.msk.bf16.gmra.mxu0 %vm197_vm2, %v148_v1 }
  0xfe   :  { %v231_v2 = vpop.f32.mrf.mxu0 }
  0xff   :  { %v4468_v6 = vadd.f32 %v231_v2, %v157_v3  ;;  %v41_v2 = vld [vmem:[%s6897_s5] sm:$0xff] }
 0x101   :  { %6946 = vst [vmem:[#allocation3_spill] sm:$0xff] %v4468_v6 }
 0x106   :  { %v233_v5 = vpop.f32.mrf.mxu0 }
 0x107   :  { %v4470_v7 = vadd.f32 %v233_v5, %v158_v4  ;;  %v4569_v4 = vperm.slane %v41_v2, 0 }
 0x109   :  { %6947 = vst [vmem:[#allocation4_spill] sm:$0xff] %v4470_v7  ;;  %v308_v8 = vpack.c.bf16 %v4470_v7, %v4468_v6 }
 0x10b   :  { %3659 = vmatmul.msk.bf16.vlgmr.msra.gmra.mxu1 %vm333_vm1, %v308_v8 }
 0x10e   :  { %v236_v9 = vpop.f32.mrf.mxu0 }
 0x10f   :  { %v4481_v13 = vadd.f32 %v236_v9, %v159_v10 }
 0x111   :  { %6948 = vst [vmem:[#allocation5_spill] sm:$0xff] %v4481_v13 }
 0x116   :  { %v238_v12 = vpop.f32.mrf.mxu0 }
 0x117   :  { %v4483_v14 = vadd.f32 %v238_v12, %v160_v11 }
 0x119   :  { %6949 = vst [vmem:[#allocation6_spill] sm:$0xff] %v4483_v14  ;;  %v309_v15 = vpack.c.bf16 %v4483_v14, %v4481_v13 }
 0x11b   :  { %3660 = vmatmul.msk.bf16.gmra.mxu1 %vm333_vm1, %v309_v15 }
 0x11e   :  { %v241_v16 = vpop.f32.mrf.mxu0 }
 0x11f   :  { %v4494_v20 = vadd.f32 %v241_v16, %v161_v17 }
 0x121   :  { %6950 = vst [vmem:[#allocation7_spill] sm:$0xff] %v4494_v20 }
 0x126   :  { %v243_v19 = vpop.f32.mrf.mxu0 }
 0x127   :  { %v4496_v22 = vadd.f32 %v243_v19, %v162_v18 }
 0x129   :  { %6951 = vst [vmem:[#allocation8_spill] sm:$0xff] %v4496_v22  ;;  %v310_v24 = vpack.c.bf16 %v4496_v22, %v4494_v20 }
 0x12b   :  { %3661 = vmatmul.msk.bf16.gmra.mxu1 %vm333_vm1, %v310_v24 }
 0x12e   :  { %v246_v25 = vpop.f32.mrf.mxu0 }
 0x12f   :  { %v4507_v29 = vadd.f32 %v246_v25, %v163_v26 }
 0x131   :  { %6952 = vst [vmem:[#allocation9_spill] sm:$0xff] %v4507_v29 }
 0x136   :  { %v248_v28 = vpop.f32.mrf.mxu0 }
 0x137   :  { %v4509_v30 = vadd.f32 %v248_v28, %v164_v27 }
 0x139   :  { %6953 = vst [vmem:[#allocation10_spill] sm:$0xff] %v4509_v30  ;;  %v311_v31 = vpack.c.bf16 %v4509_v30, %v4507_v29 }
 0x13b   :  { %3662 = vmatmul.msk.bf16.gmra.mxu1 %vm333_vm1, %v311_v31 }
 0x13e   :  { %v251_v32 = vpop.f32.mrf.mxu0 }
 0x13f   :  { %v4520_v36 = vadd.f32 %v251_v32, %v165_v33 }
 0x141   :  { %6954 = vst [vmem:[#allocation11_spill] sm:$0xff] %v4520_v36 }
 0x146   :  { %v253_v35 = vpop.f32.mrf.mxu0 }
 0x147   :  { %v4522_v37 = vadd.f32 %v253_v35, %v166_v34 }
 0x149   :  { %6955 = vst [vmem:[#allocation12_spill] sm:$0xff] %v4522_v37  ;;  %v312_v38 = vpack.c.bf16 %v4522_v37, %v4520_v36 }
 0x14b   :  { %3663 = vmatmul.msk.bf16.vlgmr.msra.gmra.mxu2 %vm333_vm1, %v312_v38 }
 0x14e   :  { %v256_v39 = vpop.f32.mrf.mxu0 }
 0x14f   :  { %v4533_v43 = vadd.f32 %v256_v39, %v167_v40 }
 0x151   :  { %6956 = vst [vmem:[#allocation13_spill] sm:$0xff] %v4533_v43 }
 0x156   :  { %v258_v42 = vpop.f32.mrf.mxu0 }
 0x157   :  { %v4535_v44 = vadd.f32 %v258_v42, %v168_v41 }
 0x159   :  { %6957 = vst [vmem:[#allocation14_spill] sm:$0xff] %v4535_v44  ;;  %v313_v45 = vpack.c.bf16 %v4535_v44, %v4533_v43 }
 0x15b   :  { %3664 = vmatmul.msk.bf16.vlgmr.msra.gmra.mxu3 %vm333_vm1, %v313_v45 }
 0x15e   :  { %v261_v46 = vpop.f32.mrf.mxu0 }
 0x15f   :  { %v4546_v50 = vadd.f32 %v261_v46, %v169_v47 }
 0x161   :  { %6958 = vst [vmem:[#allocation15_spill] sm:$0xff] %v4546_v50 }
 0x166   :  { %v263_v49 = vpop.f32.mrf.mxu0 }
 0x167   :  { %v4548_v51 = vadd.f32 %v263_v49, %v170_v48 }
 0x169   :  { %6959 = vst [vmem:[#allocation16_spill] sm:$0xff] %v4548_v51  ;;  %v314_v52 = vpack.c.bf16 %v4548_v51, %v4546_v50 }
 0x16b   :  { %3665 = vmatmul.msk.bf16.gmra.mxu3 %vm333_vm1, %v314_v52 }
 0x16e   :  { %v266_v53 = vpop.f32.mrf.mxu0 }
 0x16f   :  { %v4559_v57 = vadd.f32 %v266_v53, %v171_v54 }
 0x171   :  { %6960 = vst [vmem:[#allocation17_spill] sm:$0xff] %v4559_v57 }
 0x176   :  { %v268_v56 = vpop.f32.mrf.mxu0 }
 0x177   :  { %v4561_v58 = vadd.f32 %v268_v56, %v172_v55 }
 0x179   :  { %6961 = vst [vmem:[#allocation18_spill] sm:$0xff] %v4561_v58  ;;  %v315_v59 = vpack.c.bf16 %v4561_v58, %v4559_v57 }
 0x17b   :  { %3666 = vmatmul.msk.bf16.gmra.mxu3 %vm333_vm1, %v315_v59 }
 0x188   :  { %v367_v60 = vpop.f32.mrf.mxu1 }
 0x190   :  { %v369_v61 = vpop.f32.mrf.mxu1 }
 0x198   :  { %v372_v62 = vpop.f32.mrf.mxu1 }
 0x1a0   :  { %v374_v63 = vpop.f32.mrf.mxu1 }
 0x1a1   :  { %v375_v2 = vadd.f32 %v374_v63, %v4569_v4 }
 0x1a8   :  { %v377_v0 = vpop.f32.mrf.mxu1 }
 0x1a9   :  { %v378_v41 = vadd.f32 %v377_v0, %v4569_v4 }
 0x1ab   :  { %v411_v49 = vpack.c.bf16 %v378_v41, %v378_v41 }
 0x1ad   :  { %v443_v53 = vunpack.c.l.b16 %v411_v49 }
 0x1b0   :  { %v379_v1 = vpop.f32.mrf.mxu1 }
 0x1b1   :  { %v380_v39 = vadd.f32 %v379_v1, %v4569_v4  ;;  %v370_v1 = vadd.f32 %v369_v61, %v4569_v4 }
 0x1b3   :  { %v412_v46 = vpack.c.bf16 %v380_v39, %v380_v39 }
 0x1b5   :  { %v444_v52 = vunpack.c.l.b16 %v412_v46 }
 0x1b7   :  { %v4592_v55 = vpack.c.b16 %v444_v52, %v443_v53 }
 0x1b8   :  { %v382_v3 = vpop.f32.mrf.mxu1 }
 0x1b9   :  { %v383_v5 = vadd.f32 %v382_v3, %v4569_v4  ;;  %6964 = vst [vmem:[#allocation21_spill] sm:$0xff] %v4592_v55 }
 0x1bb   :  { %v413_v9 = vpack.c.bf16 %v383_v5, %v383_v5  ;;  %v368_v5 = vadd.f32 %v367_v60, %v4569_v4 }
 0x1bd   :  { %v445_v12 = vunpack.c.l.b16 %v413_v9 }
 0x1c0   :  { %v384_v8 = vpop.f32.mrf.mxu1 }
 0x1c1   :  { %v385_v10 = vadd.f32 %v384_v8, %v4569_v4  ;;  %v373_v8 = vadd.f32 %v372_v62, %v4569_v4 }
 0x1c3   :  { %v414_v11 = vpack.c.bf16 %v385_v10, %v385_v10 }
 0x1c5   :  { %v446_v15 = vunpack.c.l.b16 %v414_v11  ;;  %v408_v11 = vpack.c.bf16 %v370_v1, %v370_v1 }
 0x1c7   :  { %v4573_v16 = vpack.c.b16 %v446_v15, %v445_v12  ;;  %v410_v12 = vpack.c.bf16 %v375_v2, %v375_v2  ;;  %v440_v61 = vunpack.c.l.b16 %v408_v11 }
 0x1c9   :  { %6962 = vst [vmem:[#allocation19_spill] sm:$0xff] %v4573_v16  ;;  %469 = vrot.lane.b32.xlu2 %v4573_v16, %s4302_s3  ;;  %v442_v60 = vunpack.c.l.b16 %v410_v12 }
 0x1ce   :  { %v387_v17 = vpop.f32.mrf.mxu2 }
 0x1cf   :  { %v388_v18 = vadd.f32 %v387_v17, %v4569_v4 }
 0x1d1   :  { %v415_v24 = vpack.c.bf16 %v388_v18, %v388_v18  ;;  %v407_v18 = vpack.c.bf16 %v368_v5, %v368_v5 }
 0x1d3   :  { %v447_v27 = vunpack.c.l.b16 %v415_v24  ;;  %v439_v63 = vunpack.c.l.b16 %v407_v18 }
 0x1d6   :  { %v389_v19 = vpop.f32.mrf.mxu2 }
 0x1d7   :  { %v390_v25 = vadd.f32 %v389_v19, %v4569_v4  ;;  %v409_v19 = vpack.c.bf16 %v373_v8, %v373_v8 }
 0x1d9   :  { %v416_v26 = vpack.c.bf16 %v390_v25, %v390_v25  ;;  %v441_v62 = vunpack.c.l.b16 %v409_v19  ;;  %v4608_v25 = vpack.c.b16 %v440_v61, %v439_v63 }
 0x1db   :  { %v448_v28 = vunpack.c.l.b16 %v416_v26  ;;  %6965 = vst [vmem:[#allocation22_spill] sm:$0xff] %v4608_v25  ;;  %v4610_v26 = vpack.c.b16 %v442_v60, %v441_v62 }
 0x1dd   :  { %v4579_v31 = vpack.c.b16 %v448_v28, %v447_v27  ;;  %6966 = vst [vmem:[#allocation23_spill] sm:$0xff] %v4610_v26 }
 0x1de   :  { %v392_v32 = vpop.f32.mrf.mxu3 }
 0x1df   :  { %6963 = vst [vmem:[#allocation20_spill] sm:$0xff] %v4579_v31  ;;  %471 = vrot.lane.b32.xlu1 %v4579_v31, %s4302_s3  ;;  %v393_v33 = vadd.f32 %v392_v32, %v4569_v4 }
 0x1e1   :  { %v417_v35 = vpack.c.bf16 %v393_v33, %v393_v33 }
 0x1e3   :  { %v449_v42 = vunpack.c.l.b16 %v417_v35 }
 0x1e6   :  { %v394_v34 = vpop.f32.mrf.mxu3 }
 0x1e7   :  { %v395_v38 = vadd.f32 %v394_v34, %v4569_v4 }
 0x1e9   :  { %v418_v40 = vpack.c.bf16 %v395_v38, %v395_v38 }
 0x1eb   :  { %v450_v45 = vunpack.c.l.b16 %v418_v40 }
 0x1ed   :  { %v4587_v47 = vpack.c.b16 %v450_v45, %v449_v42 }
 0x1ee   :  { %v397_v48 = vpop.f32.mrf.mxu3 }
 0x1ef   :  { %473 = vrot.lane.b32.xlu0 %v4587_v47, %s4302_s3  ;;  %v398_v54 = vadd.f32 %v397_v48, %v4569_v4 }
 0x1f1   :  { %v419_v59 = vpack.c.bf16 %v398_v54, %v398_v54 }
 0x1f3   :  { %v451_v9 = vunpack.c.l.b16 %v419_v59 }
 0x1f6   :  { %v399_v56 = vpop.f32.mrf.mxu3 }
 0x1f7   :  { %v400_v0 = vadd.f32 %v399_v56, %v4569_v4  ;;  %467 = vrot.lane.b32.xlu0 %v4592_v55, %s4302_s3 }
 0x1f9   :  { %v420_v3 = vpack.c.bf16 %v400_v0, %v400_v0 }
 0x1fb   :  { %v452_v10 = vunpack.c.l.b16 %v420_v3 }
 0x1fd   :  { %v4601_v15 = vpack.c.b16 %v452_v10, %v451_v9 }
 0x1fe   :  { %v402_v17 = vpop.f32.mrf.mxu3 }
 0x1ff   :  { %854 = vrot.lane.b32.xlu0 %v4592_v55, %s4303_s25  ;;  %475 = vrot.lane.b32.xlu2 %v4601_v15, %s4302_s3  ;;  %v403_v24 = vadd.f32 %v402_v17, %v4569_v4 }
 0x201   :  { %v421_v28 = vpack.c.bf16 %v403_v24, %v403_v24 }
 0x203   :  { %v453_v34 = vunpack.c.l.b16 %v421_v28 }
 0x206   :  { %v404_v27 = vpop.f32.mrf.mxu3 }
 0x207   :  { %v405_v32 = vadd.f32 %v404_v27, %v4569_v4  ;;  %852 = vrot.lane.b32.xlu0 %v4610_v26, %s4303_s25  ;;  %463 = vrot.lane.b32.xlu2 %v4608_v25, %s4302_s3 }
 0x209   :  { %v422_v33 = vpack.c.bf16 %v405_v32, %v405_v32 }
 0x20b   :  { %v454_v35 = vunpack.c.l.b16 %v422_v33 }
 0x20d   :  { %v4617_v38 = vpack.c.b16 %v454_v35, %v453_v34 }
 0x20f   :  { %6967 = vst [vmem:[#allocation24_spill] sm:$0xff] %v4617_v38  ;;  %850 = vrot.lane.b32.xlu0 %v4608_v25, %s4303_s25  ;;  %860 = vrot.lane.b32.xlu2 %v4587_v47, %s4303_s25 }
 0x210   :  { %477 = vrot.lane.b32.xlu1 %v4617_v38, %s4302_s3 }
 0x217   :  { %840 = vrot.lane.b32.xlu0 %v4573_v16, %s4304_s26  ;;  %858 = vrot.lane.b32.xlu2 %v4579_v31, %s4303_s25 }
 0x218   :  { %465 = vrot.lane.b32.xlu1 %v4610_v26, %s4302_s3 }
 0x21f   :  { %842 = vrot.lane.b32.xlu0 %v4579_v31, %s4304_s26  ;;  %769 = vrot.lane.b32.xlu2 %v4579_v31, %s4305_s27 }
 0x220   :  { %862 = vrot.lane.b32.xlu1 %v4601_v15, %s4303_s25 }
 0x223   :  { %v4673_v4 = vpop.permute.xlu2 %469 }
 0x224   :  { %v514_v62 = vsel %vm479_vm3, %v4673_v4, 0 }
 0x227   :  { %1634 = vrot.lane.b32.xlu0 %v4601_v15, %s4306_s28  ;;  %765 = vrot.lane.b32.xlu2 %v4592_v55, %s4305_s27 }
 0x228   :  { %773 = vrot.lane.b32.xlu1 %v4601_v15, %s4305_s27 }
 0x22f   :  { %844 = vrot.lane.b32.xlu0 %v4587_v47, %s4304_s26  ;;  %761 = vrot.lane.b32.xlu2 %v4608_v25, %s4305_s27 }
 0x230   :  { %771 = vrot.lane.b32.xlu1 %v4587_v47, %s4305_s27 }
 0x237   :  { %1632 = vrot.lane.b32.xlu0 %v4587_v47, %s4306_s28  ;;  %838 = vrot.lane.b32.xlu2 %v4592_v55, %s4304_s26 }
 0x238   :  { %856 = vrot.lane.b32.xlu1 %v4573_v16, %s4303_s25 }
 0x23f   :  { %1242 = vrot.lane.b32.xlu0 %v4573_v16, %s4307_s29  ;;  %1248 = vrot.lane.b32.xlu2 %v4601_v15, %s4307_s29 }
 0x240   :  { %767 = vrot.lane.b32.xlu1 %v4573_v16, %s4305_s27 }
 0x247   :  { %1238 = vrot.lane.b32.xlu0 %v4610_v26, %s4307_s29  ;;  %1246 = vrot.lane.b32.xlu2 %v4587_v47, %s4307_s29 }
 0x248   :  { %763 = vrot.lane.b32.xlu1 %v4610_v26, %s4305_s27 }
 0x24f   :  { %1624 = vrot.lane.b32.xlu0 %v4610_v26, %s4306_s28  ;;  %1630 = vrot.lane.b32.xlu2 %v4579_v31, %s4306_s28 }
 0x250   :  { %834 = vrot.lane.b32.xlu1 %v4608_v25, %s4304_s26 }
 0x251   :  { %v472_v53 = vpop.permute.xlu1 %471 }
 0x252   :  { %v517_v19 = vsel %vm479_vm3, %v472_v53, 0 }
 0x257   :  { %1606 = vrot.lane.b32.xlu0 %v4608_v25, %s4308_s30  ;;  %1240 = vrot.lane.b32.xlu2 %v4592_v55, %s4307_s29 }
 0x258   :  { %836 = vrot.lane.b32.xlu1 %v4610_v26, %s4304_s26 }
 0x259   :  { %v476_v39 = vpop.permute.xlu2 %475 }
 0x25a   :  { %v523_v5 = vsel %vm479_vm3, %v476_v39, 0 }
 0x25f   :  { %1224 = vrot.lane.b32.xlu0 %v4592_v55, %s4309_s7  ;;  %1628 = vrot.lane.b32.xlu2 %v4573_v16, %s4306_s28 }
 0x260   :  { %1244 = vrot.lane.b32.xlu1 %v4579_v31, %s4307_s29 }
 0x261   :  { %v4687_v40 = vpop.permute.xlu2 %463  ;;  %v474_v41 = vpop.permute.xlu0 %473 }
 0x262   :  { %v520_v11 = vsel %vm479_vm3, %v474_v41, 0  ;;  %v505_v53 = vsel %vm479_vm3, %v4687_v40, 0 }
 0x267   :  { %1612 = vrot.lane.b32.xlu0 %v4573_v16, %s4308_s30  ;;  %1626 = vrot.lane.b32.xlu2 %v4592_v55, %s4306_s28 }
 0x268   :  { %846 = vrot.lane.b32.xlu1 %v4601_v15, %s4304_s26 }
 0x269   :  { %v4695_v42 = vpop.permute.xlu2 %860  ;;  %v468_v45 = vpop.permute.xlu0 %467 }
 0x26a   :  { %v511_v32 = vsel %vm479_vm3, %v468_v45, 0 }
 0x26f   :  { %1228 = vrot.lane.b32.xlu0 %v4579_v31, %s4309_s7  ;;  %1236 = vrot.lane.b32.xlu2 %v4608_v25, %s4307_s29 }
 0x270   :  { %1622 = vrot.lane.b32.xlu1 %v4608_v25, %s4306_s28 }
 0x271   :  { %v4703_v46 = vpop.permute.xlu2 %858  ;;  %v4705_v48 = vpop.permute.xlu0 %854 }
 0x277   :  { %1614 = vrot.lane.b32.xlu0 %v4579_v31, %s4308_s30  ;;  %1220 = vrot.lane.b32.xlu2 %v4608_v25, %s4309_s7 }
 0x278   :  { %1608 = vrot.lane.b32.xlu1 %v4610_v26, %s4308_s30 }
 0x279   :  { %v4713_v49 = vpop.permute.xlu2 %769  ;;  %v4715_v52 = vpop.permute.xlu0 %852 }
 0x27f   :  { %1155 = vrot.lane.b32.xlu0 %v4579_v31, %s4310_s8  ;;  %1222 = vrot.lane.b32.xlu2 %v4610_v26, %s4309_s7 }
 0x280   :  { %1226 = vrot.lane.b32.xlu1 %v4573_v16, %s4309_s7 }
 0x281   :  { %v4723_v54 = vpop.permute.xlu2 %765  ;;  %v4725_v56 = vpop.permute.xlu0 %850 }
 0x282   :  { %v478_v59 = vpop.permute.xlu1 %477 }
 0x283   :  { %v526_v0 = vsel %vm479_vm3, %v478_v59, 0 }
 0x284   :  { %528 = vmatpush.bf16.xpose.msrb.mxu2 %v526_v0 }
 0x287   :  { %1610 = vrot.lane.b32.xlu2 %v4592_v55, %s4308_s30  ;;  %775 = vrot.lane.b32.xlu0 %v4617_v38, %s4305_s27 }
 0x288   :  { %1230 = vrot.lane.b32.xlu1 %v4587_v47, %s4309_s7 }
 0x289   :  { %v4734_v1 = vpop.permute.xlu2 %761  ;;  %v4736_v2 = vpop.permute.xlu0 %840 }
 0x28a   :  { %v466_v3 = vpop.permute.xlu1 %465 }
 0x28b   :  { %v508_v4 = vsel %vm479_vm3, %v466_v3, 0 }
 0x28c   :  { %529 = vmatpush.bf16.xpose.msrb.mxu2 %v523_v5 }
 0x28f   :  { %1616 = vrot.lane.b32.xlu2 %v4587_v47, %s4308_s30  ;;  %1161 = vrot.lane.b32.xlu0 %v4617_v38, %s4310_s8 }
 0x290   :  { %1153 = vrot.lane.b32.xlu1 %v4573_v16, %s4310_s8 }
 0x291   :  { %v4745_v8 = vpop.permute.xlu2 %838  ;;  %v4747_v9 = vpop.permute.xlu0 %842 }
 0x292   :  { %v4749_v10 = vpop.permute.xlu1 %862 }
 0x294   :  { %530 = vmatpush.bf16.xpose.msrb.mxu2 %v520_v11 }
 0x297   :  { %1232 = vrot.lane.b32.xlu2 %v4601_v15, %s4309_s7 }
 0x298   :  { %1151 = vrot.lane.b32.xlu1 %v4592_v55, %s4310_s8 }
 0x299   :  { %v4756_v12 = vpop.permute.xlu2 %1248  ;;  %v4758_v17 = vpop.permute.xlu0 %1634 }
 0x29a   :  { %v774_v18 = vpop.permute.xlu1 %773 }
 0x29c   :  { %531 = vmatpush.bf16.xpose.msrb.mxu2 %v517_v19 }
 0x29f   :  { %1159 = vrot.lane.b32.xlu2 %v4601_v15, %s4310_s8 }
 0x2a0   :  { %1250 = vrot.lane.b32.xlu1 %v4617_v38, %s4307_s29 }
 0x2a1   :  { %v4765_v61 = vpop.permute.xlu2 %1246  ;;  %v4767_v60 = vpop.permute.xlu0 %844 }
 0x2a2   :  { %v772_v63 = vpop.permute.xlu1 %771 }
 0x2a4   :  { %532 = vmatpush.bf16.xpose.msrb.mxu2 %v514_v62 }
 0x2a7   :  { %1157 = vrot.lane.b32.xlu2 %v4587_v47, %s4310_s8 }
 0x2a8   :  { %848 = vrot.lane.b32.xlu1 %v4617_v38, %s4304_s26 }
 0x2a9   :  { %v4775_v24 = vpop.permute.xlu2 %1630  ;;  %v4777_v27 = vpop.permute.xlu0 %1632 }
 0x2aa   :  { %v4779_v28 = vpop.permute.xlu1 %856 }
 0x2ac   :  { %533 = vmatpush.bf16.xpose.msrb.mxu2 %v511_v32 }
 0x2af   :  { %1618 = vrot.lane.b32.xlu2 %v4601_v15, %s4308_s30 }
 0x2b0   :  { %1234 = vrot.lane.b32.xlu1 %v4617_v38, %s4309_s7 }
 0x2b1   :  { %v4786_v33 = vpop.permute.xlu2 %1240  ;;  %v4788_v34 = vpop.permute.xlu0 %1242 }
 0x2b2   :  { %v768_v35 = vpop.permute.xlu1 %767 }
 0x2b4   :  { %534 = vmatpush.bf16.xpose.msrb.mxu2 %v508_v4 }
 0x2b7   :  { %864 = vrot.lane.b32.xlu2 %v4617_v38, %s4303_s25 }
 0x2b9   :  { %v4793_v39 = vpop.permute.xlu2 %1628  ;;  %v4795_v41 = vpop.permute.xlu0 %1238 }
 0x2ba   :  { %v764_v45 = vpop.permute.xlu1 %763 }
 0x2bc   :  { %535 = vmatpush.bf16.xpose.msrb.mxu2 %v505_v53 }
 0x2bf   :  { %1636 = vrot.lane.b32.xlu2 %v4617_v38, %s4306_s28 }
 0x2c1   :  { %v4801_v59 = vpop.permute.xlu2 %1626  ;;  %v4803_v0 = vpop.permute.xlu0 %1624 }
 0x2c2   :  { %v4805_v3 = vpop.permute.xlu1 %834 }
 0x2c3   :  { %3667 = vmatmul.msk.bf16.vlgmr.msrb.gmra.mxu2 %vm479_vm3, %v4608_v25 }
 0x2c9   :  { %v4809_v5 = vpop.permute.xlu2 %1236  ;;  %v4811_v11 = vpop.permute.xlu0 %1606 }
 0x2ca   :  { %v4813_v19 = vpop.permute.xlu1 %836 }
 0x2d1   :  { %v4815_v40 = vpop.permute.xlu2 %1220  ;;  %v4817_v62 = vpop.permute.xlu0 %1224 }
 0x2d2   :  { %6968 = vst [vmem:[#allocation25_spill] sm:$0xff] %v4815_v40  ;;  %v1245_v32 = vpop.permute.xlu1 %1244 }
 0x2d3   :  { %6969 = vst [vmem:[#allocation26_spill] sm:$0xff] %v4817_v62  ;;  %3668 = vmatmul.msk.bf16.gmra.mxu2 %vm479_vm3, %v4610_v26 }
 0x2d9   :  { %v4821_v4 = vpop.permute.xlu2 %1222  ;;  %v4823_v53 = vpop.permute.xlu0 %1612 }
 0x2da   :  { %6970 = vst [vmem:[#allocation27_spill] sm:$0xff] %v4821_v4  ;;  %v4825_v21 = vpop.permute.xlu1 %846 }
 0x2e1   :  { %v4827_v23 = vpop.permute.xlu2 %1610  ;;  %v4829_v58 = vpop.permute.xlu0 %1228 }
 0x2e2   :  { %6971 = vst [vmem:[#allocation28_spill] sm:$0xff] %v4829_v58  ;;  %v4831_v57 = vpop.permute.xlu1 %1622 }
 0x2e3   :  { %3669 = vmatmul.msk.bf16.gmra.mxu2 %vm479_vm3, %v4592_v55 }
 0x2e9   :  { %v4835_v51 = vpop.permute.xlu2 %1616  ;;  %v4837_v50 = vpop.permute.xlu0 %1614 }
 0x2ea   :  { %v4839_v44 = vpop.permute.xlu1 %1608 }
 0x2f1   :  { %v4841_v43 = vpop.permute.xlu2 %1232  ;;  %v1156_v37 = vpop.permute.xlu0 %1155 }
 0x2f2   :  { %6972 = vst [vmem:[#allocation29_spill] sm:$0xff] %v4841_v43  ;;  %v4843_v36 = vpop.permute.xlu1 %1226 }
 0x2f3   :  { %6973 = vst [vmem:[#allocation30_spill] sm:$0xff] %v4843_v36  ;;  %3670 = vmatmul.msk.bf16.gmra.mxu2 %vm479_vm3, %v4573_v16 }
 0x2f9   :  { %v1160_v30 = vpop.permute.xlu2 %1159  ;;  %v776_v29 = vpop.permute.xlu0 %775 }
 0x2fa   :  { %v4847_v22 = vpop.permute.xlu1 %1230  ;;  %785 = vmatpush.bf16.msrb.mxu3 %v776_v29 }
 0x2fb   :  { %6974 = vst [vmem:[#allocation31_spill] sm:$0xff] %v4847_v22 }
 0x2fe   :  { %786 = vmatpush.bf16.msrb.mxu3 %v774_v18 }
 0x301   :  { %v1158_v20 = vpop.permute.xlu2 %1157  ;;  %v1162_v14 = vpop.permute.xlu0 %1161 }
 0x302   :  { %v1154_v13 = vpop.permute.xlu1 %1153  ;;  %787 = vmatpush.bf16.msrb.mxu3 %v772_v63  ;;  %1171 = vmatpush.bf16.msrb.mxu0 %v1162_v14  ;;  %v1283_v63 = vsel %vm479_vm3, %v4786_v33, 0 }
 0x303   :  { %3671 = vmatmul.msk.bf16.gmra.mxu2 %vm479_vm3, %v4579_v31 }
 0x306   :  { %788 = vmatpush.bf16.msrb.mxu3 %v4713_v49  ;;  %1172 = vmatpush.bf16.msrb.mxu0 %v1160_v30  ;;  %v1292_v49 = vsel %vm479_vm3, %v4765_v61, 0 }
 0x309   :  { %v4852_v7 = vpop.permute.xlu2 %1618 }
 0x30a   :  { %v1152_v6 = vpop.permute.xlu1 %1151  ;;  %789 = vmatpush.bf16.msrb.mxu3 %v768_v35  ;;  %1173 = vmatpush.bf16.msrb.mxu0 %v1158_v20  ;;  %v909_v20 = vsel %vm479_vm3, %v4749_v10, 0  ;;  %v40_v10 = vld [vmem:[%s6898_s1] sm:$0x1] }
 0x30b   :  { %v271_v35 = vld [vmem:[%s6899_s2] sm:$0xff] }
 0x30e   :  { %790 = vmatpush.bf16.msrb.mxu3 %v4723_v54  ;;  %1174 = vmatpush.bf16.msrb.mxu0 %v1156_v37  ;;  %v906_v37 = vsel %vm479_vm3, %v4695_v42, 0  ;;  %v1289_v54 = vsel %vm479_vm3, %v1245_v32, 0  ;;  %v1286_v42 = vsel %vm479_vm3, %v4788_v34, 0  ;;  %v894_v34 = vsel %vm479_vm3, %v4715_v52, 0 }
 0x30f   :  { %v1280_v32 = vsel %vm479_vm3, %v4795_v41, 0  ;;  %v891_v52 = vsel %vm479_vm3, %v4725_v56, 0  ;;  %v1681_v41 = vsel %vm479_vm3, %v4758_v17, 0  ;;  %v1678_v56 = vsel %vm479_vm3, %v4777_v27, 0 }
 0x310   :  { %v1669_v17 = vsel %vm479_vm3, %v4801_v59, 0  ;;  %v1666_v27 = vsel %vm479_vm3, %v4803_v0, 0 }
 0x311   :  { %v865_v29 = vpop.permute.xlu2 %864 }
 0x312   :  { %791 = vmatpush.bf16.msrb.mxu3 %v764_v45  ;;  %1175 = vmatpush.bf16.msrb.mxu0 %v1154_v13  ;;  %v912_v18 = vsel %vm479_vm3, %v865_v29, 0  ;;  %v1251_v14 = vpop.permute.xlu1 %1250  ;;  %v1295_v13 = vsel %vm479_vm3, %v4756_v12, 0  ;;  %v897_v12 = vsel %vm479_vm3, %v4705_v48, 0 }
 0x313   :  { %3672 = vmatmul.msk.bf16.gmra.mxu2 %vm479_vm3, %v4587_v47  ;;  %914 = vmatpush.bf16.xpose.msrb.mxu1 %v912_v18  ;;  %v1298_v30 = vsel %vm479_vm3, %v1251_v14, 0 }
 0x316   :  { %792 = vmatpush.bf16.msrb.mxu3 %v4734_v1  ;;  %1176 = vmatpush.bf16.msrb.mxu0 %v1152_v6  ;;  %v903_v6 = vsel %vm479_vm3, %v4703_v46, 0  ;;  %v900_v1 = vsel %vm479_vm3, %v4779_v28, 0  ;;  %v287_v46 = vsub.f32 1.0, %v40_v10 }
 0x318   :  { %v288_v61 = vmul.f32 -1e+09, %v287_v46 }
 0x319   :  { %v1637_v33 = vpop.permute.xlu2 %1636 }
 0x31a   :  { %1300 = vmatpush.bf16.xpose.msra.mxu3 %v1298_v30  ;;  %v4886_v28 = vperm.slane %v288_v61, 0  ;;  %v1684_v14 = vsel %vm479_vm3, %v1637_v33, 0  ;;  %v1277_v30 = vsel %vm479_vm3, %v4809_v5, 0  ;;  %v1672_v5 = vsel %vm479_vm3, %v4793_v39, 0 }
 0x31b   :  { %915 = vmatpush.bf16.xpose.msrb.mxu1 %v909_v20  ;;  %v1675_v20 = vsel %vm479_vm3, %v4775_v24, 0 }
 0x31c   :  { %v4894_v45 = vadd.f32 %v4886_v28, %v271_v35 }
 0x322   :  { %1301 = vmatpush.bf16.xpose.msra.mxu3 %v1295_v13  ;;  %v849_v13 = vpop.permute.xlu1 %848 }
 0x323   :  { %3673 = vmatmul.msk.bf16.gmra.mxu2 %vm479_vm3, %v4601_v15  ;;  %916 = vmatpush.bf16.xpose.msrb.mxu1 %v906_v37 }
 0x32a   :  { %1302 = vmatpush.bf16.xpose.msra.mxu3 %v1292_v49 }
 0x32b   :  { %917 = vmatpush.bf16.xpose.msrb.mxu1 %v903_v6  ;;  %v272_v6 = vld [vmem:[%s6899_s2 + $0x8] sm:$0xff] }
 0x32c   :  { %v4960_v10 = vadd.f32 %v4886_v28, %v272_v6 }
 0x332   :  { %1303 = vmatpush.bf16.xpose.msra.mxu3 %v1289_v54 }
 0x333   :  { %3674 = vmatmul.msk.bf16.gmra.mxu2 %vm479_vm3, %v4617_v38  ;;  %918 = vmatpush.bf16.xpose.msrb.mxu1 %v900_v1 }
 0x33a   :  { %1304 = vmatpush.bf16.xpose.msra.mxu3 %v1286_v42 }
 0x33b   :  { %919 = vmatpush.bf16.xpose.msrb.mxu1 %v897_v12 }
 0x342   :  { %1305 = vmatpush.bf16.xpose.msra.mxu3 %v1283_v63 }
 0x343   :  { %920 = vmatpush.bf16.xpose.msrb.mxu1 %v894_v34 }
 0x346   :  { %v537_v48 = vpop.f32.mrf.mxu2 }
 0x347   :  { %v577_v29 = vmul.f32 0.35355338, %v537_v48 }
 0x349   :  { %v4899_v18 = vadd.f32 %v577_v29, %v4894_v45  ;;  %v274_v29 = vld [vmem:[%s6899_s2 + $0x18] sm:$0xff] }
 0x34a   :  { %1306 = vmatpush.bf16.xpose.msra.mxu3 %v1280_v32 }
 0x34b   :  { %609 = vmax.xlane.f32.xlu0 %v4899_v18  ;;  %921 = vmatpush.bf16.xpose.msrb.mxu1 %v891_v52  ;;  %v4986_v52 = vadd.f32 %v4886_v28, %v274_v29 }
 0x34e   :  { %v539_v24 = vpop.f32.mrf.mxu2 }
 0x34f   :  { %v578_v63 = vmul.f32 0.35355338, %v539_v24 }
 0x351   :  { %v4975_v48 = vadd.f32 %v578_v63, %v4960_v10 }
 0x352   :  { %1307 = vmatpush.bf16.xpose.msra.mxu3 %v1277_v30  ;;  %3675 = vmatmul.msk.bf16.vlgmr.msrb.gmra.mxu1 %vm479_vm3, %v4805_v3  ;;  %v1663_v3 = vsel %vm479_vm3, %v4831_v57, 0 }
 0x353   :  { %1686 = vmatpush.bf16.xpose.msra.mxu1 %v1684_v14 }
 0x356   :  { %v542_v39 = vpop.f32.mrf.mxu2 }
 0x357   :  { %v579_v54 = vmul.f32 0.35355338, %v542_v39  ;;  %v276_v39 = vld [vmem:[%s6899_s2 + $0x28] sm:$0xff] }
 0x35b   :  { %1687 = vmatpush.bf16.xpose.msra.mxu1 %v1681_v41 }
 0x362   :  { %3676 = vmatmul.msk.bf16.gmra.mxu1 %vm479_vm3, %v4813_v19 }
 0x363   :  { %1688 = vmatpush.bf16.xpose.msra.mxu1 %v1678_v56 }
 0x36b   :  { %1689 = vmatpush.bf16.xpose.msra.mxu1 %v1675_v20  ;;  %v275_v20 = vld [vmem:[%s6899_s2 + $0x20] sm:$0xff] }
 0x372   :  { %3677 = vmatmul.msk.bf16.gmra.mxu1 %vm479_vm3, %v4745_v8  ;;  %v544_v8 = vpop.f32.mrf.mxu2 }
 0x373   :  { %1690 = vmatpush.bf16.xpose.msra.mxu1 %v1672_v5  ;;  %v580_v33 = vmul.f32 0.35355338, %v544_v8 }
 0x375   :  { %v4991_v41 = vadd.f32 %v580_v33, %v4986_v52 }
 0x37a   :  { %v547_v19 = vpop.f32.mrf.mxu2 }
 0x37b   :  { %1691 = vmatpush.bf16.xpose.msra.mxu1 %v1669_v17  ;;  %v581_v8 = vmul.f32 0.35355338, %v547_v19 }
 0x382   :  { %3678 = vmatmul.msk.bf16.gmra.mxu1 %vm479_vm3, %v4736_v2  ;;  %v549_v59 = vpop.f32.mrf.mxu2 }
 0x383   :  { %1692 = vmatpush.bf16.xpose.msra.mxu1 %v1666_v27  ;;  %v5002_v27 = vadd.f32 %v4886_v28, %v275_v20  ;;  %v582_v19 = vmul.f32 0.35355338, %v549_v59  ;;  %v278_v59 = vld [vmem:[%s6899_s2 + $0x38] sm:$0xff] }
 0x385   :  { %6975 = vst [vmem:[#allocation32_spill] sm:$0xff] %v5002_v27 }
 0x38a   :  { %v4935_v0 = vpop.f32.mrf.mxu2 }
 0x38b   :  { %1693 = vmatpush.bf16.xpose.msra.mxu1 %v1663_v3 }
 0x392   :  { %3679 = vmatmul.msk.bf16.gmra.mxu1 %vm479_vm3, %v4747_v9  ;;  %v4937_v2 = vpop.f32.mrf.mxu2 }
 0x39a   :  { %v4940_v57 = vpop.f32.mrf.mxu2 }
 0x3a2   :  { %3680 = vmatmul.msk.bf16.gmra.mxu1 %vm479_vm3, %v4767_v60  ;;  %v4947_v49 = vpop.f32.mrf.mxu2 }
 0x3aa   :  { %v4970_v61 = vpop.f32.mrf.mxu2 }
 0x3b2   :  { %3681 = vmatmul.msk.bf16.gmra.mxu1 %vm479_vm3, %v4825_v21  ;;  %v273_v21 = vld [vmem:[%s6899_s2 + $0x10] sm:$0xff]  ;;  %v4988_v14 = vpop.f32.mrf.mxu2 }
 0x3b3   :  { %v4957_v1 = vadd.f32 %v4886_v28, %v273_v21  ;;  %v5019_v21 = vadd.f32 %v581_v8, %v5002_v27 }
 0x3b5   :  { %v4963_v46 = vadd.f32 %v579_v54, %v4957_v1 }
 0x3ba   :  { %v5004_v24 = vpop.f32.mrf.mxu2 }
 0x3be   :  { %v610_v54 = vpop.xlane.xlu0 %609 }
 0x3bf   :  { %v641_v63 = vsub.f32 %v4899_v18, %v610_v54  ;;  %v277_v18 = vld [vmem:[%s6899_s2 + $0x30] sm:$0xff] }
 0x3c1   :  { %v657_v29 = vmul.f32 1.442695, %v641_v63 }
 0x3c2   :  { %3682 = vmatmul.msk.bf16.gmra.mxu1 %vm479_vm3, %v849_v13  ;;  %v569_v6 = vpop.f32.mrf.mxu2 }
 0x3c3   :  { %3940 = vpow2.f32 %v657_v29 }
 0x3cf   :  { %v923_v37 = vpop.f32.mrf.mxu1 }
 0x3d0   :  { %v963_v9 = vmul.f32 0.35355338, %v923_v37 }
 0x3d2   :  { %3691 = vmatmul.msk.bf16.vlgmr.msra.gmra.mxu1 %vm479_vm3, %v4811_v11  ;;  %v4945_v60 = vadd.f32 %v963_v9, %v4894_v45  ;;  %v5016_v9 = vadd.f32 %v4886_v28, %v276_v39 }
 0x3d4   :  { %995 = vmax.xlane.f32.xlu2 %v4945_v60  ;;  %6976 = vst [vmem:[#allocation33_spill] sm:$0xff] %v5016_v9  ;;  %v5036_v33 = vadd.f32 %v582_v19, %v5016_v9  ;;  %v280_v19 = vld [vmem:[%s6899_s2 + $0x48] sm:$0xff] }
 0x3d7   :  { %v925_v11 = vpop.f32.mrf.mxu1 }
 0x3d8   :  { %v964_v42 = vmul.f32 0.35355338, %v925_v11  ;;  %v284_v11 = vld [vmem:[%s6899_s2 + $0x68] sm:$0xff] }
 0x3da   :  { %v4966_v12 = vadd.f32 %v964_v42, %v4960_v10  ;;  %v590_v42 = vmul.f32 0.35355338, %v569_v6  ;;  %v584_v6 = vmul.f32 0.35355338, %v4937_v2  ;;  %v5087_v2 = vadd.f32 %v4886_v28, %v280_v19 }
 0x3dc   :  { %613 = vmax.xlane.f32.xlu2 %v4963_v46  ;;  %997 = vmax.xlane.f32.xlu1 %v4966_v12  ;;  %6979 = vst [vmem:[#allocation36_spill] sm:$0xff] %v5087_v2 }
 0x3df   :  { %v928_v34 = vpop.f32.mrf.mxu1 }
 0x3e0   :  { %v965_v35 = vmul.f32 0.35355338, %v928_v34  ;;  %v5031_v34 = vadd.f32 %v4886_v28, %v284_v11 }
 0x3e2   :  { %3692 = vmatmul.msk.bf16.gmra.mxu1 %vm479_vm3, %v4839_v44  ;;  %v4978_v32 = vadd.f32 %v965_v35, %v4957_v1 }
 0x3e4   :  { %611 = vmax.xlane.f32.xlu1 %v4975_v48  ;;  %999 = vmax.xlane.f32.xlu0 %v4978_v32 }
 0x3e7   :  { %v930_v44 = vpop.f32.mrf.mxu1 }
 0x3e8   :  { %v966_v30 = vmul.f32 0.35355338, %v930_v44  ;;  %v5039_v44 = vadd.f32 %v590_v42, %v5031_v34  ;;  %v279_v42 = vld [vmem:[%s6899_s2 + $0x40] sm:$0xff] }
 0x3e9   :  { %v5090_v63 = vadd.f32 %v4886_v28, %v279_v42  ;;  %v282_v42 = vld [vmem:[%s6899_s2 + $0x58] sm:$0xff] }
 0x3ea   :  { %v4994_v56 = vadd.f32 %v966_v30, %v4986_v52 }
 0x3ec   :  { %615 = vmax.xlane.f32.xlu0 %v4991_v41  ;;  %1001 = vmax.xlane.f32.xlu2 %v4994_v56 }
 0x3ef   :  { %v933_v5 = vpop.f32.mrf.mxu1 }
 0x3f0   :  { %v967_v17 = vmul.f32 0.35355338, %v933_v5  ;;  %v5050_v5 = vadd.f32 %v4886_v28, %v277_v18 }
 0x3f2   :  { %3693 = vmatmul.msk.bf16.gmra.mxu1 %vm479_vm3, %v4827_v23  ;;  %v5009_v3 = vadd.f32 %v967_v17, %v5002_v27  ;;  %6977 = vst [vmem:[#allocation34_spill] sm:$0xff] %v5050_v5  ;;  %v5053_v17 = vadd.f32 %v4886_v28, %v278_v59  ;;  %v285_v59 = vld [vmem:[%s6899_s2 + $0x70] sm:$0xff] }
 0x3f4   :  { %1003 = vmax.xlane.f32.xlu0 %v5009_v3  ;;  %6978 = vst [vmem:[#allocation35_spill] sm:$0xff] %v5053_v17  ;;  %v5074_v11 = vadd.f32 %v584_v6, %v5053_v17 }
 0x3f7   :  { %v935_v13 = vpop.f32.mrf.mxu1 }
 0x3f8   :  { %v968_v37 = vmul.f32 0.35355338, %v935_v13  ;;  %v5061_v13 = vpop.eup %3940 }
 0x3fa   :  { %v5022_v23 = vadd.f32 %v968_v37, %v5016_v9  ;;  %v583_v37 = vmul.f32 0.35355338, %v4935_v0  ;;  %v586_v0 = vmul.f32 0.35355338, %v4947_v49  ;;  %v587_v49 = vmul.f32 0.35355338, %v4970_v61 }
 0x3fb   :  { %v286_v61 = vld [vmem:[%s6899_s2 + $0x78] sm:$0xff] }
 0x3fc   :  { %617 = vmax.xlane.f32.xlu0 %v5019_v21  ;;  %1005 = vmax.xlane.f32.xlu1 %v5022_v23  ;;  %v5071_v54 = vadd.f32 %v583_v37, %v5050_v5  ;;  %v5093_v29 = vadd.f32 %v586_v0, %v5087_v2  ;;  %v5131_v0 = vadd.f32 %v4886_v28, %v286_v61  ;;  %v5157_v61 = vpop.permute.xlu1 %1234 }
 0x3fd   :  { %6981 = vst [vmem:[#allocation38_spill] sm:$0xff] %v5157_v61 }
 0x3ff   :  { %v938_v35 = vpop.f32.mrf.mxu1 }
 0x402   :  { %3694 = vmatmul.msk.bf16.gmra.mxu1 %vm479_vm3, %v4823_v53  ;;  %v969_v53 = vmul.f32 0.35355338, %v938_v35  ;;  %v572_v35 = vpop.f32.mrf.mxu2 }
 0x404   :  { %619 = vmax.xlane.f32.xlu0 %v5036_v33  ;;  %635 = vmax.xlane.f32.xlu1 %v5039_v44  ;;  %v5056_v39 = vadd.f32 %v969_v53, %v5050_v5  ;;  %v591_v53 = vmul.f32 0.35355338, %v572_v35  ;;  %v5134_v35 = vadd.f32 %v4886_v28, %v282_v42 }
 0x407   :  { %v940_v30 = vpop.f32.mrf.mxu1 }
 0x408   :  { %v970_v20 = vmul.f32 0.35355338, %v940_v30  ;;  %v5108_v30 = vadd.f32 %v4886_v28, %v285_v59 }
 0x40a   :  { %v5059_v8 = vadd.f32 %v970_v20, %v5053_v17  ;;  %v5116_v37 = vadd.f32 %v591_v53, %v5108_v30  ;;  %v574_v19 = vpop.f32.mrf.mxu2 }
 0x40c   :  { %1007 = vmax.xlane.f32.xlu0 %v5056_v39  ;;  %1009 = vmax.xlane.f32.xlu2 %v5059_v8 }
 0x40d   :  { %689 = vadd.xlane.f32.xlu1 %v5061_v13 }
 0x40f   :  { %v5194_v36 = vpop.f32.mrf.mxu1 }
 0x412   :  { %3695 = vmatmul.msk.bf16.gmra.mxu1 %vm479_vm3, %v4837_v50  ;;  %v585_v50 = vmul.f32 0.35355338, %v4940_v57  ;;  %v281_v57 = vld [vmem:[%s6899_s2 + $0x50] sm:$0xff] }
 0x413   :  { %v5111_v20 = vadd.f32 %v4886_v28, %v281_v57 }
 0x414   :  { %621 = vmax.xlane.f32.xlu0 %v5071_v54  ;;  %623 = vmax.xlane.f32.xlu2 %v5074_v11  ;;  %v5096_v18 = vadd.f32 %v585_v50, %v5090_v63  ;;  %v592_v50 = vmul.f32 0.35355338, %v574_v19 }
 0x415   :  { %6980 = vst [vmem:[#allocation37_spill] sm:$0xff] %v5111_v20  ;;  %v5119_v6 = vadd.f32 %v587_v49, %v5111_v20  ;;  %v283_v49 = vld [vmem:[%s6899_s2 + $0x60] sm:$0xff]  ;;  %s4311_s2 = smov 48  }
 0x416   :  { %v5137_v59 = vadd.f32 %v592_v50, %v5131_v0  ;;  %v5149_v53 = vadd.f32 %v4886_v28, %v283_v49 }
 0x41c   :  { %627 = vmax.xlane.f32.xlu0 %v5093_v29  ;;  %625 = vmax.xlane.f32.xlu2 %v5096_v18 }
 0x422   :  { %3696 = vmatmul.msk.bf16.gmra.mxu1 %vm479_vm3, %v4835_v51  ;;  %v588_v51 = vmul.f32 0.35355338, %v4988_v14  ;;  %v589_v14 = vmul.f32 0.35355338, %v5004_v24 }
 0x424   :  { %637 = vmax.xlane.f32.xlu0 %v5116_v37  ;;  %629 = vmax.xlane.f32.xlu2 %v5119_v6  ;;  %v5140_v57 = vadd.f32 %v588_v51, %v5134_v35  ;;  %v5154_v19 = vadd.f32 %v589_v14, %v5149_v53 }
 0x42c   :  { %639 = vmax.xlane.f32.xlu0 %v5137_v59  ;;  %631 = vmax.xlane.f32.xlu2 %v5140_v57 }
 0x432   :  { %3697 = vmatmul.msk.bf16.gmra.mxu1 %vm479_vm3, %v4852_v7 }
 0x434   :  { %633 = vmax.xlane.f32.xlu2 %v5154_v19 }
 0x447   :  { %v996_v42 = vpop.xlane.xlu2 %995 }
 0x448   :  { %v1027_v51 = vsub.f32 %v4945_v60, %v996_v42 }
 0x44a   :  { %v1043_v50 = vmul.f32 1.442695, %v1027_v51 }
 0x44c   :  { %3942 = vpow2.f32 %v1043_v50 }
 0x44f   :  { %v614_v43 = vpop.xlane.xlu2 %613  ;;  %v998_v24 = vpop.xlane.xlu1 %997 }
 0x450   :  { %v643_v28 = vsub.f32 %v4963_v46, %v614_v43  ;;  %v1028_v49 = vsub.f32 %v4966_v12, %v998_v24 }
 0x452   :  { %v5162_v22 = vpop.eup %3942  ;;  %v661_v7 = vmul.f32 1.442695, %v643_v28  ;;  %v1045_v14 = vmul.f32 1.442695, %v1028_v49 }
 0x453   :  { %1075 = vadd.xlane.f32.xlu0 %v5162_v22 }
 0x454   :  { %3944 = vpow2.f32 %v661_v7 }
 0x455   :  { %3946 = vpow2.f32 %v1045_v14 }
 0x457   :  { %v612_v61 = vpop.xlane.xlu1 %611  ;;  %v5165_v58 = vpop.xlane.xlu0 %999 }
 0x458   :  { %v642_v60 = vsub.f32 %v4975_v48, %v612_v61 }
 0x45a   :  { %v5168_v42 = vpop.eup %3944  ;;  %v659_v51 = vmul.f32 1.442695, %v642_v60 }
 0x45b   :  { %v5170_v50 = vpop.eup %3946  ;;  %693 = vadd.xlane.f32.xlu1 %v5168_v42 }
 0x45c   :  { %3948 = vpow2.f32 %v659_v51  ;;  %1077 = vadd.xlane.f32.xlu2 %v5170_v50 }
 0x45f   :  { %v616_v43 = vpop.xlane.xlu0 %615  ;;  %v5184_v14 = vpop.xlane.xlu2 %1001 }
 0x460   :  { %v644_v46 = vsub.f32 %v4991_v41, %v616_v43 }
 0x462   :  { %v5175_v12 = vpop.eup %3948  ;;  %v663_v24 = vmul.f32 1.442695, %v644_v46 }
 0x463   :  { %691 = vadd.xlane.f32.xlu0 %v5175_v12 }
 0x464   :  { %3950 = vpow2.f32 %v663_v24 }
 0x467   :  { %v5178_v48 = vpop.xlane.xlu0 %1003 }
 0x46a   :  { %v5180_v61 = vpop.eup %3950 }
 0x46b   :  { %695 = vadd.xlane.f32.xlu2 %v5180_v61 }
 0x46f   :  { %v618_v28 = vpop.xlane.xlu0 %617 }
 0x470   :  { %v645_v49 = vsub.f32 %v5019_v21, %v618_v28 }
 0x472   :  { %v665_v7 = vmul.f32 1.442695, %v645_v49 }
 0x474   :  { %3952 = vpow2.f32 %v665_v7  ;;  %v945_v7 = vpop.f32.mrf.mxu1 }
 0x477   :  { %v620_v41 = vpop.xlane.xlu0 %619 }
 0x478   :  { %v646_v60 = vsub.f32 %v5036_v33, %v620_v41 }
 0x47a   :  { %v667_v51 = vmul.f32 1.442695, %v646_v60  ;;  %v5187_v43 = vpop.eup %3952 }
 0x47b   :  { %697 = vadd.xlane.f32.xlu0 %v5187_v43 }
 0x47c   :  { %3954 = vpow2.f32 %v667_v51 }
 0x47f   :  { %v5190_v46 = vpop.xlane.xlu2 %1009  ;;  %v1008_v24 = vpop.xlane.xlu0 %1007 }
 0x482   :  { %v5192_v17 = vpop.eup %3954 }
 0x483   :  { %699 = vadd.xlane.f32.xlu2 %v5192_v17 }
 0x487   :  { %v624_v21 = vpop.xlane.xlu2 %623  ;;  %v622_v28 = vpop.xlane.xlu0 %621 }
 0x488   :  { %v647_v49 = vsub.f32 %v5071_v54, %v622_v28  ;;  %v648_v41 = vsub.f32 %v5074_v11, %v624_v21  ;;  %v948_v28 = vpop.f32.mrf.mxu1 }
 0x48a   :  { %v669_v33 = vmul.f32 1.442695, %v647_v49  ;;  %v671_v62 = vmul.f32 1.442695, %v648_v41 }
 0x48c   :  { %3956 = vpow2.f32 %v669_v33 }
 0x48f   :  { %v626_v60 = vpop.xlane.xlu2 %625  ;;  %1149 = vrot.lane.b32.xlu0 %v4610_v26, %s4310_s8  ;;  %v628_v31 = vpop.xlane.xlu0 %627 }
 0x490   :  { %v649_v51 = vsub.f32 %v5096_v18, %v626_v60  ;;  %v650_v54 = vsub.f32 %v5093_v29, %v628_v31  ;;  %v5212_v18 = vpop.f32.mrf.mxu1  ;;  %v972_v29 = vmul.f32 0.35355338, %v945_v7 }
 0x492   :  { %v673_v4 = vmul.f32 1.442695, %v649_v51  ;;  %v5202_v40 = vpop.eup %3956  ;;  %v675_v11 = vmul.f32 1.442695, %v650_v54  ;;  %v5225_v51 = vadd.f32 %v972_v29, %v5087_v2 }
 0x493   :  { %701 = vadd.xlane.f32.xlu2 %v5202_v40 }
 0x494   :  { %3958 = vpow2.f32 %v673_v4 }
 0x495   :  { %3960 = vpow2.f32 %v671_v62 }
 0x496   :  { %3962 = vpow2.f32 %v675_v11  ;;  %v1006_v11 = vpop.xlane.xlu1 %1005 }
 0x497   :  { %v630_v31 = vpop.xlane.xlu2 %629  ;;  %v5228_v54 = vpop.xlane.xlu0 %637 }
 0x498   :  { %v5217_v62 = vpop.f32.mrf.mxu1  ;;  %v651_v4 = vsub.f32 %v5119_v6, %v630_v31  ;;  %v1032_v31 = vsub.f32 %v5022_v23, %v1006_v11 }
 0x49a   :  { %v5206_v21 = vpop.eup %3958  ;;  %v677_v60 = vmul.f32 1.442695, %v651_v4  ;;  %v973_v4 = vmul.f32 0.35355338, %v948_v28  ;;  %v1053_v26 = vmul.f32 1.442695, %v1032_v31 }
 0x49b   :  { %v5208_v49 = vpop.eup %3960  ;;  %705 = vadd.xlane.f32.xlu1 %v5206_v21 }
 0x49c   :  { %703 = vadd.xlane.f32.xlu2 %v5208_v49  ;;  %v5214_v33 = vpop.eup %3962  ;;  %3964 = vpow2.f32 %v677_v60  ;;  %v5241_v5 = vadd.f32 %v973_v4, %v5111_v20  ;;  %v971_v4 = vmul.f32 0.35355338, %v5194_v36 }
 0x49d   :  { %3966 = vpow2.f32 %v1053_v26  ;;  %v1029_v26 = vsub.f32 %v4978_v32, %v5165_v58 }
 0x49e   :  { %v636_v60 = vpop.xlane.xlu1 %635  ;;  %v5266_v58 = vadd.f32 %v971_v4, %v5090_v63 }
 0x49f   :  { %v5238_v29 = vpop.xlane.xlu2 %631  ;;  %v640_v2 = vpop.xlane.xlu0 %639 }
 0x4a0   :  { %v5222_v41 = vpop.f32.mrf.mxu1  ;;  %v656_v31 = vsub.f32 %v5137_v59, %v640_v2 }
 0x4a2   :  { %v5234_v7 = vpop.eup %3964 }
 0x4a3   :  { %6982 = vst [vmem:[#allocation39_spill] sm:$0xff] %v5234_v7  ;;  %v5249_v23 = vpop.eup %3966 }
 0x4a4   :  { %707 = vadd.xlane.f32.xlu2 %v5214_v33 }
 0x4a6   :  { %v690_v28 = vpop.xlane.xlu1 %689 }
 0x4a7   :  { %v5247_v16 = vpop.xlane.xlu2 %633 }
 0x4a8   :  { %v5232_v6 = vpop.f32.mrf.mxu1 }
 0x4b4   :  { %1620 = vrot.lane.b32.xlu1 %v4617_v38, %s4308_s30  ;;  %v960_v38 = vpop.f32.mrf.mxu1  ;;  %s4312_s30 = smov 40  }
 0x4b9   :  { %1013 = vmax.xlane.f32.xlu0 %v5225_v51 }
 0x4bc   :  { %1147 = vrot.lane.b32.xlu2 %v4608_v25, %s4310_s8  ;;  %v1033_v25 = vsub.f32 %v5056_v39, %v1008_v24  ;;  %v5252_v11 = vpop.f32.mrf.mxu1  ;;  %v687_v24 = vmul.f32 1.442695, %v656_v31  ;;  %s4313_s8 = smov 8  }
 0x4be   :  { %v1055_v9 = vmul.f32 1.442695, %v1033_v25  ;;  %v1030_v25 = vsub.f32 %v4994_v56, %v5184_v14  ;;  %v1031_v56 = vsub.f32 %v5009_v3, %v5178_v48  ;;  %v978_v3 = vmul.f32 0.35355338, %v960_v38 }
 0x4c0   :  { %3968 = vpow2.f32 %v1055_v9  ;;  %v1049_v2 = vmul.f32 1.442695, %v1030_v25  ;;  %v5287_v4 = vadd.f32 %v978_v3, %v5131_v0 }
 0x4c1   :  { %709 = vadd.xlane.f32.xlu0 %v5234_v7  ;;  %3970 = vrcp.f32 %v690_v28  ;;  %v1047_v7 = vmul.f32 1.442695, %v1029_v26 }
 0x4c4   :  { %v1697_v59 = vpop.f32.mrf.mxu1 }
 0x4c6   :  { %v5245_v55 = vpop.xlane.xlu0 %1075  ;;  %v5262_v27 = vpop.eup %3968 }
 0x4c7   :  { %v3971_v9 = vpop.eup %3970 }
 0x4c8   :  { %v737_v36 = vmul.f32 %v3971_v9, %v5061_v13  ;;  %v654_v13 = vsub.f32 %v5039_v44, %v636_v60  ;;  %v652_v60 = vsub.f32 %v5140_v57, %v5238_v29  ;;  %v976_v57 = vmul.f32 0.35355338, %v5222_v41 }
 0x4c9   :  { %1015 = vmax.xlane.f32.xlu0 %v5241_v5 }
 0x4ce   :  { %v694_v25 = vpop.xlane.xlu1 %693 }
 0x4cf   :  { %v5260_v20 = vpop.xlane.xlu2 %1077 }
 0x4d1   :  { %1085 = vadd.xlane.f32.xlu0 %v5249_v23 }
 0x4d6   :  { %v692_v39 = vpop.xlane.xlu0 %691 }
 0x4d7   :  { %3972 = vrcp.f32 %v692_v39  ;;  %v1051_v39 = vmul.f32 1.442695, %v1031_v56  ;;  %v1736_v56 = vmul.f32 0.35355338, %v1697_v59 }
 0x4d8   :  { %3974 = vpow2.f32 %v687_v24  ;;  %v974_v24 = vmul.f32 0.35355338, %v5212_v18 }
 0x4d9   :  { %1087 = vadd.xlane.f32.xlu0 %v5262_v27  ;;  %3976 = vpow2.f32 %v1047_v7 }
 0x4da   :  { %3978 = vpow2.f32 %v1049_v2  ;;  %v683_v2 = vmul.f32 1.442695, %v654_v13 }
 0x4dd   :  { %v3973_v32 = vpop.eup %3972 }
 0x4de   :  { %1011 = vmax.xlane.f32.xlu1 %v5266_v58  ;;  %v738_v14 = vmul.f32 %v3973_v32, %v5175_v12  ;;  %v696_v28 = vpop.xlane.xlu2 %695  ;;  %v5273_v26 = vpop.eup %3974 }
 0x4df   :  { %3980 = vrcp.f32 %v696_v28  ;;  %v5276_v7 = vpop.eup %3976  ;;  %v5283_v12 = vpop.f32.mrf.mxu1  ;;  %v5303_v28 = vadd.f32 %v1736_v56, %v4960_v10  ;;  %v977_v56 = vmul.f32 0.35355338, %v5232_v6 }
 0x4e0   :  { %v753_v31 = vpack.c.bf16 %v738_v14, %v737_v36  ;;  %v5278_v48 = vpop.eup %3978  ;;  %3982 = vrcp.f32 %v694_v25  ;;  %v5293_v36 = vadd.f32 %v974_v24, %v5134_v35  ;;  %v975_v14 = vmul.f32 0.35355338, %v5217_v62 }
 0x4e1   :  { %719 = vadd.xlane.f32.xlu0 %v5273_v26  ;;  %3984 = vpow2.f32 %v1051_v39  ;;  %v653_v62 = vsub.f32 %v5154_v19, %v5247_v16  ;;  %v5321_v24 = vadd.f32 %v976_v57, %v5031_v34  ;;  %v1034_v16 = vsub.f32 %v5059_v8, %v5190_v46 }
 0x4e2   :  { %793 = vmatmul.bf16.vlgmr.msrb.gmra.mxu3 %v753_v31  ;;  %3986 = vpow2.f32 %v683_v2  ;;  %v655_v8 = vsub.f32 %v5116_v37, %v5228_v54 }
 0x4e5   :  { %1079 = vadd.xlane.f32.xlu2 %v5276_v7  ;;  %v3981_v9 = vpop.eup %3980 }
 0x4e6   :  { %1081 = vadd.xlane.f32.xlu1 %v5278_v48  ;;  %v3983_v38 = vpop.eup %3982  ;;  %v740_v44 = vmul.f32 %v3981_v9, %v5180_v61  ;;  %v679_v61 = vmul.f32 1.442695, %v652_v60  ;;  %v681_v9 = vmul.f32 1.442695, %v653_v62 }
 0x4e7   :  { %v5290_v32 = vpop.eup %3984  ;;  %v739_v18 = vmul.f32 %v3983_v38, %v5168_v42  ;;  %v1702_v31 = vpop.f32.mrf.mxu1  ;;  %v5309_v42 = vadd.f32 %v975_v14, %v5149_v53  ;;  %v5333_v14 = vadd.f32 %v977_v56, %v5108_v30 }
 0x4e8   :  { %v5306_v25 = vpop.eup %3986  ;;  %v1738_v3 = vmul.f32 0.35355338, %v1702_v31 }
 0x4e9   :  { %1025 = vmax.xlane.f32.xlu0 %v5287_v4  ;;  %v754_v59 = vpack.c.bf16 %v740_v44, %v739_v18 }
 0x4ea   :  { %v5317_v13 = vadd.f32 %v1738_v3, %v4986_v52 }
 0x4ed   :  { %1083 = vadd.xlane.f32.xlu2 %v5290_v32 }
 0x4ee   :  { %1017 = vmax.xlane.f32.xlu1 %v5293_v36  ;;  %v698_v39 = vpop.xlane.xlu0 %697 }
 0x4ef   :  { %3988 = vrcp.f32 %v698_v39 }
 0x4f0   :  { %3990 = vpow2.f32 %v679_v61 }
 0x4f1   :  { %1769 = vmax.xlane.f32.xlu0 %v5303_v28 }
 0x4f2   :  { %798 = vmatmul.bf16.gmra.mxu3 %v754_v59  ;;  %v1057_v59 = vmul.f32 1.442695, %v1034_v16 }
 0x4f5   :  { %715 = vadd.xlane.f32.xlu2 %v5306_v25  ;;  %v3989_v2 = vpop.eup %3988 }
 0x4f6   :  { %1019 = vmax.xlane.f32.xlu1 %v5309_v42  ;;  %v700_v29 = vpop.xlane.xlu2 %699  ;;  %v5323_v38 = vpop.eup %3990  ;;  %v741_v19 = vmul.f32 %v3989_v2, %v5187_v43 }
 0x4f7   :  { %3992 = vrcp.f32 %v700_v29 }
 0x4f8   :  { %3994 = vpow2.f32 %v681_v9 }
 0x4f9   :  { %1773 = vmax.xlane.f32.xlu0 %v5317_v13  ;;  %3996 = vpow2.f32 %v1057_v59 }
 0x4fd   :  { %1021 = vmax.xlane.f32.xlu2 %v5321_v24  ;;  %v3993_v41 = vpop.eup %3992 }
 0x4fe   :  { %711 = vadd.xlane.f32.xlu1 %v5323_v38  ;;  %v742_v44 = vmul.f32 %v3993_v41, %v5192_v17  ;;  %v5335_v31 = vpop.eup %3994  ;;  %v685_v17 = vmul.f32 1.442695, %v655_v8 }
 0x4ff   :  { %v5341_v46 = vpop.eup %3996 }
 0x500   :  { %v755_v18 = vpack.c.bf16 %v742_v44, %v741_v19 }
 0x501   :  { %v1150_v60 = vpop.permute.xlu0 %1149 }
 0x502   :  { %803 = vmatmul.bf16.gmra.mxu3 %v755_v18  ;;  %1177 = vmatpush.bf16.msrb.mxu0 %v1150_v60 }
 0x505   :  { %1023 = vmax.xlane.f32.xlu2 %v5333_v14 }
 0x506   :  { %713 = vadd.xlane.f32.xlu1 %v5335_v31  ;;  %v702_v43 = vpop.xlane.xlu2 %701 }
 0x507   :  { %3998 = vrcp.f32 %v702_v43  ;;  %v1735_v43 = vmul.f32 0.35355338, %v5252_v11 }
 0x508   :  { %4000 = vpow2.f32 %v685_v17 }
 0x509   :  { %v5366_v17 = vadd.f32 %v1735_v43, %v4894_v45  ;;  %v1737_v43 = vmul.f32 0.35355338, %v5283_v12 }
 0x50d   :  { %1545 = vrot.lane.b32.xlu0 %v4601_v15, %s4311_s2  ;;  %v3999_v61 = vpop.eup %3998 }
 0x50e   :  { %1089 = vadd.xlane.f32.xlu1 %v5341_v46  ;;  %v5347_v39 = vpop.eup %4000  ;;  %v743_v3 = vmul.f32 %v3999_v61, %v5202_v40  ;;  %v706_v9 = vpop.xlane.xlu1 %705 }
 0x50f   :  { %v704_v6 = vpop.xlane.xlu2 %703 }
 0x510   :  { %4002 = vrcp.f32 %v704_v6 }
 0x511   :  { %4004 = vrcp.f32 %v5260_v20 }
 0x512   :  { %4006 = vrcp.f32 %v5245_v55 }
 0x515   :  { %1543 = vrot.lane.b32.xlu0 %v4587_v47, %s4311_s2 }
 0x516   :  { %v4003_v37 = vpop.eup %4002  ;;  %717 = vadd.xlane.f32.xlu1 %v5347_v39 }
 0x517   :  { %v708_v54 = vpop.xlane.xlu2 %707  ;;  %v744_v57 = vmul.f32 %v4003_v37, %v5208_v49  ;;  %v4005_v29 = vpop.eup %4004 }
 0x518   :  { %v4007_v20 = vpop.eup %4006  ;;  %4008 = vrcp.f32 %v708_v54  ;;  %v1124_v2 = vmul.f32 %v4005_v29, %v5170_v50 }
 0x519   :  { %v756_v62 = vpack.c.bf16 %v744_v57, %v743_v3  ;;  %4010 = vrcp.f32 %v706_v9  ;;  %v1123_v41 = vmul.f32 %v4007_v20, %v5162_v22 }
 0x51b   :  { %808 = vmatmul.bf16.gmra.mxu3 %v756_v62  ;;  %v1139_v56 = vpack.c.bf16 %v1124_v2, %v1123_v41 }
 0x51e   :  { %v4009_v16 = vpop.eup %4008 }
 0x51f   :  { %v1148_v55 = vpop.permute.xlu2 %1147  ;;  %v4011_v19 = vpop.eup %4010  ;;  %v746_v40 = vmul.f32 %v4009_v16, %v5214_v33 }
 0x520   :  { %1178 = vmatpush.bf16.msrb.mxu0 %v1148_v55  ;;  %v745_v44 = vmul.f32 %v4011_v19, %v5206_v21 }
 0x522   :  { %v757_v18 = vpack.c.bf16 %v746_v40, %v745_v44 }
 0x523   :  { %1179 = vmatmul.bf16.vlgmr.msrb.gmra.mxu0 %v1139_v56 }
 0x526   :  { %v1621_v49 = vpop.permute.xlu1 %1620 }
 0x527   :  { %3698 = vmatmul.msk.bf16.gmra.mxu1 %vm479_vm3, %v1621_v49 }
 0x52b   :  { %813 = vmatmul.bf16.gmra.mxu3 %v757_v18 }
 0x52c   :  { %v1014_v60 = vpop.xlane.xlu0 %1013 }
 0x52d   :  { %v1036_v50 = vsub.f32 %v5225_v51, %v1014_v60 }
 0x52f   :  { %v1061_v59 = vmul.f32 1.442695, %v1036_v50 }
 0x531   :  { %4012 = vpow2.f32 %v1061_v59 }
 0x534   :  { %v710_v22 = vpop.xlane.xlu0 %709 }
 0x537   :  { %v5361_v8 = vpop.eup %4012 }
 0x538   :  { %1093 = vadd.xlane.f32.xlu2 %v5361_v8 }
 0x53c   :  { %v1016_v33 = vpop.xlane.xlu0 %1015 }
 0x53d   :  { %v1037_v3 = vsub.f32 %v5241_v5, %v1016_v33 }
 0x53f   :  { %v1063_v62 = vmul.f32 1.442695, %v1037_v3  ;;  %v1705_v3 = vpop.f32.mrf.mxu1 }
 0x540   :  { %1767 = vmax.xlane.f32.xlu2 %v5366_v17 }
 0x544   :  { %v1086_v21 = vpop.xlane.xlu0 %1085 }
 0x54c   :  { %v5369_v6 = vpop.xlane.xlu0 %1087 }
 0x551   :  { %v1012_v61 = vpop.xlane.xlu1 %1011 }
 0x552   :  { %v1035_v51 = vsub.f32 %v5266_v58, %v1012_v61 }
 0x554   :  { %v1059_v37 = vmul.f32 1.442695, %v1035_v51  ;;  %v5372_v54 = vpop.xlane.xlu0 %719 }
 0x556   :  { %4014 = vpow2.f32 %v1059_v37 }
 0x558   :  { %v1080_v57 = vpop.xlane.xlu2 %1079 }
 0x559   :  { %4016 = vrcp.f32 %v1080_v57  ;;  %v1082_v11 = vpop.xlane.xlu1 %1081 }
 0x55a   :  { %4018 = vrcp.f32 %v1082_v11 }
 0x55b   :  { %4020 = vpow2.f32 %v1063_v62 }
 0x55c   :  { %v5375_v29 = vpop.eup %4014  ;;  %v1026_v9 = vpop.xlane.xlu0 %1025 }
 0x55d   :  { %1091 = vadd.xlane.f32.xlu1 %v5375_v29  ;;  %v1042_v20 = vsub.f32 %v5287_v4, %v1026_v9 }
 0x55f   :  { %v4017_v58 = vpop.eup %4016  ;;  %v1073_v55 = vmul.f32 1.442695, %v1042_v20 }
 0x560   :  { %v4019_v2 = vpop.eup %4018  ;;  %v1084_v41 = vpop.xlane.xlu2 %1083  ;;  %v1125_v5 = vmul.f32 %v4017_v58, %v5276_v7 }
 0x561   :  { %v1018_v56 = vpop.xlane.xlu1 %1017  ;;  %v1126_v16 = vmul.f32 %v4019_v2, %v5278_v48  ;;  %4022 = vpow2.f32 %v1073_v55  ;;  %v5382_v49 = vpop.eup %4020  ;;  %v6984_v55 = vld [vmem:[#allocation32_spill] sm:$0xff] }
 0x562   :  { %v1038_v19 = vsub.f32 %v5293_v36, %v1018_v56  ;;  %v1707_v56 = vpop.f32.mrf.mxu1 }
 0x563   :  { %v1140_v40 = vpack.c.bf16 %v1126_v16, %v1125_v5  ;;  %v6985_v5 = vld [vmem:[#allocation19_spill] sm:$0xff]  ;;  %v1740_v16 = vmul.f32 0.35355338, %v1707_v56 }
 0x564   :  { %v1065_v44 = vmul.f32 1.442695, %v1038_v19  ;;  %v6986_v19 = vld [vmem:[#allocation33_spill] sm:$0xff] }
 0x565   :  { %1184 = vmatmul.bf16.gmra.mxu0 %v1140_v40  ;;  %1095 = vadd.xlane.f32.xlu1 %v5382_v49  ;;  %v5416_v40 = vadd.f32 %v1740_v16, %v6986_v19 }
 0x566   :  { %4024 = vpow2.f32 %v1065_v44 }
 0x567   :  { %4026 = vrcp.f32 %v1084_v41  ;;  %v5385_v4 = vpop.eup %4022 }
 0x568   :  { %v716_v18 = vpop.xlane.xlu2 %715  ;;  %4028 = vrcp.f32 %v1086_v21  ;;  %1105 = vadd.xlane.f32.xlu0 %v5385_v4 }
 0x569   :  { %v1020_v7 = vpop.xlane.xlu1 %1019 }
 0x56a   :  { %v1039_v48 = vsub.f32 %v5309_v42, %v1020_v7  ;;  %v5397_v42 = vadd.f32 %v1737_v43, %v4957_v1  ;;  %v6987_v7 = vld [vmem:[#allocation21_spill] sm:$0xff] }
 0x56c   :  { %v5389_v60 = vpop.eup %4024  ;;  %v1067_v36 = vmul.f32 1.442695, %v1039_v48 }
 0x56d   :  { %v4027_v50 = vpop.eup %4026  ;;  %1097 = vadd.xlane.f32.xlu2 %v5389_v60 }
 0x56e   :  { %4030 = vpow2.f32 %v1067_v36  ;;  %v4029_v59 = vpop.eup %4028  ;;  %v1127_v61 = vmul.f32 %v4027_v50, %v5290_v32  ;;  %v1739_v32 = vmul.f32 0.35355338, %v1705_v3 }
 0x56f   :  { %4032 = vrcp.f32 %v710_v22  ;;  %v1128_v37 = vmul.f32 %v4029_v59, %v5249_v23  ;;  %v6983_v23 = vld [vmem:[#allocation39_spill] sm:$0xff] }
 0x570   :  { %v1022_v33 = vpop.xlane.xlu2 %1021  ;;  %v5408_v41 = vadd.f32 %v1739_v32, %v6984_v55 }
 0x571   :  { %v1040_v21 = vsub.f32 %v5321_v24, %v1022_v33  ;;  %v712_v51 = vpop.xlane.xlu1 %711  ;;  %v1141_v62 = vpack.c.bf16 %v1128_v37, %v1127_v61  ;;  %v6988_v37 = vld [vmem:[#allocation24_spill] sm:$0xff] }
 0x572   :  { %4034 = vrcp.f32 %v712_v51 }
 0x573   :  { %v1069_v57 = vmul.f32 1.442695, %v1040_v21 }
 0x574   :  { %v5399_v11 = vpop.eup %4030 }
 0x575   :  { %1771 = vmax.xlane.f32.xlu2 %v5397_v42  ;;  %1099 = vadd.xlane.f32.xlu1 %v5399_v11  ;;  %4036 = vpow2.f32 %v1069_v57  ;;  %v4033_v12 = vpop.eup %4032  ;;  %v1770_v57 = vpop.xlane.xlu0 %1769 }
 0x576   :  { %1189 = vmatmul.bf16.gmra.mxu0 %v1141_v62  ;;  %v747_v9 = vmul.f32 %v4033_v12, %v6983_v23  ;;  %v1710_v62 = vpop.f32.mrf.mxu1  ;;  %v6992_v23 = vld [vmem:[#allocation25_spill] sm:$0xff] }
 0x577   :  { %v1741_v12 = vmul.f32 0.35355338, %v1710_v62 }
 0x578   :  { %v4035_v24 = vpop.eup %4034 }
 0x579   :  { %v714_v22 = vpop.xlane.xlu1 %713  ;;  %v748_v20 = vmul.f32 %v4035_v24, %v5323_v38  ;;  %v6991_v24 = vld [vmem:[#allocation34_spill] sm:$0xff] }
 0x57a   :  { %4038 = vrcp.f32 %v714_v22  ;;  %v5440_v22 = vadd.f32 %v1741_v12, %v6991_v24 }
 0x57b   :  { %v5405_v58 = vpop.eup %4036  ;;  %v758_v2 = vpack.c.bf16 %v748_v20, %v747_v9  ;;  %4040 = vrcp.f32 %v5369_v6  ;;  %v6993_v20 = vld [vmem:[#allocation20_spill] sm:$0xff] }
 0x57c   :  { %1539 = vrot.lane.b32.xlu0 %v6985_v5, %s4311_s2  ;;  %4042 = vrcp.f32 %v716_v18 }
 0x57d   :  { %1101 = vadd.xlane.f32.xlu2 %v5405_v58  ;;  %818 = vmatmul.bf16.gmra.mxu3 %v758_v2 }
 0x57e   :  { %1775 = vmax.xlane.f32.xlu1 %v5408_v41 }
 0x580   :  { %v4039_v44 = vpop.eup %4038 }
 0x581   :  { %v1090_v38 = vpop.xlane.xlu1 %1089  ;;  %v4041_v48 = vpop.eup %4040  ;;  %v749_v59 = vmul.f32 %v4039_v44, %v5335_v31 }
 0x582   :  { %4044 = vrcp.f32 %v1090_v38  ;;  %v4043_v36 = vpop.eup %4042  ;;  %v1129_v43 = vmul.f32 %v4041_v48, %v5262_v27  ;;  %v6998_v48 = vld [vmem:[#allocation26_spill] sm:$0xff] }
 0x583   :  { %v750_v18 = vmul.f32 %v4043_v36, %v5306_v25  ;;  %v5432_v25 = vpop.f32.mrf.mxu3 }
 0x584   :  { %1537 = vrot.lane.b32.xlu0 %v6987_v7, %s4311_s2  ;;  %6989 = vst [vmem:[#allocation39_spill] sm:$0xff] %v5432_v25 }
 0x585   :  { %v759_v21 = vpack.c.bf16 %v750_v18, %v749_v59 }
 0x586   :  { %1777 = vmax.xlane.f32.xlu1 %v5416_v40 }
 0x588   :  { %v4045_v50 = vpop.eup %4044 }
 0x589   :  { %v1130_v6 = vmul.f32 %v4045_v50, %v5341_v46  ;;  %v718_v61 = vpop.xlane.xlu1 %717 }
 0x58a   :  { %4046 = vrcp.f32 %v718_v61 }
 0x58b   :  { %v1142_v33 = vpack.c.bf16 %v1130_v6, %v1129_v43  ;;  %4048 = vrcp.f32 %v5372_v54  ;;  %v1800_v54 = vsub.f32 %v5303_v28, %v1770_v57  ;;  %v5437_v32 = vpop.f32.mrf.mxu3  ;;  %v1712_v43 = vpop.f32.mrf.mxu1 }
 0x58c   :  { %6990 = vst [vmem:[#allocation32_spill] sm:$0xff] %v5437_v32 }
 0x58d   :  { %1194 = vmatmul.bf16.gmra.mxu0 %v1142_v33  ;;  %823 = vmatmul.bf16.gmra.mxu3 %v759_v21  ;;  %v1742_v21 = vmul.f32 0.35355338, %v1712_v43 }
 0x590   :  { %v4047_v51 = vpop.eup %4046 }
 0x591   :  { %v4049_v3 = vpop.eup %4048  ;;  %v751_v31 = vmul.f32 %v4047_v51, %v5347_v39  ;;  %v1817_v39 = vmul.f32 1.442695, %v1800_v54 }
 0x592   :  { %v752_v27 = vmul.f32 %v4049_v3, %v5273_v26  ;;  %v1024_v26 = vpop.xlane.xlu2 %1023  ;;  %v7001_v3 = vld [vmem:[#allocation30_spill] sm:$0xff] }
 0x593   :  { %v1041_v9 = vsub.f32 %v5333_v14, %v1024_v26  ;;  %4050 = vpow2.f32 %v1817_v39  ;;  %v5448_v28 = vpop.f32.mrf.mxu3  ;;  %v6995_v14 = vld [vmem:[#allocation27_spill] sm:$0xff]  ;;  %v5488_v26 = vpop.xlane.xlu0 %1773 }
 0x594   :  { %v760_v46 = vpack.c.bf16 %v752_v27, %v751_v31  ;;  %6994 = vst [vmem:[#allocation19_spill] sm:$0xff] %v5448_v28  ;;  %v7002_v31 = vld [vmem:[#allocation35_spill] sm:$0xff] }
 0x595   :  { %1547 = vrot.lane.b32.xlu2 %v6988_v37, %s4311_s2  ;;  %v5479_v27 = vadd.f32 %v1742_v21, %v7002_v31 }
 0x599   :  { %v5450_v2 = vpop.eup %4050 }
 0x59b   :  { %v5460_v16 = vpop.f32.mrf.mxu3 }
 0x59c   :  { %6996 = vst [vmem:[#allocation33_spill] sm:$0xff] %v5460_v16 }
 0x59d   :  { %828 = vmatmul.bf16.gmra.mxu3 %v760_v46 }
 0x59f   :  { %1933 = vrot.lane.b32.xlu1 %v6988_v37, %s4312_s30 }
 0x5a3   :  { %v5462_v38 = vpop.f32.mrf.mxu3 }
 0x5a4   :  { %6997 = vst [vmem:[#allocation21_spill] sm:$0xff] %v5462_v38 }
 0x5a7   :  { %1931 = vrot.lane.b32.xlu1 %v4601_v15, %s4312_s30  ;;  %v1071_v15 = vmul.f32 1.442695, %v1041_v9 }
 0x5a9   :  { %4052 = vpow2.f32 %v1071_v15 }
 0x5ab   :  { %v1094_v44 = vpop.xlane.xlu2 %1093 }
 0x5ac   :  { %4054 = vrcp.f32 %v1094_v44 }
 0x5ad   :  { %3683 = vmatmul.msk.bf16.vlgmr.msra.gmra.mxu3 %vm479_vm3, %v6992_v23  ;;  %v7004_v23 = vld [vmem:[#allocation28_spill] sm:$0xff] }
 0x5ae   :  { %1779 = vmax.xlane.f32.xlu0 %v5440_v22 }
 0x5af   :  { %1541 = vrot.lane.b32.xlu1 %v6993_v20, %s4311_s2  ;;  %v5455_v56 = vpop.eup %4052 }
 0x5b2   :  { %v4055_v50 = vpop.eup %4054 }
 0x5b3   :  { %v1768_v6 = vpop.xlane.xlu2 %1767  ;;  %v1132_v33 = vmul.f32 %v4055_v50, %v5361_v8 }
 0x5b6   :  { %1849 = vadd.xlane.f32.xlu0 %v5450_v2 }
 0x5b7   :  { %1929 = vrot.lane.b32.xlu1 %v4587_v47, %s4312_s30  ;;  %v5466_v47 = vpop.f32.mrf.mxu3 }
 0x5b8   :  { %6999 = vst [vmem:[#allocation24_spill] sm:$0xff] %v5466_v47 }
 0x5bd   :  { %3684 = vmatmul.msk.bf16.gmra.mxu3 %vm479_vm3, %v6995_v14  ;;  %v1546_v14 = vpop.permute.xlu0 %1545 }
 0x5be   :  { %1103 = vadd.xlane.f32.xlu2 %v5455_v56 }
 0x5bf   :  { %v5472_v51 = vpop.f32.mrf.mxu3 }
 0x5c0   :  { %7000 = vst [vmem:[#allocation34_spill] sm:$0xff] %v5472_v51 }
 0x5cd   :  { %3685 = vmatmul.msk.bf16.gmra.mxu3 %vm479_vm3, %v6998_v48 }
 0x5d0   :  { %v1092_v36 = vpop.xlane.xlu1 %1091 }
 0x5d1   :  { %4056 = vrcp.f32 %v1092_v36 }
 0x5d6   :  { %1927 = vrot.lane.b32.xlu2 %v6993_v20, %s4312_s30 }
 0x5d7   :  { %v4057_v59 = vpop.eup %4056 }
 0x5d8   :  { %v1131_v18 = vmul.f32 %v4057_v59, %v5375_v29  ;;  %v1096_v37 = vpop.xlane.xlu1 %1095  ;;  %v5482_v29 = vpop.f32.mrf.mxu3  ;;  %v7007_v59 = vld [vmem:[#allocation23_spill] sm:$0xff] }
 0x5d9   :  { %4058 = vrcp.f32 %v1096_v37  ;;  %7003 = vst [vmem:[#allocation25_spill] sm:$0xff] %v5482_v29  ;;  %v5516_v37 = vpop.f32.mrf.mxu0 }
 0x5da   :  { %v1143_v61 = vpack.c.bf16 %v1132_v33, %v1131_v18  ;;  %v7008_v33 = vld [vmem:[#allocation31_spill] sm:$0xff] }
 0x5dc   :  { %1199 = vmatmul.bf16.gmra.mxu0 %v1143_v61 }
 0x5dd   :  { %3686 = vmatmul.msk.bf16.gmra.mxu3 %vm479_vm3, %v7001_v3  ;;  %v7011_v3 = vld [vmem:[#allocation29_spill] sm:$0xff] }
 0x5de   :  { %1925 = vrot.lane.b32.xlu2 %v6985_v5, %s4312_s30 }
 0x5df   :  { %v4059_v8 = vpop.eup %4058 }
 0x5e0   :  { %v1098_v46 = vpop.xlane.xlu2 %1097  ;;  %v1133_v54 = vmul.f32 %v4059_v8, %v5382_v49  ;;  %v5492_v9 = vpop.f32.mrf.mxu3  ;;  %v1799_v49 = vsub.f32 %v5366_v17, %v1768_v6 }
 0x5e1   :  { %4060 = vrcp.f32 %v1098_v46  ;;  %1781 = vmax.xlane.f32.xlu1 %v5479_v27  ;;  %7005 = vst [vmem:[#allocation20_spill] sm:$0xff] %v5492_v9  ;;  %v1544_v17 = vpop.permute.xlu0 %1543 }
 0x5e2   :  { %v1815_v18 = vmul.f32 1.442695, %v1799_v49 }
 0x5e7   :  { %v4061_v57 = vpop.eup %4060 }
 0x5e8   :  { %v5484_v62 = vpop.xlane.xlu2 %1771  ;;  %v1134_v12 = vmul.f32 %v4061_v57, %v5389_v60  ;;  %v1100_v5 = vpop.xlane.xlu1 %1099 }
 0x5e9   :  { %4062 = vrcp.f32 %v1100_v5  ;;  %v5497_v50 = vpop.f32.mrf.mxu3  ;;  %v1106_v57 = vpop.xlane.xlu0 %1105  ;;  %v7014_v5 = vld [vmem:[#allocation38_spill] sm:$0xff] }
 0x5ea   :  { %v1144_v39 = vpack.c.bf16 %v1134_v12, %v1133_v54  ;;  %7006 = vst [vmem:[#allocation27_spill] sm:$0xff] %v5497_v50  ;;  %v5522_v54 = vpop.f32.mrf.mxu0  ;;  %v1715_v50 = vpop.f32.mrf.mxu1 }
 0x5ec   :  { %1204 = vmatmul.bf16.gmra.mxu0 %v1144_v39 }
 0x5ed   :  { %3687 = vmatmul.msk.bf16.gmra.mxu3 %vm479_vm3, %v7004_v23 }
 0x5ef   :  { %v4063_v15 = vpop.eup %4062 }
 0x5f0   :  { %v1102_v20 = vpop.xlane.xlu2 %1101  ;;  %v1135_v60 = vmul.f32 %v4063_v15, %v5399_v11 }
 0x5f1   :  { %4064 = vrcp.f32 %v1102_v20  ;;  %v5503_v61 = vpop.xlane.xlu1 %1775  ;;  %v1540_v39 = vpop.permute.xlu0 %1539 }
 0x5f2   :  { %4066 = vpow2.f32 %v1815_v18  ;;  %v5528_v23 = vpop.f32.mrf.mxu0 }
 0x5f3   :  { %4068 = vrcp.f32 %v1106_v57 }
 0x5f7   :  { %v4065_v44 = vpop.eup %4064 }
 0x5f8   :  { %v1548_v48 = vpop.permute.xlu2 %1547  ;;  %v1136_v36 = vmul.f32 %v4065_v44, %v5405_v58  ;;  %v5509_v58 = vpop.eup %4066 }
 0x5f9   :  { %1557 = vmatpush.bf16.msra.mxu2 %v1548_v48  ;;  %v5512_v6 = vpop.xlane.xlu1 %1777 }
 0x5fa   :  { %1535 = vrot.lane.b32.xlu1 %v7007_v59, %s4311_s2  ;;  %v1145_v43 = vpack.c.bf16 %v1136_v36, %v1135_v60  ;;  %v5534_v48 = vpop.f32.mrf.mxu0 }
 0x5fc   :  { %1209 = vmatmul.bf16.gmra.mxu0 %v1145_v43 }
 0x5fd   :  { %1558 = vmatpush.bf16.msra.mxu2 %v1546_v14  ;;  %3688 = vmatmul.msk.bf16.gmra.mxu3 %vm479_vm3, %v7008_v33  ;;  %v1538_v14 = vpop.permute.xlu0 %1537 }
 0x600   :  { %v5505_v11 = vpop.f32.mrf.mxu3 }
 0x601   :  { %7009 = vst [vmem:[#allocation26_spill] sm:$0xff] %v5505_v11  ;;  %1559 = vmatpush.bf16.msra.mxu2 %v1544_v17  ;;  %v4069_v17 = vpop.eup %4068 }
 0x602   :  { %1923 = vrot.lane.b32.xlu1 %v6987_v7, %s4312_s30  ;;  %v5539_v33 = vpop.f32.mrf.mxu0 }
 0x607   :  { %1847 = vadd.xlane.f32.xlu2 %v5509_v58 }
 0x608   :  { %v5514_v21 = vpop.f32.mrf.mxu3 }
 0x609   :  { %7010 = vst [vmem:[#allocation30_spill] sm:$0xff] %v5514_v21 }
 0x60d   :  { %3689 = vmatmul.msk.bf16.gmra.mxu3 %vm479_vm3, %v7011_v3 }
 0x610   :  { %v5520_v46 = vpop.f32.mrf.mxu3 }
 0x611   :  { %7012 = vst [vmem:[#allocation35_spill] sm:$0xff] %v5520_v46  ;;  %v1934_v8 = vpop.permute.xlu1 %1933 }
 0x612   :  { %1943 = vmatpush.bf16.msra.mxu0 %v1934_v8 }
 0x618   :  { %v5524_v7 = vpop.f32.mrf.mxu3 }
 0x619   :  { %7013 = vst [vmem:[#allocation28_spill] sm:$0xff] %v5524_v7  ;;  %v1932_v12 = vpop.permute.xlu1 %1931 }
 0x61a   :  { %1944 = vmatpush.bf16.msra.mxu0 %v1932_v12 }
 0x61d   :  { %3690 = vmatmul.msk.bf16.gmra.mxu3 %vm479_vm3, %v7014_v5  ;;  %v1138_v5 = vmul.f32 %v4069_v17, %v5385_v4 }
 0x620   :  { %v5530_v15 = vpop.f32.mrf.mxu3 }
 0x621   :  { %v1542_v20 = vpop.permute.xlu1 %1541  ;;  %7015 = vst [vmem:[#allocation23_spill] sm:$0xff] %v5530_v15  ;;  %v5598_v21 = vpop.xlane.xlu0 %1779 }
 0x622   :  { %1560 = vmatpush.bf16.msra.mxu2 %v1542_v20 }
 0x626   :  { %1561 = vmatpush.bf16.msra.mxu2 %v1540_v39 }
 0x628   :  { %v5532_v49 = vpop.f32.mrf.mxu3 }
 0x629   :  { %v1930_v44 = vpop.permute.xlu1 %1929  ;;  %7016 = vst [vmem:[#allocation31_spill] sm:$0xff] %v5532_v49  ;;  %v7018_v49 = vld [vmem:[#allocation36_spill] sm:$0xff]  ;;  %v5607_v7 = vpop.xlane.xlu0 %1849 }
 0x62a   :  { %1562 = vmatpush.bf16.msra.mxu2 %v1538_v14  ;;  %1945 = vmatpush.bf16.msra.mxu0 %v1930_v44 }
 0x630   :  { %v1309_v60 = vpop.f32.mrf.mxu3 }
 0x631   :  { %v1104_v36 = vpop.xlane.xlu2 %1103  ;;  %v1349_v43 = vmul.f32 0.35355338, %v1309_v60 }
 0x632   :  { %4070 = vrcp.f32 %v1104_v36 }
 0x633   :  { %v5537_v18 = vadd.f32 %v1349_v43, %v4894_v45  ;;  %v5548_v45 = vpop.f32.mrf.mxu0 }
 0x635   :  { %1381 = vmax.xlane.f32.xlu0 %v5537_v18 }
 0x638   :  { %v4071_v3 = vpop.eup %4070  ;;  %v1311_v8 = vpop.f32.mrf.mxu3 }
 0x639   :  { %v1928_v12 = vpop.permute.xlu2 %1927  ;;  %v1137_v39 = vmul.f32 %v4071_v3, %v5455_v56  ;;  %v1350_v57 = vmul.f32 0.35355338, %v1311_v8 }
 0x63a   :  { %1946 = vmatpush.bf16.msra.mxu0 %v1928_v12 }
 0x63b   :  { %v1146_v20 = vpack.c.bf16 %v1138_v5, %v1137_v39  ;;  %v5545_v14 = vadd.f32 %v1350_v57, %v4960_v10  ;;  %v5554_v4 = vpop.f32.mrf.mxu0 }
 0x63d   :  { %1214 = vmatmul.bf16.gmra.mxu0 %v1146_v20  ;;  %1383 = vmax.xlane.f32.xlu1 %v5545_v14 }
 0x640   :  { %v1314_v44 = vpop.f32.mrf.mxu3 }
 0x641   :  { %v1926_v60 = vpop.permute.xlu2 %1925  ;;  %v1351_v36 = vmul.f32 0.35355338, %v1314_v44 }
 0x642   :  { %1947 = vmatpush.bf16.msra.mxu0 %v1926_v60 }
 0x643   :  { %v5551_v43 = vadd.f32 %v1351_v36, %v4957_v1  ;;  %v5560_v3 = vpop.f32.mrf.mxu0 }
 0x645   :  { %1385 = vmax.xlane.f32.xlu0 %v5551_v43 }
 0x648   :  { %v1316_v56 = vpop.f32.mrf.mxu3 }
 0x649   :  { %v1352_v17 = vmul.f32 0.35355338, %v1316_v56  ;;  %v7017_v56 = vld [vmem:[#allocation22_spill] sm:$0xff] }
 0x64b   :  { %v5557_v10 = vadd.f32 %v1352_v17, %v4986_v52 }
 0x64d   :  { %1387 = vmax.xlane.f32.xlu1 %v5557_v10 }
 0x650   :  { %v1319_v8 = vpop.f32.mrf.mxu3 }
 0x651   :  { %v1353_v12 = vmul.f32 0.35355338, %v1319_v8 }
 0x653   :  { %v5563_v39 = vadd.f32 %v1353_v12, %v6984_v55 }
 0x654   :  { %v5570_v52 = vpop.xlane.xlu1 %1781 }
 0x655   :  { %1389 = vmax.xlane.f32.xlu0 %v5563_v39 }
 0x658   :  { %v1321_v1 = vpop.f32.mrf.mxu3 }
 0x659   :  { %v5566_v5 = vpop.f32.mrf.mxu0 }
 0x660   :  { %v1324_v57 = vpop.f32.mrf.mxu3 }
 0x661   :  { %v5568_v20 = vpop.f32.mrf.mxu0  ;;  %v1355_v44 = vmul.f32 0.35355338, %v1324_v57 }
 0x663   :  { %v5573_v60 = vadd.f32 %v1355_v44, %v6991_v24 }
 0x665   :  { %1393 = vmax.xlane.f32.xlu2 %v5573_v60 }
 0x666   :  { %1921 = vrot.lane.b32.xlu1 %v7007_v59, %s4312_s30 }
 0x668   :  { %v1326_v55 = vpop.f32.mrf.mxu3 }
 0x669   :  { %v5578_v36 = vpop.f32.mrf.mxu0  ;;  %1533 = vrot.lane.b32.xlu0 %v7017_v56, %s4311_s2 }
 0x66c   :  { %v1536_v17 = vpop.permute.xlu1 %1535 }
 0x66d   :  { %1563 = vmatpush.bf16.msra.mxu2 %v1536_v17  ;;  %v1354_v17 = vmul.f32 0.35355338, %v1321_v1  ;;  %v1743_v1 = vmul.f32 0.35355338, %v1715_v50 }
 0x66f   :  { %v5595_v11 = vadd.f32 %v1354_v17, %v6986_v19  ;;  %v1801_v19 = vsub.f32 %v5397_v42, %v5484_v62  ;;  %v5613_v17 = vadd.f32 %v1743_v1, %v5090_v63 }
 0x670   :  { %v1329_v8 = vpop.f32.mrf.mxu3 }
 0x671   :  { %v5582_v12 = vpop.f32.mrf.mxu0 }
 0x674   :  { %v1924_v57 = vpop.permute.xlu1 %1923 }
 0x675   :  { %1948 = vmatpush.bf16.msra.mxu0 %v1924_v57  ;;  %v1356_v57 = vmul.f32 0.35355338, %v1326_v55  ;;  %v1819_v55 = vmul.f32 1.442695, %v1801_v19 }
 0x677   :  { %4072 = vpow2.f32 %v1819_v55 }
 0x678   :  { %v1331_v24 = vpop.f32.mrf.mxu3 }
 0x679   :  { %v5584_v44 = vpop.f32.mrf.mxu0  ;;  %v1358_v15 = vmul.f32 0.35355338, %v1331_v24  ;;  %v5601_v24 = vadd.f32 %v1356_v57, %v7002_v31 }
 0x67b   :  { %v5587_v46 = vadd.f32 %v1358_v15, %v7018_v49  ;;  %v1357_v15 = vmul.f32 0.35355338, %v1329_v8 }
 0x67d   :  { %1399 = vmax.xlane.f32.xlu2 %v5587_v46  ;;  %v5605_v9 = vadd.f32 %v1357_v15, %v5090_v63  ;;  %v5617_v15 = vpop.f32.mrf.mxu1  ;;  %v5619_v51 = vpop.eup %4072 }
 0x680   :  { %v1334_v29 = vpop.f32.mrf.mxu3 }
 0x681   :  { %v5590_v59 = vpop.f32.mrf.mxu0  ;;  %v1359_v63 = vmul.f32 0.35355338, %v1334_v29 }
 0x685   :  { %v1720_v1 = vpop.f32.mrf.mxu1 }
 0x690   :  { %1391 = vmax.xlane.f32.xlu1 %v5595_v11 }
 0x698   :  { %1395 = vmax.xlane.f32.xlu1 %v5601_v24 }
 0x6a0   :  { %1397 = vmax.xlane.f32.xlu1 %v5605_v9 }
 0x6a8   :  { %1783 = vmax.xlane.f32.xlu1 %v5613_v17  ;;  %v1382_v31 = vpop.xlane.xlu0 %1381 }
 0x6a9   :  { %v1413_v8 = vsub.f32 %v5537_v18, %v1382_v31  ;;  %v7019_v18 = vld [vmem:[#allocation37_spill] sm:$0xff]  ;;  %v1803_v31 = vsub.f32 %v5408_v41, %v5503_v61 }
 0x6aa   :  { %v5627_v19 = vadd.f32 %v1359_v63, %v7019_v18 }
 0x6ab   :  { %v1429_v57 = vmul.f32 1.442695, %v1413_v8 }
 0x6ad   :  { %4074 = vpow2.f32 %v1429_v57  ;;  %v1802_v57 = vsub.f32 %v5317_v13, %v5488_v26 }
 0x6af   :  { %v1821_v41 = vmul.f32 1.442695, %v1802_v57 }
 0x6b0   :  { %v1384_v38 = vpop.xlane.xlu1 %1383  ;;  %1851 = vadd.xlane.f32.xlu1 %v5619_v51 }
 0x6b1   :  { %v1414_v42 = vsub.f32 %v5545_v14, %v1384_v38  ;;  %v1745_v38 = vmul.f32 0.35355338, %v1720_v1 }
 0x6b3   :  { %v5623_v62 = vpop.eup %4074  ;;  %v1431_v50 = vmul.f32 1.442695, %v1414_v42  ;;  %v1823_v42 = vmul.f32 1.442695, %v1803_v31  ;;  %v5639_v63 = vadd.f32 %v1745_v38, %v7019_v18  ;;  %v1722_v38 = vpop.f32.mrf.mxu1 }
 0x6b4   :  { %1461 = vadd.xlane.f32.xlu2 %v5623_v62 }
 0x6b5   :  { %4076 = vpow2.f32 %v1431_v50  ;;  %v1336_v50 = vpop.f32.mrf.mxu3 }
 0x6b6   :  { %v1360_v31 = vmul.f32 0.35355338, %v1336_v50 }
 0x6b8   :  { %1401 = vmax.xlane.f32.xlu1 %v5627_v19  ;;  %v1386_v55 = vpop.xlane.xlu0 %1385 }
 0x6b9   :  { %v1415_v8 = vsub.f32 %v5551_v43, %v1386_v55 }
 0x6bb   :  { %v5633_v29 = vpop.eup %4076  ;;  %v1433_v14 = vmul.f32 1.442695, %v1415_v8 }
 0x6bc   :  { %1463 = vadd.xlane.f32.xlu2 %v5633_v29 }
 0x6bd   :  { %4078 = vpow2.f32 %v1433_v14  ;;  %v1339_v1 = vpop.f32.mrf.mxu3  ;;  %v5653_v14 = vadd.f32 %v1360_v31, %v5134_v35  ;;  %v1725_v31 = vpop.f32.mrf.mxu1 }
 0x6be   :  { %4080 = vpow2.f32 %v1823_v42 }
 0x6bf   :  { %4082 = vpow2.f32 %v1821_v41 }
 0x6c0   :  { %1787 = vmax.xlane.f32.xlu1 %v5639_v63  ;;  %v1388_v8 = vpop.xlane.xlu1 %1387 }
 0x6c3   :  { %v5642_v61 = vpop.eup %4078 }
 0x6c4   :  { %1465 = vadd.xlane.f32.xlu0 %v5642_v61  ;;  %v5645_v43 = vpop.eup %4080 }
 0x6c5   :  { %v5649_v18 = vpop.eup %4082  ;;  %v1341_v42 = vpop.f32.mrf.mxu3 }
 0x6c6   :  { %v1362_v41 = vmul.f32 0.35355338, %v1341_v42  ;;  %v1747_v42 = vmul.f32 0.35355338, %v1725_v31  ;;  %v1848_v31 = vpop.xlane.xlu2 %1847 }
 0x6c8   :  { %1855 = vadd.xlane.f32.xlu1 %v5645_v43  ;;  %v1390_v13 = vpop.xlane.xlu0 %1389 }
 0x6c9   :  { %v1417_v26 = vsub.f32 %v5563_v39, %v1390_v13  ;;  %v1746_v39 = vmul.f32 0.35355338, %v1722_v38  ;;  %v1361_v38 = vmul.f32 0.35355338, %v1339_v1 }
 0x6cb   :  { %v1437_v55 = vmul.f32 1.442695, %v1417_v26  ;;  %v5662_v50 = vadd.f32 %v1746_v39, %v5134_v35  ;;  %v5665_v26 = vadd.f32 %v1362_v41, %v5031_v34  ;;  %v5675_v35 = vadd.f32 %v1747_v42, %v5149_v53 }
 0x6cc   :  { %1853 = vadd.xlane.f32.xlu0 %v5649_v18  ;;  %v1744_v41 = vmul.f32 0.35355338, %v5617_v15  ;;  %v1727_v15 = vpop.f32.mrf.mxu1 }
 0x6cd   :  { %4084 = vpow2.f32 %v1437_v55 }
 0x6d3   :  { %v5655_v57 = vpop.eup %4084 }
 0x6d4   :  { %1919 = vrot.lane.b32.xlu2 %v7017_v56, %s4312_s30  ;;  %1403 = vmax.xlane.f32.xlu0 %v5653_v14  ;;  %v1806_v56 = vsub.f32 %v5479_v27, %v5570_v52  ;;  %v1416_v27 = vsub.f32 %v5557_v10, %v1388_v8  ;;  %v1805_v8 = vsub.f32 %v5440_v22, %v5598_v21 }
 0x6d5   :  { %1469 = vadd.xlane.f32.xlu1 %v5655_v57 }
 0x6d6   :  { %v1829_v47 = vmul.f32 1.442695, %v1806_v56  ;;  %v1435_v52 = vmul.f32 1.442695, %v1416_v27  ;;  %v1827_v27 = vmul.f32 1.442695, %v1805_v8 }
 0x6d8   :  { %v1922_v13 = vpop.permute.xlu1 %1921  ;;  %4086 = vpow2.f32 %v1829_v47  ;;  %v5690_v47 = vadd.f32 %v1744_v41, %v7018_v49  ;;  %v1394_v42 = vpop.xlane.xlu2 %1393 }
 0x6d9   :  { %1949 = vmatpush.bf16.msra.mxu0 %v1922_v13  ;;  %v5672_v13 = vadd.f32 %v1361_v38, %v5149_v53  ;;  %4088 = vpow2.f32 %v1435_v52  ;;  %v1804_v53 = vsub.f32 %v5416_v40, %v5512_v6  ;;  %v1748_v52 = vmul.f32 0.35355338, %v1727_v15 }
 0x6db   :  { %v1534_v55 = vpop.permute.xlu0 %1533  ;;  %v5705_v21 = vadd.f32 %v1748_v52, %v5031_v34 }
 0x6dc   :  { %1789 = vmax.xlane.f32.xlu0 %v5662_v50  ;;  %1564 = vmatpush.bf16.msra.mxu2 %v1534_v55  ;;  %v1825_v55 = vmul.f32 1.442695, %v1804_v53 }
 0x6dd   :  { %1407 = vmax.xlane.f32.xlu1 %v5665_v26 }
 0x6de   :  { %v5679_v39 = vpop.eup %4086  ;;  %4090 = vpow2.f32 %v1825_v55 }
 0x6df   :  { %v5683_v1 = vpop.eup %4088 }
 0x6e4   :  { %1405 = vmax.xlane.f32.xlu0 %v5672_v13  ;;  %v5696_v6 = vpop.eup %4090 }
 0x6e5   :  { %1791 = vmax.xlane.f32.xlu1 %v5675_v35 }
 0x6ed   :  { %1861 = vadd.xlane.f32.xlu1 %v5679_v39 }
 0x6fd   :  { %1467 = vadd.xlane.f32.xlu2 %v5683_v1 }
 0x703   :  { %v1392_v56 = vpop.xlane.xlu1 %1391 }
 0x704   :  { %v1418_v38 = vsub.f32 %v5595_v11, %v1392_v56  ;;  %v1419_v11 = vsub.f32 %v5573_v60, %v1394_v42  ;;  %v1730_v56 = vpop.f32.mrf.mxu1 }
 0x705   :  { %1785 = vmax.xlane.f32.xlu2 %v5690_v47 }
 0x706   :  { %v1439_v10 = vmul.f32 1.442695, %v1418_v38  ;;  %v1441_v22 = vmul.f32 1.442695, %v1419_v11  ;;  %v1344_v38 = vpop.f32.mrf.mxu3 }
 0x707   :  { %v1363_v52 = vmul.f32 0.35355338, %v1344_v38 }
 0x708   :  { %4092 = vpow2.f32 %v1439_v10 }
 0x709   :  { %4094 = vpow2.f32 %v1827_v27 }
 0x70a   :  { %4096 = vpow2.f32 %v1441_v22 }
 0x70b   :  { %v1396_v40 = vpop.xlane.xlu1 %1395 }
 0x70c   :  { %v1420_v53 = vsub.f32 %v5601_v24, %v1396_v40  ;;  %v1400_v24 = vpop.xlane.xlu2 %1399 }
 0x70d   :  { %1857 = vadd.xlane.f32.xlu2 %v5696_v6  ;;  %v1422_v11 = vsub.f32 %v5587_v46, %v1400_v24  ;;  %v1749_v24 = vmul.f32 0.35355338, %v1730_v56 }
 0x70e   :  { %v5699_v49 = vpop.eup %4092  ;;  %v1443_v41 = vmul.f32 1.442695, %v1420_v53  ;;  %v1346_v27 = vpop.f32.mrf.mxu3 }
 0x70f   :  { %1471 = vadd.xlane.f32.xlu0 %v5699_v49  ;;  %v5709_v8 = vpop.eup %4094  ;;  %v1364_v22 = vmul.f32 0.35355338, %v1346_v27 }
 0x710   :  { %4098 = vpow2.f32 %v1443_v41  ;;  %v5712_v34 = vpop.eup %4096  ;;  %v1447_v41 = vmul.f32 1.442695, %v1422_v11 }
 0x711   :  { %v5729_v28 = vadd.f32 %v1364_v22, %v5131_v0 }
 0x713   :  { %v1398_v55 = vpop.xlane.xlu1 %1397 }
 0x714   :  { %v1421_v10 = vsub.f32 %v5605_v9, %v1398_v55  ;;  %v1732_v9 = vpop.f32.mrf.mxu1  ;;  %v5723_v55 = vadd.f32 %v1363_v52, %v5108_v30 }
 0x715   :  { %1793 = vmax.xlane.f32.xlu2 %v5705_v21  ;;  %v1750_v53 = vmul.f32 0.35355338, %v1732_v9 }
 0x716   :  { %v1445_v60 = vmul.f32 1.442695, %v1421_v10  ;;  %v5714_v40 = vpop.eup %4098 }
 0x717   :  { %1859 = vadd.xlane.f32.xlu0 %v5709_v8 }
 0x718   :  { %4100 = vpow2.f32 %v1445_v60  ;;  %v5726_v60 = vadd.f32 %v1750_v53, %v5131_v0  ;;  %v5739_v0 = vadd.f32 %v1749_v24, %v5108_v30 }
 0x719   :  { %4102 = vpow2.f32 %v1447_v41 }
 0x71a   :  { %4104 = vrcp.f32 %v1848_v31 }
 0x71b   :  { %v1784_v42 = vpop.xlane.xlu1 %1783  ;;  %4106 = vrcp.f32 %v5607_v7 }
 0x71c   :  { %v1807_v46 = vsub.f32 %v5613_v17, %v1784_v42 }
 0x71d   :  { %1473 = vadd.xlane.f32.xlu2 %v5712_v34 }
 0x71e   :  { %v5717_v15 = vpop.eup %4100  ;;  %v1831_v9 = vmul.f32 1.442695, %v1807_v46 }
 0x71f   :  { %1475 = vadd.xlane.f32.xlu0 %v5714_v40  ;;  %1477 = vadd.xlane.f32.xlu1 %v5717_v15  ;;  %v5735_v11 = vpop.eup %4102 }
 0x720   :  { %4108 = vpow2.f32 %v1831_v9  ;;  %v4105_v56 = vpop.eup %4104 }
 0x721   :  { %v4107_v53 = vpop.eup %4106  ;;  %v1895_v30 = vmul.f32 %v4105_v56, %v5509_v58 }
 0x722   :  { %v1896_v46 = vmul.f32 %v4107_v53, %v5450_v2 }
 0x723   :  { %v1852_v10 = vpop.xlane.xlu1 %1851 }
 0x725   :  { %1409 = vmax.xlane.f32.xlu2 %v5723_v55 }
 0x726   :  { %v5744_v31 = vpop.eup %4108 }
 0x727   :  { %v1462_v38 = vpop.xlane.xlu2 %1461  ;;  %1411 = vmax.xlane.f32.xlu0 %v5729_v28  ;;  %1797 = vmax.xlane.f32.xlu1 %v5726_v60 }
 0x728   :  { %4110 = vrcp.f32 %v1462_v38 }
 0x72b   :  { %v1402_v27 = vpop.xlane.xlu1 %1401 }
 0x72c   :  { %v1423_v52 = vsub.f32 %v5627_v19, %v1402_v27 }
 0x72d   :  { %1479 = vadd.xlane.f32.xlu2 %v5735_v11 }
 0x72e   :  { %v1449_v17 = vmul.f32 1.442695, %v1423_v52  ;;  %v4111_v19 = vpop.eup %4110  ;;  %v1911_v52 = vpack.c.bf16 %v1896_v46, %v1895_v30 }
 0x72f   :  { %v1464_v42 = vpop.xlane.xlu2 %1463  ;;  %1795 = vmax.xlane.f32.xlu0 %v5739_v0  ;;  %v1509_v9 = vmul.f32 %v4111_v19, %v5623_v62 }
 0x730   :  { %4112 = vpow2.f32 %v1449_v17 }
 0x731   :  { %4114 = vrcp.f32 %v1464_v42 }
 0x732   :  { %4116 = vrcp.f32 %v1852_v10 }
 0x733   :  { %v5750_v22 = vpop.xlane.xlu1 %1787 }
 0x735   :  { %1863 = vadd.xlane.f32.xlu2 %v5744_v31 }
 0x736   :  { %v5748_v7 = vpop.eup %4112 }
 0x737   :  { %v4115_v41 = vpop.eup %4114  ;;  %v1920_v38 = vpop.permute.xlu2 %1919  ;;  %1481 = vadd.xlane.f32.xlu1 %v5748_v7 }
 0x738   :  { %v1466_v24 = vpop.xlane.xlu0 %1465  ;;  %v1510_v27 = vmul.f32 %v4115_v41, %v5633_v29  ;;  %1950 = vmatpush.bf16.msra.mxu0 %v1920_v38  ;;  %v4117_v56 = vpop.eup %4116 }
 0x739   :  { %v1897_v53 = vmul.f32 %v4117_v56, %v5619_v51 }
 0x73a   :  { %v1525_v58 = vpack.c.bf16 %v1510_v27, %v1509_v9 }
 0x73b   :  { %1951 = vmatmul.bf16.vlgmr.msra.gmra.mxu0 %v1911_v52  ;;  %v1856_v42 = vpop.xlane.xlu1 %1855 }
 0x73c   :  { %1565 = vmatmul.bf16.vlgmr.msra.gmra.mxu2 %v1525_v58 }
 0x740   :  { %v1854_v17 = vpop.xlane.xlu0 %1853 }
 0x741   :  { %4118 = vrcp.f32 %v1854_v17 }
 0x747   :  { %v4119_v16 = vpop.eup %4118 }
 0x748   :  { %v1404_v2 = vpop.xlane.xlu0 %1403  ;;  %v1898_v25 = vmul.f32 %v4119_v16, %v5649_v18  ;;  %v1470_v32 = vpop.xlane.xlu1 %1469 }
 0x749   :  { %v1424_v62 = vsub.f32 %v5653_v14, %v1404_v2 }
 0x74a   :  { %v1912_v29 = vpack.c.bf16 %v1898_v25, %v1897_v53 }
 0x74b   :  { %v1451_v19 = vmul.f32 1.442695, %v1424_v62 }
 0x74c   :  { %1956 = vmatmul.bf16.gmra.mxu0 %v1912_v29 }
 0x74d   :  { %4120 = vpow2.f32 %v1451_v19  ;;  %v1809_v19 = vsub.f32 %v5639_v63, %v5750_v22 }
 0x750   :  { %v1790_v30 = vpop.xlane.xlu0 %1789  ;;  %v1408_v41 = vpop.xlane.xlu1 %1407 }
 0x751   :  { %v1810_v10 = vsub.f32 %v5662_v50, %v1790_v30  ;;  %v1835_v30 = vmul.f32 1.442695, %v1809_v19 }
 0x753   :  { %v5760_v46 = vpop.eup %4120  ;;  %v1837_v38 = vmul.f32 1.442695, %v1810_v10 }
 0x754   :  { %1483 = vadd.xlane.f32.xlu2 %v5760_v46 }
 0x755   :  { %4122 = vpow2.f32 %v1837_v38 }
 0x758   :  { %v1406_v51 = vpop.xlane.xlu0 %1405  ;;  %v1792_v9 = vpop.xlane.xlu1 %1791 }
 0x759   :  { %v1425_v16 = vsub.f32 %v5672_v13, %v1406_v51  ;;  %v1811_v18 = vsub.f32 %v5675_v35, %v1792_v9 }
 0x75b   :  { %v5765_v25 = vpop.eup %4122  ;;  %v1453_v14 = vmul.f32 1.442695, %v1425_v16  ;;  %v1839_v27 = vmul.f32 1.442695, %v1811_v18 }
 0x75c   :  { %1869 = vadd.xlane.f32.xlu1 %v5765_v25 }
 0x75d   :  { %4124 = vpow2.f32 %v1453_v14 }
 0x75e   :  { %4126 = vpow2.f32 %v1839_v27 }
 0x75f   :  { %4128 = vrcp.f32 %v1466_v24 }
 0x760   :  { %v1862_v18 = vpop.xlane.xlu1 %1861 }
 0x763   :  { %v5768_v50 = vpop.eup %4124 }
 0x764   :  { %v5770_v52 = vpop.eup %4126  ;;  %1485 = vadd.xlane.f32.xlu2 %v5768_v50 }
 0x765   :  { %1871 = vadd.xlane.f32.xlu1 %v5770_v52  ;;  %v4129_v35 = vpop.eup %4128 }
 0x766   :  { %v1511_v56 = vmul.f32 %v4129_v35, %v5642_v61  ;;  %v1426_v61 = vsub.f32 %v5665_v26, %v1408_v41 }
 0x768   :  { %v1455_v9 = vmul.f32 1.442695, %v1426_v61 }
 0x770   :  { %v1468_v13 = vpop.xlane.xlu2 %1467 }
 0x771   :  { %4130 = vrcp.f32 %v1468_v13 }
 0x777   :  { %v4131_v58 = vpop.eup %4130 }
 0x778   :  { %v1786_v17 = vpop.xlane.xlu2 %1785  ;;  %v1512_v2 = vmul.f32 %v4131_v58, %v5683_v1 }
 0x779   :  { %v1808_v53 = vsub.f32 %v5690_v47, %v1786_v17 }
 0x77a   :  { %v1526_v62 = vpack.c.bf16 %v1512_v2, %v1511_v56 }
 0x77b   :  { %v1833_v29 = vmul.f32 1.442695, %v1808_v53 }
 0x77c   :  { %1570 = vmatmul.bf16.gmra.mxu2 %v1526_v62 }
 0x77d   :  { %4132 = vpow2.f32 %v1833_v29 }
 0x77e   :  { %4134 = vrcp.f32 %v1856_v42 }
 0x77f   :  { %4136 = vrcp.f32 %v1470_v32 }
 0x780   :  { %v1858_v24 = vpop.xlane.xlu2 %1857 }
 0x781   :  { %4138 = vrcp.f32 %v1858_v24 }
 0x782   :  { %v1472_v10 = vpop.xlane.xlu0 %1471 }
 0x783   :  { %v5779_v38 = vpop.eup %4132  ;;  %4140 = vrcp.f32 %v1472_v10 }
 0x784   :  { %1865 = vadd.xlane.f32.xlu0 %v5779_v38  ;;  %v4135_v1 = vpop.eup %4134  ;;  %4142 = vpow2.f32 %v1835_v30 }
 0x785   :  { %v4137_v47 = vpop.eup %4136  ;;  %v1899_v22 = vmul.f32 %v4135_v1, %v5645_v43  ;;  %4144 = vpow2.f32 %v1455_v9 }
 0x786   :  { %v1513_v26 = vmul.f32 %v4137_v47, %v5655_v57 }
 0x787   :  { %v4139_v51 = vpop.eup %4138 }
 0x788   :  { %v1794_v63 = vpop.xlane.xlu2 %1793  ;;  %v1900_v32 = vmul.f32 %v4139_v51, %v5696_v6 }
 0x789   :  { %v4141_v42 = vpop.eup %4140  ;;  %v1812_v16 = vsub.f32 %v5705_v21, %v1794_v63 }
 0x78a   :  { %v1860_v14 = vpop.xlane.xlu0 %1859  ;;  %v1913_v27 = vpack.c.bf16 %v1900_v32, %v1899_v22  ;;  %v1514_v41 = vmul.f32 %v4141_v42, %v5699_v49  ;;  %v5788_v13 = vpop.eup %4142 }
 0x78b   :  { %v1841_v35 = vmul.f32 1.442695, %v1812_v16  ;;  %4146 = vrcp.f32 %v1860_v14  ;;  %v5791_v21 = vpop.eup %4144 }
 0x78c   :  { %1867 = vadd.xlane.f32.xlu0 %v5788_v13  ;;  %1961 = vmatmul.bf16.gmra.mxu0 %v1913_v27  ;;  %v1527_v43 = vpack.c.bf16 %v1514_v41, %v1513_v26 }
 0x78d   :  { %4148 = vpow2.f32 %v1841_v35 }
 0x78e   :  { %1575 = vmatmul.bf16.gmra.mxu2 %v1527_v43  ;;  %4150 = vrcp.f32 %v1862_v18 }
 0x790   :  { %v1474_v6 = vpop.xlane.xlu2 %1473 }
 0x791   :  { %v4147_v58 = vpop.eup %4146  ;;  %4152 = vrcp.f32 %v1474_v6  ;;  %v3820_v6 = vpack.i.bf16 %v5522_v54, %v5516_v37  ;;  %v3835_v37 = vpack.i.bf16 %v5534_v48, %v5528_v23  ;;  %v3865_v23 = vpack.i.bf16 %v5560_v3, %v5554_v4 }
 0x792   :  { %v1478_v57 = vpop.xlane.xlu1 %1477  ;;  %v1476_v17 = vpop.xlane.xlu0 %1475  ;;  %v1901_v2 = vmul.f32 %v4147_v58, %v5709_v8  ;;  %v3880_v48 = vpack.i.bf16 %v5568_v20, %v5566_v5 }
 0x793   :  { %v5793_v49 = vpop.eup %4148  ;;  %4154 = vrcp.f32 %v1476_v17 }
 0x794   :  { %1487 = vadd.xlane.f32.xlu0 %v5791_v21  ;;  %1873 = vadd.xlane.f32.xlu2 %v5793_v49  ;;  %v4151_v56 = vpop.eup %4150 }
 0x795   :  { %v1902_v29 = vmul.f32 %v4151_v56, %v5679_v39 }
 0x797   :  { %v4153_v53 = vpop.eup %4152  ;;  %v1914_v61 = vpack.c.bf16 %v1902_v29, %v1901_v2 }
 0x798   :  { %v1410_v62 = vpop.xlane.xlu2 %1409  ;;  %v1515_v51 = vmul.f32 %v4153_v53, %v5712_v34 }
 0x799   :  { %v1427_v19 = vsub.f32 %v5723_v55, %v1410_v62  ;;  %v4155_v24 = vpop.eup %4154 }
 0x79a   :  { %v1798_v30 = vpop.xlane.xlu1 %1797  ;;  %v1412_v10 = vpop.xlane.xlu0 %1411  ;;  %v1516_v9 = vmul.f32 %v4155_v24, %v5714_v40 }
 0x79b   :  { %v1457_v1 = vmul.f32 1.442695, %v1427_v19  ;;  %v1428_v47 = vsub.f32 %v5729_v28, %v1412_v10  ;;  %v1814_v8 = vsub.f32 %v5726_v60, %v1798_v30  ;;  %v1215_v60 = vpop.f32.mrf.mxu0 }
 0x79c   :  { %1966 = vmatmul.bf16.gmra.mxu0 %v1914_v61  ;;  %v1528_v22 = vpack.c.bf16 %v1516_v9, %v1515_v51  ;;  %v3850_v61 = vpack.i.bf16 %v5548_v45, %v5539_v33  ;;  %v7020_v33 = vpack.i.bf16 %v5590_v59, %v5584_v44 }
 0x79d   :  { %4156 = vpow2.f32 %v1457_v1  ;;  %v1459_v63 = vmul.f32 1.442695, %v1428_v47  ;;  %v1845_v55 = vmul.f32 1.442695, %v1814_v8 }
 0x79e   :  { %1580 = vmatmul.bf16.gmra.mxu2 %v1528_v22 }
 0x79f   :  { %4158 = vpow2.f32 %v1459_v63 }
 0x7a0   :  { %v1480_v39 = vpop.xlane.xlu2 %1479 }
 0x7a1   :  { %4160 = vrcp.f32 %v1480_v39 }
 0x7a2   :  { %4162 = vrcp.f32 %v1478_v57  ;;  %v1796_v32 = vpop.xlane.xlu0 %1795 }
 0x7a3   :  { %v5804_v42 = vpop.eup %4156  ;;  %v1813_v28 = vsub.f32 %v5739_v0, %v1796_v32  ;;  %4164 = vpow2.f32 %v1845_v55  ;;  %v1217_v35 = vpop.f32.mrf.mxu0 }
 0x7a4   :  { %1489 = vadd.xlane.f32.xlu0 %v5804_v42  ;;  %v3925_v4 = vpack.i.bf16 %v1217_v35, %v1215_v60 }
 0x7a5   :  { %v1843_v34 = vmul.f32 1.442695, %v1813_v28  ;;  %v5808_v40 = vpop.eup %4158 }
 0x7a6   :  { %1491 = vadd.xlane.f32.xlu1 %v5808_v40 }
 0x7a7   :  { %v4161_v16 = vpop.eup %4160  ;;  %4166 = vpow2.f32 %v1843_v34 }
 0x7a8   :  { %v4163_v18 = vpop.eup %4162  ;;  %v1518_v14 = vmul.f32 %v4161_v16, %v5735_v11  ;;  %v1864_v58 = vpop.xlane.xlu2 %1863 }
 0x7a9   :  { %v5812_v27 = vpop.eup %4164  ;;  %v1517_v26 = vmul.f32 %v4163_v18, %v5717_v15 }
 0x7aa   :  { %v1482_v17 = vpop.xlane.xlu1 %1481 }
 0x7ab   :  { %v1529_v41 = vpack.c.bf16 %v1518_v14, %v1517_v26  ;;  %4168 = vrcp.f32 %v1482_v17 }
 0x7ac   :  { %1877 = vadd.xlane.f32.xlu0 %v5812_v27 }
 0x7ad   :  { %v5816_v0 = vpop.eup %4166 }
 0x7ae   :  { %1875 = vadd.xlane.f32.xlu2 %v5816_v0  ;;  %1585 = vmatmul.bf16.gmra.mxu2 %v1529_v41 }
 0x7b1   :  { %v4169_v54 = vpop.eup %4168 }
 0x7b2   :  { %v1519_v19 = vmul.f32 %v4169_v54, %v5748_v7  ;;  %v3895_v7 = vpack.i.bf16 %v5582_v12, %v5578_v36 }
 0x7b8   :  { %v1952_v43 = vpop.f32.mrf.mxu0 }
 0x7bf   :  { %v1566_v57 = vpop.f32.mrf.mxu2  ;;  %3821 = vrot.lane.b32.xlu1 %v3820_v6, %s4313_s8 }
 0x7c0   :  { %v1954_v11 = vpop.f32.mrf.mxu0 }
 0x7c1   :  { %v3830_v15 = vpack.i.bf16 %v1954_v11, %v1952_v43  ;;  %v3784_v43 = vld [vmem:[%s6895_s4 + $0x38] sm:$0xff] }
 0x7c2   :  { %2289 = vmatpush.bf16.msrb.mxu3 %v3784_v43  ;;  %v7024_v43 = vld [vmem:[#allocation19_spill] sm:$0xff] }
 0x7c3   :  { %3831 = vrot.lane.b32.xlu0 %v3830_v15, %s4314_s16 }
 0x7c7   :  { %v1484_v56 = vpop.xlane.xlu2 %1483  ;;  %v1568_v2 = vpop.f32.mrf.mxu2 }
 0x7c8   :  { %4170 = vrcp.f32 %v1484_v56  ;;  %v3825_v53 = vpack.i.bf16 %v1568_v2, %v1566_v57 }
 0x7c9   :  { %v1957_v62 = vpop.f32.mrf.mxu0  ;;  %4172 = vrcp.f32 %v1864_v58 }
 0x7ca   :  { %3826 = vrot.lane.b32.xlu2 %v3825_v53, %s4315_s17 }
 0x7cb   :  { %3836 = vrot.lane.b32.xlu0 %v3835_v37, %s4313_s8 }
 0x7ce   :  { %v4171_v29 = vpop.eup %4170 }
 0x7cf   :  { %v1520_v24 = vmul.f32 %v4171_v29, %v5760_v46  ;;  %v4173_v3 = vpop.eup %4172  ;;  %v1870_v51 = vpop.xlane.xlu1 %1869 }
 0x7d0   :  { %v1903_v47 = vmul.f32 %v4173_v3, %v5744_v31 }
 0x7d1   :  { %v1959_v30 = vpop.f32.mrf.mxu0  ;;  %v1530_v10 = vpack.c.bf16 %v1520_v24, %v1519_v19 }
 0x7d2   :  { %v3845_v1 = vpack.i.bf16 %v1959_v30, %v1957_v62 }
 0x7d3   :  { %1590 = vmatmul.bf16.gmra.mxu2 %v1530_v10  ;;  %3851 = vrot.lane.b32.xlu0 %v3850_v61, %s4313_s8 }
 0x7d4   :  { %3846 = vrot.lane.b32.xlu2 %v3845_v1, %s4314_s16 }
 0x7d7   :  { %v1486_v9 = vpop.xlane.xlu2 %1485 }
 0x7d8   :  { %v1872_v26 = vpop.xlane.xlu1 %1871 }
 0x7db   :  { %3866 = vrot.lane.b32.xlu0 %v3865_v23, %s4313_s8 }
 0x7e3   :  { %3881 = vrot.lane.b32.xlu0 %v3880_v48, %s4313_s8 }
 0x7eb   :  { %3896 = vrot.lane.b32.xlu0 %v3895_v7, %s4313_s8 }
 0x7f3   :  { %3911 = vrot.lane.b32.xlu0 %v7020_v33, %s4313_s8 }
 0x7f7   :  { %v1866_v45 = vpop.xlane.xlu0 %1865 }
 0x7f8   :  { %4174 = vrcp.f32 %v1866_v45 }
 0x7fb   :  { %3926 = vrot.lane.b32.xlu0 %v3925_v4, %s4313_s8 }
 0x7fe   :  { %v4175_v5 = vpop.eup %4174 }
 0x7ff   :  { %v1571_v20 = vpop.f32.mrf.mxu2  ;;  %v1868_v46 = vpop.xlane.xlu0 %1867  ;;  %v1904_v36 = vmul.f32 %v4175_v5, %v5779_v38 }
 0x800   :  { %4176 = vrcp.f32 %v1868_v46 }
 0x801   :  { %v1915_v12 = vpack.c.bf16 %v1904_v36, %v1903_v47  ;;  %4178 = vrcp.f32 %v1870_v51  ;;  %v7022_v47 = vld [vmem:[#allocation39_spill] sm:$0xff] }
 0x802   :  { %4180 = vrcp.f32 %v1486_v9 }
 0x803   :  { %1971 = vmatmul.bf16.gmra.mxu0 %v1915_v12 }
 0x806   :  { %v4177_v22 = vpop.eup %4176 }
 0x807   :  { %v1573_v44 = vpop.f32.mrf.mxu2  ;;  %v1488_v8 = vpop.xlane.xlu0 %1487  ;;  %v1905_v31 = vmul.f32 %v4177_v22, %v5788_v13 }
 0x808   :  { %v3840_v59 = vpack.i.bf16 %v1573_v44, %v1571_v20  ;;  %4182 = vrcp.f32 %v1488_v8  ;;  %v4179_v39 = vpop.eup %4178  ;;  %v1874_v28 = vpop.xlane.xlu2 %1873  ;;  %v7021_v20 = vld [vmem:[#allocation32_spill] sm:$0xff] }
 0x809   :  { %v1962_v63 = vpop.f32.mrf.mxu0  ;;  %v4181_v55 = vpop.eup %4180  ;;  %v1906_v32 = vmul.f32 %v4179_v39, %v5765_v25  ;;  %4184 = vrcp.f32 %v1874_v28 }
 0x80a   :  { %3841 = vrot.lane.b32.xlu1 %v3840_v59, %s4315_s17  ;;  %v1521_v34 = vmul.f32 %v4181_v55, %v5768_v50  ;;  %4186 = vrcp.f32 %v1872_v26  ;;  %v3783_v50 = vld [vmem:[%s6895_s4 + $0x30] sm:$0xff] }
 0x80b   :  { %v1916_v14 = vpack.c.bf16 %v1906_v32, %v1905_v31  ;;  %2290 = vmatpush.bf16.msrb.mxu3 %v3783_v50 }
 0x80e   :  { %v4183_v38 = vpop.eup %4182 }
 0x80f   :  { %v1522_v60 = vmul.f32 %v4183_v38, %v5791_v21  ;;  %v4185_v6 = vpop.eup %4184 }
 0x810   :  { %v4187_v11 = vpop.eup %4186  ;;  %v1908_v15 = vmul.f32 %v4185_v6, %v5793_v49 }
 0x811   :  { %v1576_v16 = vpop.f32.mrf.mxu2  ;;  %v1964_v18 = vpop.f32.mrf.mxu0  ;;  %v1531_v35 = vpack.c.bf16 %v1522_v60, %v1521_v34  ;;  %v1907_v56 = vmul.f32 %v4187_v11, %v5770_v52 }
 0x812   :  { %v3860_v41 = vpack.i.bf16 %v1964_v18, %v1962_v63 }
 0x813   :  { %1976 = vmatmul.bf16.gmra.mxu0 %v1916_v14  ;;  %1595 = vmatmul.bf16.gmra.mxu2 %v1531_v35  ;;  %v1917_v37 = vpack.c.bf16 %v1908_v15, %v1907_v56 }
 0x814   :  { %3861 = vrot.lane.b32.xlu2 %v3860_v41, %s4314_s16  ;;  %v7023_v41 = vld [vmem:[#allocation33_spill] sm:$0xff] }
 0x817   :  { %v1490_v25 = vpop.xlane.xlu0 %1489 }
 0x818   :  { %4188 = vrcp.f32 %v1490_v25 }
 0x819   :  { %v1578_v13 = vpop.f32.mrf.mxu2  ;;  %v1967_v21 = vpop.f32.mrf.mxu0 }
 0x81a   :  { %v3855_v58 = vpack.i.bf16 %v1578_v13, %v1576_v16  ;;  %v1492_v57 = vpop.xlane.xlu1 %1491 }
 0x81b   :  { %4190 = vrcp.f32 %v1492_v57 }
 0x81c   :  { %3856 = vrot.lane.b32.xlu1 %v3855_v58, %s4315_s17 }
 0x81e   :  { %v4189_v17 = vpop.eup %4188 }
 0x81f   :  { %v1523_v19 = vmul.f32 %v4189_v17, %v5804_v42  ;;  %v1878_v30 = vpop.xlane.xlu0 %1877 }
 0x821   :  { %v4191_v2 = vpop.eup %4190  ;;  %v1969_v53 = vpop.f32.mrf.mxu0 }
 0x822   :  { %v1876_v62 = vpop.xlane.xlu2 %1875  ;;  %v1581_v54 = vpop.f32.mrf.mxu2  ;;  %v3875_v29 = vpack.i.bf16 %v1969_v53, %v1967_v21  ;;  %v1524_v24 = vmul.f32 %v4191_v2, %v5808_v40 }
 0x823   :  { %1981 = vmatmul.bf16.gmra.mxu0 %v1917_v37  ;;  %4192 = vrcp.f32 %v1876_v62 }
 0x824   :  { %3876 = vrot.lane.b32.xlu2 %v3875_v29, %s4314_s16  ;;  %v1532_v10 = vpack.c.bf16 %v1524_v24, %v1523_v19  ;;  %4194 = vrcp.f32 %v1878_v30  ;;  %v7025_v29 = vld [vmem:[#allocation24_spill] sm:$0xff]  ;;  %v7026_v24 = vld [vmem:[#allocation21_spill] sm:$0xff] }
 0x826   :  { %1600 = vmatmul.bf16.gmra.mxu2 %v1532_v10 }
 0x829   :  { %v4193_v49 = vpop.eup %4192 }
 0x82a   :  { %v1583_v52 = vpop.f32.mrf.mxu2  ;;  %v4195_v1 = vpop.eup %4194  ;;  %v1909_v23 = vmul.f32 %v4193_v49, %v5816_v0 }
 0x82b   :  { %v3870_v61 = vpack.i.bf16 %v1583_v52, %v1581_v54  ;;  %v1910_v42 = vmul.f32 %v4195_v1, %v5812_v27  ;;  %v3827_v48 = vpop.permute.xlu2 %3826 }
 0x82c   :  { %v3829_v3 = vunpack.i.h.bf16 %v3827_v48  ;;  %v3828_v5 = vunpack.i.l.bf16 %v3827_v48 }
 0x82d   :  { %3871 = vrot.lane.b32.xlu1 %v3870_v61, %s4315_s17  ;;  %v1918_v40 = vpack.c.bf16 %v1910_v42, %v1909_v23 }
 0x831   :  { %v3822_v33 = vpop.permute.xlu1 %3821 }
 0x832   :  { %v1586_v7 = vpop.f32.mrf.mxu2  ;;  %v3824_v45 = vunpack.i.h.bf16 %v3822_v33  ;;  %v3823_v4 = vunpack.i.l.bf16 %v3822_v33 }
 0x833   :  { %1986 = vmatmul.bf16.gmra.mxu0 %v1918_v40  ;;  %v3847_v34 = vpop.permute.xlu2 %3846 }
 0x834   :  { %v2185_v46 = vsel %vm479_vm3, %v7021_v20, %v3824_v45  ;;  %v2184_v36 = vsel %vm479_vm3, %v7022_v47, %v3823_v4  ;;  %v3849_v14 = vunpack.i.h.bf16 %v3847_v34  ;;  %v3848_v26 = vunpack.i.l.bf16 %v3847_v34 }
 0x835   :  { %v3832_v0 = vpop.permute.xlu0 %3831  ;;  %v2201_v51 = vsel %vm2200_vm4, %v2184_v36, %v3828_v5  ;;  %v2202_v9 = vsel %vm2200_vm4, %v2185_v46, %v3829_v3 }
 0x836   :  { %v3834_v12 = vunpack.i.h.bf16 %v3832_v0  ;;  %v3833_v27 = vunpack.i.l.bf16 %v3832_v0 }
 0x838   :  { %v2219_v44 = vsel %vm2217_vm5, %v2202_v9, %v3834_v12  ;;  %v2218_v59 = vsel %vm2217_vm5, %v2201_v51, %v3833_v27  ;;  %v7027_v27 = vld [vmem:[#allocation25_spill] sm:$0xff]  ;;  %v7028_v9 = vld [vmem:[#allocation34_spill] sm:$0xff] }
 0x839   :  { %v2234_v8 = vpack.c.bf16 %v2219_v44, %v2218_v59 }
 0x83a   :  { %v1588_v63 = vpop.f32.mrf.mxu2 }
 0x83b   :  { %v3885_v22 = vpack.i.bf16 %v1588_v63, %v1586_v7  ;;  %3707 = vmatmul.msk.bf16.vlgmr.msrb.gmra.mxu3 %vm333_vm1, %v2234_v8 }
 0x83d   :  { %3886 = vrot.lane.b32.xlu1 %v3885_v22, %s4315_s17  ;;  %v3837_v38 = vpop.permute.xlu0 %3836 }
 0x83e   :  { %v3839_v32 = vunpack.i.h.bf16 %v3837_v38  ;;  %v3838_v28 = vunpack.i.l.bf16 %v3837_v38 }
 0x840   :  { %v2187_v35 = vsel %vm479_vm3, %v7023_v41, %v3839_v32  ;;  %v2186_v25 = vsel %vm479_vm3, %v7024_v43, %v3838_v28 }
 0x845   :  { %v3852_v15 = vpop.permute.xlu0 %3851 }
 0x846   :  { %v3854_v56 = vunpack.i.h.bf16 %v3852_v15  ;;  %v3853_v2 = vunpack.i.l.bf16 %v3852_v15 }
 0x848   :  { %v2189_v19 = vsel %vm479_vm3, %v7025_v29, %v3854_v56  ;;  %v2188_v30 = vsel %vm479_vm3, %v7026_v24, %v3853_v2 }
 0x84d   :  { %v3867_v45 = vpop.permute.xlu0 %3866 }
 0x84e   :  { %v3869_v4 = vunpack.i.h.bf16 %v3867_v45  ;;  %v3868_v3 = vunpack.i.l.bf16 %v3867_v45 }
 0x850   :  { %v2191_v51 = vsel %vm479_vm3, %v7027_v27, %v3869_v4  ;;  %v2190_v44 = vsel %vm479_vm3, %v7028_v9, %v3868_v3  ;;  %v7033_v3 = vld [vmem:[#allocation30_spill] sm:$0xff] }
 0x855   :  { %v3882_v15 = vpop.permute.xlu0 %3881 }
 0x856   :  { %v1591_v39 = vpop.f32.mrf.mxu2  ;;  %v3884_v56 = vunpack.i.h.bf16 %v3882_v15  ;;  %v3883_v2 = vunpack.i.l.bf16 %v3882_v15 }
 0x85e   :  { %v1593_v55 = vpop.f32.mrf.mxu2 }
 0x85f   :  { %v3900_v31 = vpack.i.bf16 %v1593_v55, %v1591_v39 }
 0x861   :  { %3901 = vrot.lane.b32.xlu1 %v3900_v31, %s4315_s17 }
 0x86e   :  { %v3862_v53 = vpop.permute.xlu2 %3861 }
 0x86f   :  { %v3864_v10 = vunpack.i.h.bf16 %v3862_v53  ;;  %v3863_v49 = vunpack.i.l.bf16 %v3862_v53 }
 0x87c   :  { %v3842_v60 = vpop.permute.xlu1 %3841 }
 0x87d   :  { %v3844_v16 = vunpack.i.h.bf16 %v3842_v60  ;;  %v3843_v18 = vunpack.i.l.bf16 %v3842_v60 }
 0x87e   :  { %v3877_v5 = vpop.permute.xlu2 %3876 }
 0x87f   :  { %v2203_v50 = vsel %vm2200_vm4, %v2186_v25, %v3843_v18  ;;  %v2204_v13 = vsel %vm2200_vm4, %v2187_v35, %v3844_v16  ;;  %v3879_v59 = vunpack.i.h.bf16 %v3877_v5  ;;  %v3878_v8 = vunpack.i.l.bf16 %v3877_v5  ;;  %v7029_v25 = vld [vmem:[#allocation3_spill] sm:$0xff] }
 0x880   :  { %v1972_v21 = vpop.f32.mrf.mxu0  ;;  %v2220_v6 = vsel %vm2217_vm5, %v2203_v50, %v3848_v26  ;;  %v2221_v58 = vsel %vm2217_vm5, %v2204_v13, %v3849_v14  ;;  %v5917_v26 = vld [vmem:[%s6897_s5] sm:$0xff] }
 0x881   :  { %v2235_v57 = vpack.c.bf16 %v2221_v58, %v2220_v6  ;;  %v5920_v41 = vperm.slane %v5917_v26, 1  ;;  %v7030_v58 = vld [vmem:[#allocation4_spill] sm:$0xff] }
 0x883   :  { %3708 = vmatmul.msk.bf16.gmra.mxu3 %vm333_vm1, %v2235_v57 }
 0x888   :  { %v1974_v11 = vpop.f32.mrf.mxu0 }
 0x889   :  { %v3890_v17 = vpack.i.bf16 %v1974_v11, %v1972_v21 }
 0x88b   :  { %3891 = vrot.lane.b32.xlu2 %v3890_v17, %s4314_s16 }
 0x88e   :  { %v3857_v62 = vpop.permute.xlu1 %3856 }
 0x88f   :  { %v3859_v37 = vunpack.i.h.bf16 %v3857_v62  ;;  %v3858_v54 = vunpack.i.l.bf16 %v3857_v62 }
 0x890   :  { %v1977_v52 = vpop.f32.mrf.mxu0 }
 0x891   :  { %v2205_v61 = vsel %vm2200_vm4, %v2188_v30, %v3858_v54  ;;  %v2206_v1 = vsel %vm2200_vm4, %v2189_v19, %v3859_v37  ;;  %v7031_v54 = vld [vmem:[#allocation27_spill] sm:$0xff]  ;;  %v7032_v19 = vld [vmem:[#allocation20_spill] sm:$0xff] }
 0x892   :  { %v2222_v23 = vsel %vm2217_vm5, %v2205_v61, %v3863_v49  ;;  %v2223_v42 = vsel %vm2217_vm5, %v2206_v1, %v3864_v10  ;;  %v2193_v29 = vsel %vm479_vm3, %v7031_v54, %v3884_v56  ;;  %v2192_v24 = vsel %vm479_vm3, %v7032_v19, %v3883_v2 }
 0x893   :  { %v2236_v48 = vpack.c.bf16 %v2223_v42, %v2222_v23  ;;  %v3897_v42 = vpop.permute.xlu0 %3896 }
 0x895   :  { %3709 = vmatmul.msk.bf16.gmra.mxu3 %vm333_vm1, %v2236_v48 }
 0x896   :  { %v1596_v40 = vpop.f32.mrf.mxu2 }
 0x898   :  { %v1979_v7 = vpop.f32.mrf.mxu0 }
 0x899   :  { %v3905_v33 = vpack.i.bf16 %v1979_v7, %v1977_v52  ;;  %v3898_v7 = vunpack.i.l.bf16 %v3897_v42 }
 0x89b   :  { %3906 = vrot.lane.b32.xlu2 %v3905_v33, %s4314_s16 }
 0x89e   :  { %v1598_v46 = vpop.f32.mrf.mxu2 }
 0x89f   :  { %v3872_v20 = vpop.permute.xlu1 %3871  ;;  %v3915_v0 = vpack.i.bf16 %v1598_v46, %v1596_v40  ;;  %v3899_v40 = vunpack.i.h.bf16 %v3897_v42 }
 0x8a0   :  { %v3874_v47 = vunpack.i.h.bf16 %v3872_v20  ;;  %v3873_v36 = vunpack.i.l.bf16 %v3872_v20  ;;  %v1982_v12 = vpop.f32.mrf.mxu0  ;;  %v7034_v20 = vld [vmem:[#allocation26_spill] sm:$0xff] }
 0x8a1   :  { %3916 = vrot.lane.b32.xlu1 %v3915_v0, %s4315_s17  ;;  %v2195_v5 = vsel %vm479_vm3, %v7033_v3, %v3899_v40  ;;  %v2194_v46 = vsel %vm479_vm3, %v7034_v20, %v3898_v7 }
 0x8a2   :  { %v2207_v63 = vsel %vm2200_vm4, %v2190_v44, %v3873_v36  ;;  %v2208_v22 = vsel %vm2200_vm4, %v2191_v51, %v3874_v47 }
 0x8a3   :  { %v2224_v39 = vsel %vm2217_vm5, %v2207_v63, %v3878_v8  ;;  %v2225_v55 = vsel %vm2217_vm5, %v2208_v22, %v3879_v59  ;;  %v7035_v8 = vld [vmem:[#allocation5_spill] sm:$0xff] }
 0x8a4   :  { %v2237_v31 = vpack.c.bf16 %v2225_v55, %v2224_v39  ;;  %v3912_v55 = vpop.permute.xlu0 %3911 }
 0x8a6   :  { %3710 = vmatmul.msk.bf16.gmra.mxu3 %vm333_vm1, %v2237_v31 }
 0x8a8   :  { %v1984_v38 = vpop.f32.mrf.mxu0 }
 0x8a9   :  { %v1601_v32 = vpop.f32.mrf.mxu2  ;;  %v3920_v28 = vpack.i.bf16 %v1984_v38, %v1982_v12  ;;  %v7036_v38 = vld [vmem:[#allocation6_spill] sm:$0xff] }
 0x8ab   :  { %3921 = vrot.lane.b32.xlu2 %v3920_v28, %s4314_s16  ;;  %v3914_v28 = vunpack.i.h.bf16 %v3912_v55 }
 0x8af   :  { %v3887_v17 = vpop.permute.xlu1 %3886 }
 0x8b0   :  { %v1987_v34 = vpop.f32.mrf.mxu0  ;;  %v3889_v53 = vunpack.i.h.bf16 %v3887_v17  ;;  %v3888_v62 = vunpack.i.l.bf16 %v3887_v17 }
 0x8b1   :  { %v1603_v60 = vpop.f32.mrf.mxu2 }
 0x8b2   :  { %v3930_v16 = vpack.i.bf16 %v1603_v60, %v1601_v32  ;;  %v2209_v49 = vsel %vm2200_vm4, %v2192_v24, %v3888_v62  ;;  %v2210_v52 = vsel %vm2200_vm4, %v2193_v29, %v3889_v53  ;;  %v4316_v29 = vmov 32.0  }
 0x8b3   :  { %4196 = vrcp.f32 %v4316_v29 }
 0x8b4   :  { %3931 = vrot.lane.b32.xlu1 %v3930_v16, %s4315_s17 }
 0x8b8   :  { %v1989_v18 = vpop.f32.mrf.mxu0 }
 0x8b9   :  { %v3935_v14 = vpack.i.bf16 %v1989_v18, %v1987_v34  ;;  %v3913_v34 = vunpack.i.l.bf16 %v3912_v55 }
 0x8bb   :  { %3936 = vrot.lane.b32.xlu2 %v3935_v14, %s4314_s16 }
 0x8be   :  { %v2292_v35 = vpop.f32.mrf.mxu3 }
 0x8bf   :  { %v2293_v43 = vadd.f32 %v2292_v35, %v5920_v41 }
 0x8c1   :  { %v5924_v50 = vadd.f32 %v2293_v43, %v7029_v25  ;;  %v7037_v43 = vld [vmem:[#allocation28_spill] sm:$0xff] }
 0x8c2   :  { %v2197_v25 = vsel %vm479_vm3, %v7037_v43, %v3914_v28  ;;  %v7044_v43 = vld [vmem:[#allocation10_spill] sm:$0xff] }
 0x8c3   :  { %v2348_v13 = vsel %vm333_vm1, %v5924_v50, 0.0 }
 0x8c4   :  { %2349 = vadd.xlane.f32.xlu0 %v2348_v13  ;;  %v7038_v13 = vld [vmem:[#allocation35_spill] sm:$0xff] }
 0x8c6   :  { %v2294_v21 = vpop.f32.mrf.mxu3 }
 0x8c7   :  { %v2295_v6 = vadd.f32 %v2294_v21, %v5920_v41  ;;  %v2196_v21 = vsel %vm479_vm3, %v7038_v13, %v3913_v34 }
 0x8c9   :  { %v5930_v57 = vadd.f32 %v2295_v6, %v7030_v58 }
 0x8cb   :  { %v2351_v11 = vsel %vm333_vm1, %v5930_v57, 0.0 }
 0x8d3   :  { %v3902_v48 = vpop.permute.xlu1 %3901 }
 0x8d4   :  { %v3904_v33 = vunpack.i.h.bf16 %v3902_v48  ;;  %v3903_v45 = vunpack.i.l.bf16 %v3902_v48 }
 0x8d6   :  { %v2211_v0 = vsel %vm2200_vm4, %v2194_v46, %v3903_v45  ;;  %v2212_v12 = vsel %vm2200_vm4, %v2195_v5, %v3904_v33  ;;  %v7042_v5 = vld [vmem:[#allocation23_spill] sm:$0xff] }
 0x8de   :  { %2352 = vadd.xlane.f32.xlu1 %v2351_v11 }
 0x8e5   :  { %v3892_v37 = vpop.permute.xlu2 %3891 }
 0x8e6   :  { %v3894_v30 = vunpack.i.h.bf16 %v3892_v37  ;;  %v3893_v10 = vunpack.i.l.bf16 %v3892_v37  ;;  %v7039_v37 = vld [vmem:[#allocation7_spill] sm:$0xff] }
 0x8e8   :  { %v2226_v61 = vsel %vm2217_vm5, %v2209_v49, %v3893_v10  ;;  %v2227_v1 = vsel %vm2217_vm5, %v2210_v52, %v3894_v30  ;;  %v3927_v30 = vpop.permute.xlu0 %3926  ;;  %v4197_v49 = vpop.eup %4196  ;;  %v7040_v52 = vld [vmem:[#allocation8_spill] sm:$0xff] }
 0x8e9   :  { %v2238_v23 = vpack.c.bf16 %v2227_v1, %v2226_v61  ;;  %v3929_v1 = vunpack.i.h.bf16 %v3927_v30  ;;  %v2397_v40 = vmul.f32 32.0, %v4197_v49  ;;  %vm2401_vm6 = vweird.f32 %v4197_v49 }
 0x8eb   :  { %3711 = vmatmul.msk.bf16.gmra.mxu3 %vm333_vm1, %v2238_v23  ;;  %v3928_v23 = vunpack.i.l.bf16 %v3927_v30 }
 0x8ed   :  { %v2198_v20 = vsel %vm479_vm3, %v7042_v5, %v3928_v23 }
 0x8f5   :  { %v3907_v4 = vpop.permute.xlu2 %3906 }
 0x8f6   :  { %v3909_v47 = vunpack.i.h.bf16 %v3907_v4  ;;  %v3908_v36 = vunpack.i.l.bf16 %v3907_v4  ;;  %v7041_v4 = vld [vmem:[#allocation31_spill] sm:$0xff] }
 0x8f7   :  { %v2199_v3 = vsel %vm479_vm3, %v7041_v4, %v3929_v1 }
 0x8f8   :  { %v2228_v27 = vsel %vm2217_vm5, %v2211_v0, %v3908_v36  ;;  %v2229_v51 = vsel %vm2217_vm5, %v2212_v12, %v3909_v47 }
 0x8f9   :  { %v2239_v9 = vpack.c.bf16 %v2229_v51, %v2228_v27  ;;  %v2398_v27 = vsub.f32 1.0, %v2397_v40 }
 0x8fb   :  { %3712 = vmatmul.msk.bf16.gmra.mxu3 %vm333_vm1, %v2239_v9 }
 0x905   :  { %v3922_v60 = vpop.permute.xlu2 %3921 }
 0x906   :  { %v2297_v44 = vpop.f32.mrf.mxu3  ;;  %v3924_v6 = vunpack.i.h.bf16 %v3922_v60  ;;  %v3923_v58 = vunpack.i.l.bf16 %v3922_v60 }
 0x907   :  { %v2298_v59 = vadd.f32 %v2297_v44, %v5920_v41 }
 0x909   :  { %v5954_v63 = vadd.f32 %v2298_v59, %v7035_v8  ;;  %v7043_v8 = vld [vmem:[#allocation9_spill] sm:$0xff] }
 0x90b   :  { %v2354_v22 = vsel %vm333_vm1, %v5954_v63, 0.0 }
 0x90c   :  { %2355 = vadd.xlane.f32.xlu2 %v2354_v22 }
 0x90e   :  { %v2299_v39 = vpop.f32.mrf.mxu3 }
 0x90f   :  { %v2300_v31 = vadd.f32 %v2299_v39, %v5920_v41  ;;  %v2399_v39 = vmul.f32 %v4197_v49, %v2398_v27  ;;  %v7048_v27 = vld [vmem:[#allocation14_spill] sm:$0xff] }
 0x911   :  { %v5960_v32 = vadd.f32 %v2300_v31, %v7036_v38  ;;  %v2400_v31 = vadd.f32 %v4197_v49, %v2399_v39 }
 0x913   :  { %v2357_v16 = vsel %vm333_vm1, %v5960_v32, 0.0  ;;  %v3917_v18 = vpop.permute.xlu1 %3916  ;;  %v6000_v38 = vsel %vm2401_vm6, %v4197_v49, %v2400_v31 }
 0x914   :  { %2358 = vadd.xlane.f32.xlu0 %v2357_v16  ;;  %v3919_v14 = vunpack.i.h.bf16 %v3917_v18  ;;  %v3918_v35 = vunpack.i.l.bf16 %v3917_v18 }
 0x915   :  { %v3937_v42 = vpop.permute.xlu2 %3936 }
 0x916   :  { %v2213_v11 = vsel %vm2200_vm4, %v2196_v21, %v3918_v35  ;;  %v2214_v15 = vsel %vm2200_vm4, %v2197_v25, %v3919_v14  ;;  %v3939_v46 = vunpack.i.h.bf16 %v3937_v42  ;;  %v3938_v47 = vunpack.i.l.bf16 %v3937_v42 }
 0x917   :  { %v2230_v56 = vsel %vm2217_vm5, %v2213_v11, %v3923_v58  ;;  %v2231_v2 = vsel %vm2217_vm5, %v2214_v15, %v3924_v6 }
 0x918   :  { %v2302_v17 = vpop.f32.mrf.mxu3  ;;  %v2240_v62 = vpack.c.bf16 %v2231_v2, %v2230_v56  ;;  %v7045_v56 = vld [vmem:[#allocation11_spill] sm:$0xff] }
 0x919   :  { %v2303_v53 = vadd.f32 %v2302_v17, %v5920_v41 }
 0x91a   :  { %3713 = vmatmul.msk.bf16.gmra.mxu3 %vm333_vm1, %v2240_v62 }
 0x91b   :  { %v5974_v54 = vadd.f32 %v2303_v53, %v7039_v37 }
 0x91d   :  { %v2360_v19 = vsel %vm333_vm1, %v5974_v54, 0.0 }
 0x91e   :  { %2361 = vadd.xlane.f32.xlu1 %v2360_v19 }
 0x920   :  { %v2304_v24 = vpop.f32.mrf.mxu3 }
 0x921   :  { %v2305_v10 = vadd.f32 %v2304_v24, %v5920_v41 }
 0x923   :  { %v5981_v61 = vadd.f32 %v2305_v10, %v7040_v52  ;;  %v7046_v52 = vld [vmem:[#allocation12_spill] sm:$0xff] }
 0x925   :  { %v2363_v48 = vsel %vm333_vm1, %v5981_v61, 0.0 }
 0x926   :  { %v3932_v7 = vpop.permute.xlu1 %3931  ;;  %2364 = vadd.xlane.f32.xlu2 %v2363_v48 }
 0x927   :  { %v3934_v33 = vunpack.i.h.bf16 %v3932_v7  ;;  %v3933_v45 = vunpack.i.l.bf16 %v3932_v7 }
 0x929   :  { %v2215_v36 = vsel %vm2200_vm4, %v2198_v20, %v3933_v45  ;;  %v2216_v0 = vsel %vm2200_vm4, %v2199_v3, %v3934_v33  ;;  %v2307_v12 = vpop.f32.mrf.mxu3  ;;  %v7047_v45 = vld [vmem:[#allocation13_spill] sm:$0xff] }
 0x92a   :  { %v2308_v51 = vadd.f32 %v2307_v12, %v5920_v41  ;;  %v2232_v9 = vsel %vm2217_vm5, %v2215_v36, %v3938_v47  ;;  %v2233_v44 = vsel %vm2217_vm5, %v2216_v0, %v3939_v46 }
 0x92b   :  { %v2241_v59 = vpack.c.bf16 %v2233_v44, %v2232_v9 }
 0x92c   :  { %v5995_v22 = vadd.f32 %v2308_v51, %v7043_v8 }
 0x92d   :  { %3714 = vmatmul.msk.bf16.gmra.mxu3 %vm333_vm1, %v2241_v59 }
 0x92e   :  { %v2366_v55 = vsel %vm333_vm1, %v5995_v22, 0.0 }
 0x92f   :  { %2367 = vadd.xlane.f32.xlu2 %v2366_v55 }
 0x931   :  { %v2309_v16 = vpop.f32.mrf.mxu3 }
 0x932   :  { %v2310_v14 = vadd.f32 %v2309_v16, %v5920_v41 }
 0x934   :  { %v6011_v25 = vadd.f32 %v2310_v14, %v7044_v43 }
 0x936   :  { %v2369_v13 = vsel %vm333_vm1, %v6011_v25, 0.0 }
 0x937   :  { %v2350_v28 = vpop.xlane.xlu0 %2349 }
 0x938   :  { %v2403_v34 = vmul.f32 %v6000_v38, %v2350_v28  ;;  %v7049_v28 = vld [vmem:[#allocation15_spill] sm:$0xff] }
 0x93a   :  { %v6004_v60 = vsub.f32 %v5924_v50, %v2403_v34 }
 0x93c   :  { %v2435_v18 = vmul.f32 %v6004_v60, %v6004_v60 }
 0x93e   :  { %v2451_v35 = vsel %vm333_vm1, %v2435_v18, 0.0 }
 0x93f   :  { %2452 = vadd.xlane.f32.xlu0 %v2451_v35 }
 0x947   :  { %2370 = vadd.xlane.f32.xlu0 %v2369_v13  ;;  %v7050_v13 = vld [vmem:[#allocation16_spill] sm:$0xff] }
 0x951   :  { %v2353_v21 = vpop.xlane.xlu1 %2352 }
 0x952   :  { %v2404_v50 = vmul.f32 %v6000_v38, %v2353_v21 }
 0x954   :  { %v6017_v6 = vsub.f32 %v5930_v57, %v2404_v50 }
 0x956   :  { %v2436_v58 = vmul.f32 %v6017_v6, %v6017_v6 }
 0x958   :  { %v2454_v11 = vsel %vm333_vm1, %v2436_v58, 0.0 }
 0x959   :  { %2455 = vadd.xlane.f32.xlu1 %v2454_v11 }
 0x96e   :  { %v2312_v15 = vpop.f32.mrf.mxu3 }
 0x96f   :  { %v2313_v17 = vadd.f32 %v2312_v15, %v5920_v41  ;;  %v7051_v15 = vld [vmem:[#allocation17_spill] sm:$0xff] }
 0x971   :  { %v6024_v2 = vadd.f32 %v2313_v17, %v7045_v56 }
 0x973   :  { %v2372_v53 = vsel %vm333_vm1, %v6024_v2, 0.0 }
 0x974   :  { %2373 = vadd.xlane.f32.xlu0 %v2372_v53 }
 0x976   :  { %v2314_v37 = vpop.f32.mrf.mxu3 }
 0x977   :  { %v2315_v24 = vadd.f32 %v2314_v37, %v5920_v41 }
 0x979   :  { %v6038_v1 = vadd.f32 %v2315_v24, %v7046_v52  ;;  %v3785_v52 = vld [vmem:[%s6895_s4 + $0x40] sm:$0xff] }
 0x97b   :  { %v2375_v40 = vsel %vm333_vm1, %v6038_v1, 0.0 }
 0x97e   :  { %v2317_v42 = vpop.f32.mrf.mxu3 }
 0x97f   :  { %v2356_v62 = vpop.xlane.xlu2 %2355  ;;  %v2318_v48 = vadd.f32 %v2317_v42, %v5920_v41 }
 0x980   :  { %v2405_v57 = vmul.f32 %v6000_v38, %v2356_v62 }
 0x981   :  { %v6050_v4 = vadd.f32 %v2318_v48, %v7047_v45 }
 0x982   :  { %v6030_v29 = vsub.f32 %v5954_v63, %v2405_v57 }
 0x983   :  { %v2378_v20 = vsel %vm333_vm1, %v6050_v4, 0.0 }
 0x984   :  { %v2437_v19 = vmul.f32 %v6030_v29, %v6030_v29 }
 0x986   :  { %v2457_v30 = vsel %vm333_vm1, %v2437_v19, 0.0  ;;  %v2319_v5 = vpop.f32.mrf.mxu3 }
 0x987   :  { %2458 = vadd.xlane.f32.xlu1 %v2457_v30  ;;  %v2359_v10 = vpop.xlane.xlu0 %2358  ;;  %v2320_v47 = vadd.f32 %v2319_v5, %v5920_v41 }
 0x988   :  { %v2406_v49 = vmul.f32 %v6000_v38, %v2359_v10  ;;  %v3786_v10 = vld [vmem:[%s6895_s4 + $0x48] sm:$0xff] }
 0x989   :  { %v6064_v51 = vadd.f32 %v2320_v47, %v7048_v27  ;;  %2796 = vmatpush.bf16.msrb.mxu2 %v3786_v10 }
 0x98a   :  { %v6041_v23 = vsub.f32 %v5960_v32, %v2406_v49 }
 0x98b   :  { %v2381_v39 = vsel %vm333_vm1, %v6064_v51, 0.0 }
 0x98c   :  { %v2438_v63 = vmul.f32 %v6041_v23, %v6041_v23 }
 0x98d   :  { %2797 = vmatpush.bf16.msrb.mxu2 %v3785_v52 }
 0x98e   :  { %v2460_v7 = vsel %vm333_vm1, %v2438_v63, 0.0 }
 0x98f   :  { %2376 = vadd.xlane.f32.xlu1 %v2375_v40  ;;  %2461 = vadd.xlane.f32.xlu2 %v2460_v7 }
 0x991   :  { %v2362_v33 = vpop.xlane.xlu1 %2361 }
 0x992   :  { %v2407_v32 = vmul.f32 %v6000_v38, %v2362_v33 }
 0x994   :  { %v6054_v3 = vsub.f32 %v5974_v54, %v2407_v32 }
 0x996   :  { %v2439_v46 = vmul.f32 %v6054_v3, %v6054_v3 }
 0x997   :  { %2379 = vadd.xlane.f32.xlu1 %v2378_v20 }
 0x998   :  { %v2463_v36 = vsel %vm333_vm1, %v2439_v46, 0.0 }
 0x999   :  { %v2365_v0 = vpop.xlane.xlu2 %2364  ;;  %2464 = vadd.xlane.f32.xlu2 %v2463_v36 }
 0x99a   :  { %v2408_v12 = vmul.f32 %v6000_v38, %v2365_v0  ;;  %v6115_v0 = vperm.slane %v5917_v26, 2 }
 0x99c   :  { %v6067_v54 = vsub.f32 %v5981_v61, %v2408_v12 }
 0x99d   :  { %v2322_v9 = vpop.f32.mrf.mxu3 }
 0x99e   :  { %v2440_v44 = vmul.f32 %v6067_v54, %v6067_v54  ;;  %v2323_v59 = vadd.f32 %v2322_v9, %v5920_v41 }
 0x9a0   :  { %v2466_v8 = vsel %vm333_vm1, %v2440_v44, 0.0  ;;  %v6077_v34 = vadd.f32 %v2323_v59, %v7049_v28  ;;  %v6119_v44 = vperm.slane %v5917_v26, 3 }
 0x9a1   :  { %2467 = vadd.xlane.f32.xlu0 %v2466_v8  ;;  %2382 = vadd.xlane.f32.xlu2 %v2381_v39 }
 0x9a2   :  { %v2368_v55 = vpop.xlane.xlu2 %2367  ;;  %v2384_v14 = vsel %vm333_vm1, %v6077_v34, 0.0 }
 0x9a3   :  { %v2409_v31 = vmul.f32 %v6000_v38, %v2368_v55 }
 0x9a5   :  { %v6080_v61 = vsub.f32 %v5995_v22, %v2409_v31  ;;  %v2324_v16 = vpop.f32.mrf.mxu3 }
 0x9a6   :  { %v2325_v35 = vadd.f32 %v2324_v16, %v5920_v41 }
 0x9a7   :  { %v2441_v18 = vmul.f32 %v6080_v61, %v6080_v61 }
 0x9a8   :  { %v6089_v21 = vadd.f32 %v2325_v35, %v7050_v13  ;;  %v7052_v13 = vld [vmem:[#allocation18_spill] sm:$0xff] }
 0x9a9   :  { %v2469_v43 = vsel %vm333_vm1, %v2441_v18, 0.0  ;;  %2385 = vadd.xlane.f32.xlu2 %v2384_v14 }
 0x9aa   :  { %2470 = vadd.xlane.f32.xlu0 %v2469_v43  ;;  %v2387_v58 = vsel %vm333_vm1, %v6089_v21, 0.0 }
 0x9b0   :  { %v2327_v50 = vpop.f32.mrf.mxu3 }
 0x9b1   :  { %v2328_v22 = vadd.f32 %v2327_v50, %v5920_v41 }
 0x9b2   :  { %2388 = vadd.xlane.f32.xlu0 %v2387_v58  ;;  %v2453_v11 = vpop.xlane.xlu0 %2452 }
 0x9b3   :  { %v6095_v17 = vadd.f32 %v2328_v22, %v7051_v15  ;;  %v2499_v56 = vmul.f32 %v2453_v11, %v6000_v38 }
 0x9b5   :  { %v2390_v53 = vsel %vm333_vm1, %v6095_v17, 0.0  ;;  %v2515_v57 = vadd.f32 1e-12, %v2499_v56 }
 0x9b7   :  { %4198 = vrsqrt.f32 %v2515_v57  ;;  %vm2537_vm8 = vweird.f32 %v2515_v57 }
 0x9b8   :  { %v2329_v14 = vpop.f32.mrf.mxu3 }
 0x9b9   :  { %v2330_v35 = vadd.f32 %v2329_v14, %v5920_v41 }
 0x9ba   :  { %2391 = vadd.xlane.f32.xlu0 %v2390_v53  ;;  %v2371_v62 = vpop.xlane.xlu0 %2370 }
 0x9bb   :  { %v2410_v37 = vmul.f32 %v6000_v38, %v2371_v62  ;;  %v6142_v50 = vadd.f32 %v2330_v35, %v7052_v13 }
 0x9bd   :  { %v6102_v19 = vsub.f32 %v6011_v25, %v2410_v37  ;;  %v4199_v49 = vpop.eup %4198  ;;  %v2393_v22 = vsel %vm333_vm1, %v6142_v50, 0.0 }
 0x9be   :  { %v2532_v42 = vmul.f32 %v4199_v49, %v2515_v57  ;;  %vm2538_vm7 = vweird.f32 %v4199_v49 }
 0x9bf   :  { %v2442_v24 = vmul.f32 %v6102_v19, %v6102_v19  ;;  %vm2539_vm9 = vmor %vm2537_vm8, %vm2538_vm7 }
 0x9c0   :  { %v2533_v25 = vmul.f32 %v4199_v49, %v2532_v42 }
 0x9c1   :  { %v2472_v30 = vsel %vm333_vm1, %v2442_v24, 0.0 }
 0x9c2   :  { %2473 = vadd.xlane.f32.xlu1 %v2472_v30  ;;  %v2534_v7 = vmul.f32 0.5, %v2533_v25 }
 0x9c4   :  { %v2535_v33 = vsub.f32 1.5, %v2534_v7 }
 0x9c6   :  { %v2536_v32 = vmul.f32 %v4199_v49, %v2535_v33 }
 0x9c8   :  { %v2540_v46 = vsel %vm2539_vm9, %v4199_v49, %v2536_v32 }
 0x9c9   :  { %v2691_v12 = vmul.f32 %v2540_v46, %v6004_v60 }
 0x9cb   :  { %v2708_v59 = vmul.f32 %v6115_v0, %v2691_v12 }
 0x9cc   :  { %v2456_v63 = vpop.xlane.xlu1 %2455 }
 0x9cd   :  { %v2500_v48 = vmul.f32 %v2456_v63, %v6000_v38  ;;  %v6125_v55 = vadd.f32 %v6119_v44, %v2708_v59 }
 0x9cf   :  { %v2516_v40 = vadd.f32 1e-12, %v2500_v48 }
 0x9d1   :  { %4200 = vrsqrt.f32 %v2516_v40  ;;  %vm2547_vm11 = vweird.f32 %v2516_v40 }
 0x9d7   :  { %v4201_v45 = vpop.eup %4200 }
 0x9d8   :  { %v2542_v5 = vmul.f32 %v4201_v45, %v2516_v40  ;;  %vm2548_vm10 = vweird.f32 %v4201_v45 }
 0x9d9   :  { %vm2549_vm12 = vmor %vm2547_vm11, %vm2548_vm10 }
 0x9da   :  { %v2543_v20 = vmul.f32 %v4201_v45, %v2542_v5 }
 0x9dc   :  { %v2544_v47 = vmul.f32 0.5, %v2543_v20 }
 0x9de   :  { %v2545_v36 = vsub.f32 1.5, %v2544_v47 }
 0x9e0   :  { %v2546_v27 = vmul.f32 %v4201_v45, %v2545_v36 }
 0x9e2   :  { %v2550_v9 = vsel %vm2549_vm12, %v4201_v45, %v2546_v27 }
 0x9e3   :  { %v2692_v8 = vmul.f32 %v2550_v9, %v6017_v6 }
 0x9e5   :  { %v2709_v39 = vmul.f32 %v6115_v0, %v2692_v8 }
 0x9e7   :  { %v6128_v31 = vadd.f32 %v6119_v44, %v2709_v39  ;;  %v2374_v60 = vpop.xlane.xlu0 %2373 }
 0x9e8   :  { %v2411_v28 = vmul.f32 %v6000_v38, %v2374_v60 }
 0x9e9   :  { %v2741_v16 = vpack.c.bf16 %v6128_v31, %v6125_v55 }
 0x9ea   :  { %v6134_v18 = vsub.f32 %v6024_v2, %v2411_v28 }
 0x9eb   :  { %3723 = vmatmul.msk.bf16.vlgmr.msrb.gmra.mxu2 %vm333_vm1, %v2741_v16 }
 0x9ec   :  { %v2443_v6 = vmul.f32 %v6134_v18, %v6134_v18 }
 0x9ee   :  { %v2475_v43 = vsel %vm333_vm1, %v2443_v6, 0.0 }
 0x9ef   :  { %2476 = vadd.xlane.f32.xlu1 %v2475_v43 }
 0x9f7   :  { %2394 = vadd.xlane.f32.xlu1 %v2393_v22 }
 0x9fa   :  { %v2459_v2 = vpop.xlane.xlu1 %2458 }
 0x9fb   :  { %v2501_v58 = vmul.f32 %v2459_v2, %v6000_v38 }
 0x9fd   :  { %v2517_v11 = vadd.f32 1e-12, %v2501_v58 }
 0x9ff   :  { %4202 = vrsqrt.f32 %v2517_v11  ;;  %vm2557_vm14 = vweird.f32 %v2517_v11 }
 0xa02   :  { %v2377_v15 = vpop.xlane.xlu1 %2376  ;;  %v2462_v56 = vpop.xlane.xlu2 %2461 }
 0xa03   :  { %v2412_v53 = vmul.f32 %v6000_v38, %v2377_v15  ;;  %v2502_v41 = vmul.f32 %v2462_v56, %v6000_v38 }
 0xa05   :  { %v4203_v62 = vpop.eup %4202  ;;  %v6150_v57 = vsub.f32 %v6038_v1, %v2412_v53  ;;  %v2518_v37 = vadd.f32 1e-12, %v2502_v41 }
 0xa06   :  { %v2552_v24 = vmul.f32 %v4203_v62, %v2517_v11  ;;  %vm2558_vm13 = vweird.f32 %v4203_v62 }
 0xa07   :  { %4204 = vrsqrt.f32 %v2518_v37  ;;  %v2444_v30 = vmul.f32 %v6150_v57, %v6150_v57  ;;  %vm2559_vm15 = vmor %vm2557_vm14, %vm2558_vm13  ;;  %vm2567_vm3 = vweird.f32 %v2518_v37 }
 0xa08   :  { %v2553_v10 = vmul.f32 %v4203_v62, %v2552_v24 }
 0xa09   :  { %v2478_v49 = vsel %vm333_vm1, %v2444_v30, 0.0 }
 0xa0a   :  { %v2554_v52 = vmul.f32 0.5, %v2553_v10  ;;  %v2380_v42 = vpop.xlane.xlu1 %2379  ;;  %2479 = vadd.xlane.f32.xlu2 %v2478_v49 }
 0xa0b   :  { %v2413_v25 = vmul.f32 %v6000_v38, %v2380_v42 }
 0xa0c   :  { %v2555_v63 = vsub.f32 1.5, %v2554_v52  ;;  %v2465_v48 = vpop.xlane.xlu2 %2464 }
 0xa0d   :  { %v4205_v40 = vpop.eup %4204  ;;  %v6157_v1 = vsub.f32 %v6050_v4, %v2413_v25  ;;  %v2503_v7 = vmul.f32 %v2465_v48, %v6000_v38 }
 0xa0e   :  { %v2556_v33 = vmul.f32 %v4203_v62, %v2555_v63  ;;  %v2562_v45 = vmul.f32 %v4205_v40, %v2518_v37  ;;  %vm2568_vm0 = vweird.f32 %v4205_v40 }
 0xa0f   :  { %v2519_v32 = vadd.f32 1e-12, %v2503_v7  ;;  %v2445_v5 = vmul.f32 %v6157_v1, %v6157_v1  ;;  %vm2569_vm4 = vmor %vm2567_vm3, %vm2568_vm0 }
 0xa10   :  { %v2563_v20 = vmul.f32 %v4205_v40, %v2562_v45  ;;  %v2560_v47 = vsel %vm2559_vm15, %v4203_v62, %v2556_v33 }
 0xa11   :  { %4206 = vrsqrt.f32 %v2519_v32  ;;  %v2481_v46 = vsel %vm333_vm1, %v2445_v5, 0.0  ;;  %v2693_v9 = vmul.f32 %v2560_v47, %v6030_v29  ;;  %vm2577_vm6 = vweird.f32 %v2519_v32 }
 0xa12   :  { %v2564_v36 = vmul.f32 0.5, %v2563_v20  ;;  %2482 = vadd.xlane.f32.xlu2 %v2481_v46 }
 0xa13   :  { %v2710_v43 = vmul.f32 %v6115_v0, %v2693_v9 }
 0xa14   :  { %v2565_v4 = vsub.f32 1.5, %v2564_v36  ;;  %v2383_v12 = vpop.xlane.xlu2 %2382  ;;  %v2468_v27 = vpop.xlane.xlu0 %2467 }
 0xa15   :  { %v2414_v59 = vmul.f32 %v6000_v38, %v2383_v12  ;;  %v2504_v8 = vmul.f32 %v2468_v27, %v6000_v38  ;;  %v6177_v56 = vadd.f32 %v6119_v44, %v2710_v43 }
 0xa16   :  { %v2566_v39 = vmul.f32 %v4205_v40, %v2565_v4 }
 0xa17   :  { %v4207_v60 = vpop.eup %4206  ;;  %v6167_v28 = vsub.f32 %v6064_v51, %v2414_v59  ;;  %v2520_v16 = vadd.f32 1e-12, %v2504_v8 }
 0xa18   :  { %v2570_v14 = vsel %vm2569_vm4, %v4205_v40, %v2566_v39  ;;  %v2572_v6 = vmul.f32 %v4207_v60, %v2519_v32  ;;  %vm2578_vm5 = vweird.f32 %v4207_v60 }
 0xa19   :  { %v2694_v35 = vmul.f32 %v2570_v14, %v6041_v23  ;;  %4208 = vrsqrt.f32 %v2520_v16  ;;  %v2446_v29 = vmul.f32 %v6167_v28, %v6167_v28  ;;  %vm2579_vm7 = vmor %vm2577_vm6, %vm2578_vm5  ;;  %vm2587_vm9 = vweird.f32 %v2520_v16 }
 0xa1a   :  { %v2573_v13 = vmul.f32 %v4207_v60, %v2572_v6 }
 0xa1b   :  { %v2484_v22 = vsel %vm333_vm1, %v2446_v29, 0.0  ;;  %v2711_v2 = vmul.f32 %v6115_v0, %v2694_v35 }
 0xa1c   :  { %v2574_v58 = vmul.f32 0.5, %v2573_v13  ;;  %2485 = vadd.xlane.f32.xlu0 %v2484_v22  ;;  %v2386_v51 = vpop.xlane.xlu2 %2385 }
 0xa1d   :  { %v2415_v11 = vmul.f32 %v6000_v38, %v2386_v51  ;;  %v2471_v15 = vpop.xlane.xlu0 %2470  ;;  %v6180_v23 = vadd.f32 %v6119_v44, %v2711_v2 }
 0xa1e   :  { %v2575_v53 = vsub.f32 1.5, %v2574_v58  ;;  %v2505_v10 = vmul.f32 %v2471_v15, %v6000_v38 }
 0xa1f   :  { %v4209_v41 = vpop.eup %4208  ;;  %v6183_v62 = vsub.f32 %v6077_v34, %v2415_v11  ;;  %v2742_v37 = vpack.c.bf16 %v6180_v23, %v6177_v56 }
 0xa20   :  { %v2576_v24 = vmul.f32 %v4207_v60, %v2575_v53  ;;  %v2582_v30 = vmul.f32 %v4209_v41, %v2520_v16  ;;  %v2521_v63 = vadd.f32 1e-12, %v2505_v10  ;;  %vm2588_vm8 = vweird.f32 %v4209_v41 }
 0xa21   :  { %3724 = vmatmul.msk.bf16.gmra.mxu2 %vm333_vm1, %v2742_v37  ;;  %v2447_v49 = vmul.f32 %v6183_v62, %v6183_v62  ;;  %vm2589_vm10 = vmor %vm2587_vm9, %vm2588_vm8 }
 0xa22   :  { %v2583_v52 = vmul.f32 %v4209_v41, %v2582_v30  ;;  %v2580_v34 = vsel %vm2579_vm7, %v4207_v60, %v2576_v24  ;;  %4210 = vrsqrt.f32 %v2521_v63  ;;  %vm2597_vm12 = vweird.f32 %v2521_v63 }
 0xa23   :  { %v2487_v42 = vsel %vm333_vm1, %v2447_v49, 0.0  ;;  %v2695_v33 = vmul.f32 %v2580_v34, %v6054_v3  ;;  %v3788_v34 = vld [vmem:[%s6895_s4 + $0x58] sm:$0xff] }
 0xa24   :  { %v2584_v25 = vmul.f32 0.5, %v2583_v52  ;;  %2488 = vadd.xlane.f32.xlu1 %v2487_v42  ;;  %v3789_v42 = vld [vmem:[%s6895_s4 + $0x60] sm:$0xff] }
 0xa25   :  { %v2389_v48 = vpop.xlane.xlu0 %2388  ;;  %v2712_v47 = vmul.f32 %v6115_v0, %v2695_v33 }
 0xa26   :  { %v2585_v40 = vsub.f32 1.5, %v2584_v25  ;;  %v2416_v7 = vmul.f32 %v6000_v38, %v2389_v48 }
 0xa28   :  { %v2586_v45 = vmul.f32 %v4209_v41, %v2585_v40  ;;  %v6195_v32 = vsub.f32 %v6089_v21, %v2416_v7  ;;  %v4211_v12 = vpop.eup %4210  ;;  %v6205_v21 = vadd.f32 %v6119_v44, %v2712_v47  ;;  %v6245_v40 = vperm.slane %v5917_v26, 4  ;;  %v3787_v7 = vld [vmem:[%s6895_s4 + $0x50] sm:$0xff] }
 0xa29   :  { %vm2598_vm11 = vweird.f32 %v4211_v12 }
 0xa2a   :  { %v2590_v5 = vsel %vm2589_vm10, %v4209_v41, %v2586_v45  ;;  %v2448_v20 = vmul.f32 %v6195_v32, %v6195_v32  ;;  %vm2599_vm13 = vmor %vm2597_vm12, %vm2598_vm11 }
 0xa2b   :  { %v2696_v46 = vmul.f32 %v2590_v5, %v6067_v54  ;;  %v2592_v54 = vmul.f32 %v4211_v12, %v2521_v63 }
 0xa2c   :  { %v2490_v36 = vsel %vm333_vm1, %v2448_v20, 0.0 }
 0xa2d   :  { %2491 = vadd.xlane.f32.xlu2 %v2490_v36  ;;  %v2392_v4 = vpop.xlane.xlu0 %2391  ;;  %v2713_v3 = vmul.f32 %v6115_v0, %v2696_v46  ;;  %v2593_v16 = vmul.f32 %v4211_v12, %v2592_v54 }
 0xa2e   :  { %v2417_v27 = vmul.f32 %v6000_v38, %v2392_v4 }
 0xa2f   :  { %v6208_v9 = vadd.f32 %v6119_v44, %v2713_v3  ;;  %v2594_v29 = vmul.f32 0.5, %v2593_v16 }
 0xa30   :  { %v6211_v59 = vsub.f32 %v6095_v17, %v2417_v27 }
 0xa31   :  { %v2743_v8 = vpack.c.bf16 %v6208_v9, %v6205_v21  ;;  %v2595_v17 = vsub.f32 1.5, %v2594_v29 }
 0xa32   :  { %v2449_v39 = vmul.f32 %v6211_v59, %v6211_v59 }
 0xa33   :  { %3725 = vmatmul.msk.bf16.gmra.mxu2 %vm333_vm1, %v2743_v8  ;;  %v2596_v13 = vmul.f32 %v4211_v12, %v2595_v17 }
 0xa34   :  { %v2493_v60 = vsel %vm333_vm1, %v2449_v39, 0.0 }
 0xa35   :  { %2494 = vadd.xlane.f32.xlu0 %v2493_v60  ;;  %v2474_v14 = vpop.xlane.xlu1 %2473  ;;  %v2600_v58 = vsel %vm2599_vm13, %v4211_v12, %v2596_v13 }
 0xa36   :  { %v2506_v6 = vmul.f32 %v2474_v14, %v6000_v38  ;;  %v2697_v15 = vmul.f32 %v2600_v58, %v6080_v61  ;;  %v3790_v61 = vld [vmem:[%s6895_s4 + $0x68] sm:$0xff] }
 0xa37   :  { %3052 = vmatpush.bf16.msrb.mxu1 %v3790_v61 }
 0xa38   :  { %v2522_v35 = vadd.f32 1e-12, %v2506_v6  ;;  %v2714_v24 = vmul.f32 %v6115_v0, %v2697_v15 }
 0xa3a   :  { %4212 = vrsqrt.f32 %v2522_v35  ;;  %vm2607_vm15 = vweird.f32 %v2522_v35  ;;  %v6225_v10 = vadd.f32 %v6119_v44, %v2714_v24 }
 0xa3b   :  { %3053 = vmatpush.bf16.msrb.mxu1 %v3789_v42 }
 0xa3f   :  { %3054 = vmatpush.bf16.msrb.mxu1 %v3788_v34 }
 0xa40   :  { %v4213_v43 = vpop.eup %4212 }
 0xa41   :  { %v2602_v22 = vmul.f32 %v4213_v43, %v2522_v35  ;;  %vm2608_vm14 = vweird.f32 %v4213_v43 }
 0xa42   :  { %vm2609_vm0 = vmor %vm2607_vm15, %vm2608_vm14 }
 0xa43   :  { %v2603_v2 = vmul.f32 %v4213_v43, %v2602_v22  ;;  %3055 = vmatpush.bf16.msrb.mxu1 %v3787_v7 }
 0xa45   :  { %v2604_v51 = vmul.f32 0.5, %v2603_v2 }
 0xa47   :  { %v2605_v11 = vsub.f32 1.5, %v2604_v51 }
 0xa49   :  { %v2606_v53 = vmul.f32 %v4213_v43, %v2605_v11 }
 0xa4b   :  { %v2610_v41 = vsel %vm2609_vm0, %v4213_v43, %v2606_v53 }
 0xa4c   :  { %v2698_v37 = vmul.f32 %v2610_v41, %v6102_v19 }
 0xa4e   :  { %v2715_v30 = vmul.f32 %v6115_v0, %v2698_v37 }
 0xa50   :  { %v6228_v49 = vadd.f32 %v6119_v44, %v2715_v30 }
 0xa52   :  { %v2744_v52 = vpack.c.bf16 %v6228_v49, %v6225_v10 }
 0xa54   :  { %3726 = vmatmul.msk.bf16.gmra.mxu2 %vm333_vm1, %v2744_v52 }
 0xa62   :  { %v2477_v19 = vpop.xlane.xlu1 %2476 }
 0xa63   :  { %v2507_v25 = vmul.f32 %v2477_v19, %v6000_v38 }
 0xa65   :  { %v2523_v33 = vadd.f32 1e-12, %v2507_v25 }
 0xa67   :  { %4214 = vrsqrt.f32 %v2523_v33  ;;  %vm2617_vm4 = vweird.f32 %v2523_v33 }
 0xa6a   :  { %v2395_v63 = vpop.xlane.xlu1 %2394 }
 0xa6b   :  { %v2418_v48 = vmul.f32 %v6000_v38, %v2395_v63 }
 0xa6d   :  { %v6251_v45 = vsub.f32 %v6142_v50, %v2418_v48  ;;  %v4215_v3 = vpop.eup %4214 }
 0xa6e   :  { %v2799_v5 = vpop.f32.mrf.mxu2  ;;  %v2612_v54 = vmul.f32 %v4215_v3, %v2523_v33  ;;  %vm2618_vm3 = vweird.f32 %v4215_v3 }
 0xa6f   :  { %v2800_v20 = vadd.f32 %v2799_v5, %v6245_v40  ;;  %v2450_v46 = vmul.f32 %v6251_v45, %v6251_v45  ;;  %vm2619_vm5 = vmor %vm2617_vm4, %vm2618_vm3 }
 0xa70   :  { %v2613_v16 = vmul.f32 %v4215_v3, %v2612_v54 }
 0xa71   :  { %v2855_v47 = vmul.f32 0.044715, %v2800_v20  ;;  %v2496_v26 = vsel %vm333_vm1, %v2450_v46, 0.0  ;;  %v2839_v30 = vmul.f32 0.5, %v2800_v20 }
 0xa72   :  { %2497 = vadd.xlane.f32.xlu1 %v2496_v26  ;;  %v2614_v43 = vmul.f32 0.5, %v2613_v16 }
 0xa73   :  { %v2871_v36 = vmul.f32 %v2855_v47, %v2800_v20 }
 0xa74   :  { %v2615_v2 = vsub.f32 1.5, %v2614_v43 }
 0xa75   :  { %v2887_v4 = vmul.f32 %v2871_v36, %v2800_v20 }
 0xa76   :  { %v2801_v12 = vpop.f32.mrf.mxu2  ;;  %v2616_v37 = vmul.f32 %v4215_v3, %v2615_v2 }
 0xa77   :  { %v2903_v27 = vadd.f32 %v2887_v4, %v2800_v20  ;;  %v2802_v50 = vadd.f32 %v2801_v12, %v6245_v40 }
 0xa78   :  { %v2620_v25 = vsel %vm2619_vm5, %v4215_v3, %v2616_v37 }
 0xa79   :  { %v2856_v8 = vmul.f32 0.044715, %v2802_v50  ;;  %v2919_v39 = vmul.f32 0.7978846, %v2903_v27  ;;  %v2840_v52 = vmul.f32 0.5, %v2802_v50  ;;  %v2699_v47 = vmul.f32 %v2620_v25, %v6134_v18 }
 0xa7b   :  { %v2872_v60 = vmul.f32 %v2856_v8, %v2802_v50  ;;  %4216 = vtanh.f32 %v2919_v39  ;;  %v2716_v27 = vmul.f32 %v6115_v0, %v2699_v47 }
 0xa7d   :  { %v2888_v14 = vmul.f32 %v2872_v60, %v2802_v50  ;;  %v2480_v6 = vpop.xlane.xlu2 %2479  ;;  %v6268_v60 = vadd.f32 %v6119_v44, %v2716_v27 }
 0xa7e   :  { %v2508_v35 = vmul.f32 %v2480_v6, %v6000_v38 }
 0xa7f   :  { %v2904_v29 = vadd.f32 %v2888_v14, %v2802_v50 }
 0xa80   :  { %v2524_v17 = vadd.f32 1e-12, %v2508_v35 }
 0xa81   :  { %v2920_v13 = vmul.f32 0.7978846, %v2904_v29  ;;  %v4217_v22 = vpop.eup %4216 }
 0xa82   :  { %4218 = vrsqrt.f32 %v2524_v17  ;;  %v2951_v15 = vadd.f32 1.0, %v4217_v22  ;;  %vm2627_vm7 = vweird.f32 %v2524_v17 }
 0xa83   :  { %4220 = vtanh.f32 %v2920_v13 }
 0xa84   :  { %v2967_v42 = vmul.f32 %v2951_v15, %v2839_v30 }
 0xa85   :  { %v2483_v58 = vpop.xlane.xlu2 %2482 }
 0xa86   :  { %v2509_v51 = vmul.f32 %v2483_v58, %v6000_v38 }
 0xa88   :  { %v4219_v11 = vpop.eup %4218  ;;  %v2525_v53 = vadd.f32 1e-12, %v2509_v51 }
 0xa89   :  { %v4221_v41 = vpop.eup %4220  ;;  %v2622_v24 = vmul.f32 %v4219_v11, %v2524_v17  ;;  %vm2628_vm6 = vweird.f32 %v4219_v11 }
 0xa8a   :  { %v2952_v61 = vadd.f32 1.0, %v4221_v41  ;;  %4222 = vrsqrt.f32 %v2525_v53  ;;  %vm2629_vm8 = vmor %vm2627_vm7, %vm2628_vm6  ;;  %vm2637_vm10 = vweird.f32 %v2525_v53 }
 0xa8b   :  { %v2623_v19 = vmul.f32 %v4219_v11, %v2622_v24 }
 0xa8c   :  { %v2968_v34 = vmul.f32 %v2952_v61, %v2840_v52 }
 0xa8d   :  { %v2624_v63 = vmul.f32 0.5, %v2623_v19 }
 0xa8e   :  { %v2983_v48 = vpack.c.bf16 %v2968_v34, %v2967_v42 }
 0xa8f   :  { %v2625_v7 = vsub.f32 1.5, %v2624_v63  ;;  %v2486_v5 = vpop.xlane.xlu0 %2485 }
 0xa90   :  { %v4223_v46 = vpop.eup %4222  ;;  %3747 = vmatmul.msk.bf16.vlgmr.msrb.gmra.mxu1 %vm197_vm2, %v2983_v48  ;;  %v2510_v20 = vmul.f32 %v2486_v5, %v6000_v38 }
 0xa91   :  { %v2626_v26 = vmul.f32 %v4219_v11, %v2625_v7  ;;  %v2632_v33 = vmul.f32 %v4223_v46, %v2525_v53  ;;  %vm2638_vm9 = vweird.f32 %v4223_v46 }
 0xa92   :  { %v2526_v36 = vadd.f32 1e-12, %v2510_v20  ;;  %vm2639_vm11 = vmor %vm2637_vm10, %vm2638_vm9 }
 0xa93   :  { %v2630_v4 = vsel %vm2629_vm8, %v4219_v11, %v2626_v26  ;;  %v2633_v12 = vmul.f32 %v4223_v46, %v2632_v33 }
 0xa94   :  { %v2700_v3 = vmul.f32 %v2630_v4, %v6150_v57  ;;  %4224 = vrsqrt.f32 %v2526_v36  ;;  %vm2647_vm13 = vweird.f32 %v2526_v36 }
 0xa95   :  { %v2634_v50 = vmul.f32 0.5, %v2633_v12 }
 0xa96   :  { %v2717_v54 = vmul.f32 %v6115_v0, %v2700_v3 }
 0xa97   :  { %v2635_v18 = vsub.f32 1.5, %v2634_v50  ;;  %v2489_v8 = vpop.xlane.xlu1 %2488 }
 0xa98   :  { %v2511_v39 = vmul.f32 %v2489_v8, %v6000_v38  ;;  %v6271_v16 = vadd.f32 %v6119_v44, %v2717_v54 }
 0xa99   :  { %v2636_v35 = vmul.f32 %v4223_v46, %v2635_v18 }
 0xa9a   :  { %v4225_v14 = vpop.eup %4224  ;;  %v2527_v6 = vadd.f32 1e-12, %v2511_v39  ;;  %v2745_v57 = vpack.c.bf16 %v6271_v16, %v6268_v60 }
 0xa9b   :  { %v2642_v29 = vmul.f32 %v4225_v14, %v2526_v36  ;;  %v2640_v43 = vsel %vm2639_vm11, %v4223_v46, %v2636_v35  ;;  %vm2648_vm12 = vweird.f32 %v4225_v14 }
 0xa9c   :  { %4226 = vrsqrt.f32 %v2527_v6  ;;  %3727 = vmatmul.msk.bf16.gmra.mxu2 %vm333_vm1, %v2745_v57  ;;  %v2701_v11 = vmul.f32 %v2640_v43, %v6157_v1  ;;  %vm2649_vm14 = vmor %vm2647_vm13, %vm2648_vm12  ;;  %vm2657_vm0 = vweird.f32 %v2527_v6 }
 0xa9d   :  { %v2643_v17 = vmul.f32 %v4225_v14, %v2642_v29 }
 0xa9e   :  { %v2718_v19 = vmul.f32 %v6115_v0, %v2701_v11 }
 0xa9f   :  { %v2644_v13 = vmul.f32 0.5, %v2643_v17 }
 0xaa0   :  { %v2492_v22 = vpop.xlane.xlu2 %2491  ;;  %v6283_v48 = vadd.f32 %v6119_v44, %v2718_v19 }
 0xaa1   :  { %v2645_v2 = vsub.f32 1.5, %v2644_v13  ;;  %v2512_v58 = vmul.f32 %v2492_v22, %v6000_v38 }
 0xaa2   :  { %v4227_v51 = vpop.eup %4226 }
 0xaa3   :  { %v2646_v15 = vmul.f32 %v4225_v14, %v2645_v2  ;;  %v2652_v41 = vmul.f32 %v4227_v51, %v2527_v6  ;;  %v2528_v37 = vadd.f32 1e-12, %v2512_v58  ;;  %vm2658_vm15 = vweird.f32 %v4227_v51 }
 0xaa4   :  { %v2804_v24 = vpop.f32.mrf.mxu2  ;;  %vm2659_vm3 = vmor %vm2657_vm0, %vm2658_vm15 }
 0xaa5   :  { %v2650_v30 = vsel %vm2649_vm14, %v4225_v14, %v2646_v15  ;;  %v2653_v53 = vmul.f32 %v4227_v51, %v2652_v41  ;;  %4228 = vrsqrt.f32 %v2528_v37  ;;  %v2805_v61 = vadd.f32 %v2804_v24, %v6245_v40 }
 0xaa6   :  { %v2702_v52 = vmul.f32 %v2650_v30, %v6167_v28  ;;  %vm2667_vm5 = vweird.f32 %v2528_v37 }
 0xaa7   :  { %v2654_v42 = vmul.f32 0.5, %v2653_v53  ;;  %v2857_v34 = vmul.f32 0.044715, %v2805_v61 }
 0xaa8   :  { %v2719_v25 = vmul.f32 %v6115_v0, %v2702_v52  ;;  %v2841_v52 = vmul.f32 0.5, %v2805_v61 }
 0xaa9   :  { %v2655_v1 = vsub.f32 1.5, %v2654_v42  ;;  %v2873_v63 = vmul.f32 %v2857_v34, %v2805_v61 }
 0xaaa   :  { %v6286_v7 = vadd.f32 %v6119_v44, %v2719_v25 }
 0xaab   :  { %v4229_v5 = vpop.eup %4228  ;;  %v2656_v46 = vmul.f32 %v4227_v51, %v2655_v1  ;;  %v2889_v47 = vmul.f32 %v2873_v63, %v2805_v61 }
 0xaac   :  { %v2662_v28 = vmul.f32 %v4229_v5, %v2528_v37  ;;  %v2806_v20 = vpop.f32.mrf.mxu2  ;;  %v2746_v26 = vpack.c.bf16 %v6286_v7, %v6283_v48  ;;  %vm2668_vm4 = vweird.f32 %v4229_v5 }
 0xaad   :  { %v2807_v33 = vadd.f32 %v2806_v20, %v6245_v40  ;;  %v2905_v4 = vadd.f32 %v2889_v47, %v2805_v61  ;;  %v2660_v3 = vsel %vm2659_vm3, %v4227_v51, %v2656_v46  ;;  %vm2669_vm6 = vmor %vm2667_vm5, %vm2668_vm4 }
 0xaae   :  { %v2663_v36 = vmul.f32 %v4229_v5, %v2662_v28  ;;  %3728 = vmatmul.msk.bf16.gmra.mxu2 %vm333_vm1, %v2746_v26  ;;  %v2703_v8 = vmul.f32 %v2660_v3, %v6183_v62 }
 0xaaf   :  { %v2858_v12 = vmul.f32 0.044715, %v2807_v33  ;;  %v2921_v50 = vmul.f32 0.7978846, %v2905_v4  ;;  %v2842_v19 = vmul.f32 0.5, %v2807_v33 }
 0xab0   :  { %v2664_v27 = vmul.f32 0.5, %v2663_v36  ;;  %v2720_v13 = vmul.f32 %v6115_v0, %v2703_v8  ;;  %v2495_v36 = vpop.xlane.xlu0 %2494 }
 0xab1   :  { %v2874_v54 = vmul.f32 %v2858_v12, %v2807_v33  ;;  %4230 = vtanh.f32 %v2921_v50  ;;  %v2513_v4 = vmul.f32 %v2495_v36, %v6000_v38 }
 0xab2   :  { %v2665_v18 = vsub.f32 1.5, %v2664_v27  ;;  %v6298_v51 = vadd.f32 %v6119_v44, %v2720_v13 }
 0xab3   :  { %v2890_v39 = vmul.f32 %v2874_v54, %v2807_v33  ;;  %v2529_v50 = vadd.f32 1e-12, %v2513_v4 }
 0xab4   :  { %v2666_v14 = vmul.f32 %v4229_v5, %v2665_v18 }
 0xab5   :  { %v2906_v57 = vadd.f32 %v2890_v39, %v2807_v33  ;;  %vm2677_vm8 = vweird.f32 %v2529_v50 }
 0xab6   :  { %v2670_v6 = vsel %vm2669_vm6, %v4229_v5, %v2666_v14  ;;  %v2809_v35 = vpop.f32.mrf.mxu2 }
 0xab7   :  { %v2704_v29 = vmul.f32 %v2670_v6, %v6195_v32  ;;  %v2922_v17 = vmul.f32 0.7978846, %v2906_v57  ;;  %v2810_v43 = vadd.f32 %v2809_v35, %v6245_v40  ;;  %v4231_v62 = vpop.eup %4230 }
 0xab8   :  { %v2953_v37 = vadd.f32 1.0, %v4231_v62 }
 0xab9   :  { %v2859_v22 = vmul.f32 0.044715, %v2810_v43  ;;  %v2721_v2 = vmul.f32 %v6115_v0, %v2704_v29  ;;  %4232 = vtanh.f32 %v2922_v17  ;;  %v2843_v12 = vmul.f32 0.5, %v2810_v43 }
 0xaba   :  { %v2969_v25 = vmul.f32 %v2953_v37, %v2841_v52 }
 0xabb   :  { %v2875_v58 = vmul.f32 %v2859_v22, %v2810_v43  ;;  %v6301_v11 = vadd.f32 %v6119_v44, %v2721_v2 }
 0xabd   :  { %v2891_v15 = vmul.f32 %v2875_v58, %v2810_v43  ;;  %v2747_v32 = vpack.c.bf16 %v6301_v11, %v6298_v51 }
 0xabe   :  { %v2811_v41 = vpop.f32.mrf.mxu2 }
 0xabf   :  { %v4233_v24 = vpop.eup %4232  ;;  %v2907_v30 = vadd.f32 %v2891_v15, %v2810_v43  ;;  %v2812_v53 = vadd.f32 %v2811_v41, %v6245_v40  ;;  %3729 = vmatmul.msk.bf16.gmra.mxu2 %vm333_vm1, %v2747_v32 }
 0xac0   :  { %v2954_v42 = vadd.f32 1.0, %v4233_v24 }
 0xac1   :  { %v2860_v34 = vmul.f32 0.044715, %v2812_v53  ;;  %v2923_v63 = vmul.f32 0.7978846, %v2907_v30  ;;  %v2844_v3 = vmul.f32 0.5, %v2812_v53 }
 0xac2   :  { %v2970_v1 = vmul.f32 %v2954_v42, %v2842_v19 }
 0xac3   :  { %v2876_v5 = vmul.f32 %v2860_v34, %v2812_v53  ;;  %4234 = vtanh.f32 %v2923_v63 }
 0xac4   :  { %v2984_v46 = vpack.c.bf16 %v2970_v1, %v2969_v25 }
 0xac5   :  { %v2892_v28 = vmul.f32 %v2876_v5, %v2812_v53 }
 0xac6   :  { %3748 = vmatmul.msk.bf16.gmra.mxu1 %vm197_vm2, %v2984_v46 }
 0xac7   :  { %v2908_v47 = vadd.f32 %v2892_v28, %v2812_v53 }
 0xac9   :  { %v2924_v20 = vmul.f32 0.7978846, %v2908_v47  ;;  %v4235_v26 = vpop.eup %4234 }
 0xaca   :  { %v2955_v61 = vadd.f32 1.0, %v4235_v26 }
 0xacb   :  { %4236 = vtanh.f32 %v2924_v20 }
 0xacc   :  { %v2971_v54 = vmul.f32 %v2955_v61, %v2843_v12  ;;  %4238 = vrsqrt.f32 %v2529_v50 }
 0xad1   :  { %v4237_v33 = vpop.eup %4236 }
 0xad2   :  { %v2956_v27 = vadd.f32 1.0, %v4237_v33  ;;  %v4239_v35 = vpop.eup %4238 }
 0xad3   :  { %v2672_v22 = vmul.f32 %v4239_v35, %v2529_v50  ;;  %vm2678_vm7 = vweird.f32 %v4239_v35 }
 0xad4   :  { %v2972_v18 = vmul.f32 %v2956_v27, %v2844_v3  ;;  %vm2679_vm9 = vmor %vm2677_vm8, %vm2678_vm7 }
 0xad5   :  { %v2673_v15 = vmul.f32 %v4239_v35, %v2672_v22 }
 0xad6   :  { %v2985_v8 = vpack.c.bf16 %v2972_v18, %v2971_v54 }
 0xad7   :  { %v2814_v39 = vpop.f32.mrf.mxu2  ;;  %v2674_v53 = vmul.f32 0.5, %v2673_v15 }
 0xad8   :  { %v2815_v14 = vadd.f32 %v2814_v39, %v6245_v40  ;;  %3749 = vmatmul.msk.bf16.gmra.mxu1 %vm197_vm2, %v2985_v8 }
 0xad9   :  { %v2675_v19 = vsub.f32 1.5, %v2674_v53 }
 0xada   :  { %v2861_v57 = vmul.f32 0.044715, %v2815_v14  ;;  %v2845_v28 = vmul.f32 0.5, %v2815_v14 }
 0xadb   :  { %v2676_v25 = vmul.f32 %v4239_v35, %v2675_v19 }
 0xadc   :  { %v2877_v6 = vmul.f32 %v2861_v57, %v2815_v14 }
 0xadd   :  { %v2680_v26 = vsel %vm2679_vm9, %v4239_v35, %v2676_v25 }
 0xade   :  { %v2893_v29 = vmul.f32 %v2877_v6, %v2815_v14  ;;  %v2705_v3 = vmul.f32 %v2680_v26, %v6211_v59 }
 0xadf   :  { %v2816_v17 = vpop.f32.mrf.mxu2 }
 0xae0   :  { %v2909_v13 = vadd.f32 %v2893_v29, %v2815_v14  ;;  %v2817_v43 = vadd.f32 %v2816_v17, %v6245_v40  ;;  %v2722_v18 = vmul.f32 %v6115_v0, %v2705_v3 }
 0xae2   :  { %v2862_v2 = vmul.f32 0.044715, %v2817_v43  ;;  %v2925_v62 = vmul.f32 0.7978846, %v2909_v13  ;;  %v2846_v47 = vmul.f32 0.5, %v2817_v43  ;;  %v6319_v39 = vadd.f32 %v6119_v44, %v2722_v18 }
 0xae4   :  { %v2878_v58 = vmul.f32 %v2862_v2, %v2817_v43  ;;  %4240 = vtanh.f32 %v2925_v62 }
 0xae5   :  { %v2498_v32 = vpop.xlane.xlu1 %2497 }
 0xae6   :  { %v2894_v41 = vmul.f32 %v2878_v58, %v2817_v43  ;;  %v2514_v37 = vmul.f32 %v2498_v32, %v6000_v38 }
 0xae8   :  { %v2910_v24 = vadd.f32 %v2894_v41, %v2817_v43  ;;  %v2530_v30 = vadd.f32 1e-12, %v2514_v37 }
 0xaea   :  { %v2926_v52 = vmul.f32 0.7978846, %v2910_v24  ;;  %4242 = vrsqrt.f32 %v2530_v30  ;;  %v4241_v42 = vpop.eup %4240  ;;  %vm2687_vm11 = vweird.f32 %v2530_v30 }
 0xaeb   :  { %v2957_v63 = vadd.f32 1.0, %v4241_v42 }
 0xaec   :  { %4244 = vtanh.f32 %v2926_v52 }
 0xaed   :  { %v2973_v4 = vmul.f32 %v2957_v63, %v2845_v28 }
 0xaf0   :  { %v4243_v34 = vpop.eup %4242 }
 0xaf1   :  { %v2682_v1 = vmul.f32 %v4243_v34, %v2530_v30  ;;  %vm2688_vm10 = vweird.f32 %v4243_v34 }
 0xaf2   :  { %v4245_v5 = vpop.eup %4244  ;;  %vm2689_vm12 = vmor %vm2687_vm11, %vm2688_vm10 }
 0xaf3   :  { %v2683_v46 = vmul.f32 %v4243_v34, %v2682_v1  ;;  %v2958_v20 = vadd.f32 1.0, %v4245_v5 }
 0xaf5   :  { %v2684_v36 = vmul.f32 0.5, %v2683_v46  ;;  %v2974_v61 = vmul.f32 %v2958_v20, %v2846_v47 }
 0xaf7   :  { %v2685_v33 = vsub.f32 1.5, %v2684_v36  ;;  %v2986_v12 = vpack.c.bf16 %v2974_v61, %v2973_v4 }
 0xaf9   :  { %v2686_v27 = vmul.f32 %v4243_v34, %v2685_v33  ;;  %3750 = vmatmul.msk.bf16.gmra.mxu1 %vm197_vm2, %v2986_v12 }
 0xafb   :  { %v2690_v50 = vsel %vm2689_vm12, %v4243_v34, %v2686_v27 }
 0xafc   :  { %v2706_v54 = vmul.f32 %v2690_v50, %v6251_v45 }
 0xafe   :  { %v2723_v8 = vmul.f32 %v6115_v0, %v2706_v54 }
 0xb00   :  { %v6322_v14 = vadd.f32 %v6119_v44, %v2723_v8 }
 0xb02   :  { %v2748_v59 = vpack.c.bf16 %v6322_v14, %v6319_v39 }
 0xb04   :  { %3730 = vmatmul.msk.bf16.gmra.mxu2 %vm333_vm1, %v2748_v59 }
 0xb1f   :  { %v2819_v57 = vpop.f32.mrf.mxu2 }
 0xb20   :  { %v2820_v6 = vadd.f32 %v2819_v57, %v6245_v40 }
 0xb22   :  { %v2863_v35 = vmul.f32 0.044715, %v2820_v6  ;;  %v2847_v25 = vmul.f32 0.5, %v2820_v6 }
 0xb24   :  { %v2879_v45 = vmul.f32 %v2863_v35, %v2820_v6 }
 0xb26   :  { %v2895_v29 = vmul.f32 %v2879_v45, %v2820_v6 }
 0xb27   :  { %v2821_v17 = vpop.f32.mrf.mxu2 }
 0xb28   :  { %v2911_v13 = vadd.f32 %v2895_v29, %v2820_v6  ;;  %v2822_v0 = vadd.f32 %v2821_v17, %v6245_v40 }
 0xb2a   :  { %v2864_v43 = vmul.f32 0.044715, %v2822_v0  ;;  %v2927_v22 = vmul.f32 0.7978846, %v2911_v13  ;;  %v2848_v1 = vmul.f32 0.5, %v2822_v0 }
 0xb2c   :  { %v2880_v2 = vmul.f32 %v2864_v43, %v2822_v0  ;;  %4246 = vtanh.f32 %v2927_v22 }
 0xb2e   :  { %v2896_v44 = vmul.f32 %v2880_v2, %v2822_v0 }
 0xb30   :  { %v2912_v62 = vadd.f32 %v2896_v44, %v2822_v0 }
 0xb31   :  { %v2824_v58 = vpop.f32.mrf.mxu2 }
 0xb32   :  { %v2928_v15 = vmul.f32 0.7978846, %v2912_v62  ;;  %v2825_v32 = vadd.f32 %v2824_v58, %v6245_v40  ;;  %v4247_v37 = vpop.eup %4246 }
 0xb33   :  { %v2959_v52 = vadd.f32 1.0, %v4247_v37 }
 0xb34   :  { %v2865_v41 = vmul.f32 0.044715, %v2825_v32  ;;  %4248 = vtanh.f32 %v2928_v15  ;;  %v2849_v45 = vmul.f32 0.5, %v2825_v32 }
 0xb35   :  { %v2975_v46 = vmul.f32 %v2959_v52, %v2847_v25 }
 0xb36   :  { %v2881_v24 = vmul.f32 %v2865_v41, %v2825_v32 }
 0xb38   :  { %v2897_v30 = vmul.f32 %v2881_v24, %v2825_v32 }
 0xb39   :  { %v2826_v53 = vpop.f32.mrf.mxu2 }
 0xb3a   :  { %v4249_v19 = vpop.eup %4248  ;;  %v2913_v42 = vadd.f32 %v2897_v30, %v2825_v32  ;;  %v2827_v34 = vadd.f32 %v2826_v53, %v6245_v40 }
 0xb3b   :  { %v2960_v63 = vadd.f32 1.0, %v4249_v19 }
 0xb3c   :  { %v2866_v5 = vmul.f32 0.044715, %v2827_v34  ;;  %v2929_v47 = vmul.f32 0.7978846, %v2913_v42  ;;  %v2850_v29 = vmul.f32 0.5, %v2827_v34  ;;  %v6336_v42 = vpop.f32.mrf.mxu1 }
 0xb3d   :  { %v2976_v28 = vmul.f32 %v2960_v63, %v2848_v1 }
 0xb3e   :  { %v2882_v20 = vmul.f32 %v2866_v5, %v2827_v34  ;;  %4250 = vtanh.f32 %v2929_v47 }
 0xb3f   :  { %v2987_v26 = vpack.c.bf16 %v2976_v28, %v2975_v46 }
 0xb40   :  { %v2898_v36 = vmul.f32 %v2882_v20, %v2827_v34 }
 0xb41   :  { %3751 = vmatmul.msk.bf16.gmra.mxu1 %vm197_vm2, %v2987_v26 }
 0xb42   :  { %v2914_v4 = vadd.f32 %v2898_v36, %v2827_v34  ;;  %v2829_v61 = vpop.f32.mrf.mxu2 }
 0xb43   :  { %v2830_v33 = vadd.f32 %v2829_v61, %v6245_v40 }
 0xb44   :  { %v2930_v12 = vmul.f32 0.7978846, %v2914_v4  ;;  %v4251_v50 = vpop.eup %4250  ;;  %v6338_v34 = vpop.f32.mrf.mxu1 }
 0xb45   :  { %v2867_v3 = vmul.f32 0.044715, %v2830_v33  ;;  %v2961_v57 = vadd.f32 1.0, %v4251_v50  ;;  %v2851_v24 = vmul.f32 0.5, %v2830_v33 }
 0xb46   :  { %4252 = vtanh.f32 %v2930_v12 }
 0xb47   :  { %v2883_v27 = vmul.f32 %v2867_v3, %v2830_v33  ;;  %v2977_v43 = vmul.f32 %v2961_v57, %v2849_v45 }
 0xb49   :  { %v2899_v54 = vmul.f32 %v2883_v27, %v2830_v33 }
 0xb4a   :  { %v2831_v18 = vpop.f32.mrf.mxu2 }
 0xb4b   :  { %v2915_v8 = vadd.f32 %v2899_v54, %v2830_v33  ;;  %v2832_v59 = vadd.f32 %v2831_v18, %v6245_v40 }
 0xb4c   :  { %v4253_v6 = vpop.eup %4252  ;;  %v6340_v1 = vpop.f32.mrf.mxu1 }
 0xb4d   :  { %v2868_v35 = vmul.f32 0.044715, %v2832_v59  ;;  %v2962_v17 = vadd.f32 1.0, %v4253_v6  ;;  %v2931_v13 = vmul.f32 0.7978846, %v2915_v8  ;;  %v2852_v30 = vmul.f32 0.5, %v2832_v59 }
 0xb4f   :  { %v2884_v0 = vmul.f32 %v2868_v35, %v2832_v59  ;;  %v2978_v22 = vmul.f32 %v2962_v17, %v2850_v29  ;;  %4254 = vtanh.f32 %v2931_v13 }
 0xb51   :  { %v2900_v2 = vmul.f32 %v2884_v0, %v2832_v59  ;;  %v2988_v44 = vpack.c.bf16 %v2978_v22, %v2977_v43  ;;  %v6352_v22 = vld [vmem:[%s6897_s5] sm:$0xff] }
 0xb53   :  { %v2916_v62 = vadd.f32 %v2900_v2, %v2832_v59  ;;  %3752 = vmatmul.msk.bf16.gmra.mxu1 %vm197_vm2, %v2988_v44  ;;  %v2999_v2 = vperm.slane %v6352_v22, 5 }
 0xb54   :  { %v6344_v36 = vpop.f32.mrf.mxu1 }
 0xb55   :  { %v2932_v58 = vmul.f32 0.7978846, %v2916_v62  ;;  %v4255_v15 = vpop.eup %4254 }
 0xb56   :  { %v2963_v41 = vadd.f32 1.0, %v4255_v15 }
 0xb57   :  { %4256 = vtanh.f32 %v2932_v58 }
 0xb58   :  { %v2979_v53 = vmul.f32 %v2963_v41, %v2851_v24 }
 0xb5c   :  { %v6346_v27 = vpop.f32.mrf.mxu1 }
 0xb5d   :  { %v4257_v37 = vpop.eup %4256 }
 0xb5e   :  { %v2964_v32 = vadd.f32 1.0, %v4257_v37 }
 0xb60   :  { %v2980_v52 = vmul.f32 %v2964_v32, %v2852_v30 }
 0xb62   :  { %v2989_v19 = vpack.c.bf16 %v2980_v52, %v2979_v53 }
 0xb64   :  { %3753 = vmatmul.msk.bf16.gmra.mxu1 %vm197_vm2, %v2989_v19  ;;  %v3069_v35 = vpop.f32.mrf.mxu1 }
 0xb76   :  { %v3072_v17 = vpop.f32.mrf.mxu1 }
 0xb7e   :  { %v3074_v13 = vpop.f32.mrf.mxu1 }
 0xb87   :  { %v2834_v25 = vpop.f32.mrf.mxu2 }
 0xb88   :  { %v2835_v63 = vadd.f32 %v2834_v25, %v6245_v40 }
 0xb8a   :  { %v2869_v5 = vmul.f32 0.044715, %v2835_v63  ;;  %v2853_v59 = vmul.f32 0.5, %v2835_v63 }
 0xb8c   :  { %v2885_v46 = vmul.f32 %v2869_v5, %v2835_v63 }
 0xb8e   :  { %v2901_v28 = vmul.f32 %v2885_v46, %v2835_v63  ;;  %v3070_v46 = vadd.f32 %v3069_v35, %v2999_v2 }
 0xb8f   :  { %v2836_v47 = vpop.f32.mrf.mxu2 }
 0xb90   :  { %v2917_v20 = vadd.f32 %v2901_v28, %v2835_v63  ;;  %v2837_v26 = vadd.f32 %v2836_v47, %v6245_v40  ;;  %v6381_v47 = vadd.f32 %v3070_v46, %v6208_v9 }
 0xb92   :  { %v2870_v4 = vmul.f32 0.044715, %v2837_v26  ;;  %v2933_v61 = vmul.f32 0.7978846, %v2917_v20  ;;  %v2854_v57 = vmul.f32 0.5, %v2837_v26  ;;  %v3058_v20 = vadd.f32 %v6336_v42, %v2999_v2 }
 0xb94   :  { %v2886_v33 = vmul.f32 %v2870_v4, %v2837_v26  ;;  %4258 = vtanh.f32 %v2933_v61 }
 0xb96   :  { %v2902_v12 = vmul.f32 %v2886_v33, %v2837_v26 }
 0xb98   :  { %v2918_v3 = vadd.f32 %v2902_v12, %v2837_v26 }
 0xb9a   :  { %v2934_v50 = vmul.f32 0.7978846, %v2918_v3  ;;  %v4259_v54 = vpop.eup %4258 }
 0xb9b   :  { %v2965_v18 = vadd.f32 1.0, %v4259_v54  ;;  %v3075_v54 = vadd.f32 %v3074_v13, %v2999_v2 }
 0xb9c   :  { %4260 = vtanh.f32 %v2934_v50 }
 0xb9d   :  { %v2981_v40 = vmul.f32 %v2965_v18, %v2853_v59  ;;  %v6407_v59 = vadd.f32 %v3075_v54, %v6228_v49 }
 0xb9f   :  { %v3134_v35 = vsel %vm333_vm1, %v6407_v59, 0.0 }
 0xba2   :  { %v4261_v8 = vpop.eup %4260 }
 0xba3   :  { %v2966_v6 = vadd.f32 1.0, %v4261_v8 }
 0xba5   :  { %v2982_v45 = vmul.f32 %v2966_v6, %v2854_v57  ;;  %v3063_v57 = vadd.f32 %v6340_v1, %v2999_v2  ;;  %v3065_v1 = vadd.f32 %v6344_v36, %v2999_v2 }
 0xba7   :  { %v2990_v29 = vpack.c.bf16 %v2982_v45, %v2981_v40  ;;  %v6419_v40 = vadd.f32 %v3063_v57, %v6177_v56  ;;  %v6434_v56 = vadd.f32 %v3065_v1, %v6180_v23 }
 0xba9   :  { %3754 = vmatmul.msk.bf16.gmra.mxu1 %vm197_vm2, %v2990_v29  ;;  %v3119_v45 = vsel %vm333_vm1, %v6419_v40, 0.0 }
 0xbbe   :  { %v3077_v0 = vpop.f32.mrf.mxu1 }
 0xbbf   :  { %v3078_v9 = vadd.f32 %v3077_v0, %v2999_v2 }
 0xbc1   :  { %v6397_v3 = vadd.f32 %v3078_v9, %v6268_v60 }
 0xbc6   :  { %v3079_v43 = vpop.f32.mrf.mxu1 }
 0xbc7   :  { %v3080_v18 = vadd.f32 %v3079_v43, %v2999_v2 }
 0xbc9   :  { %v6410_v60 = vadd.f32 %v3080_v18, %v6271_v16  ;;  %v3060_v16 = vadd.f32 %v6338_v34, %v2999_v2  ;;  %v3122_v34 = vsel %vm333_vm1, %v6434_v56, 0.0 }
 0xbcb   :  { %v3140_v6 = vsel %vm333_vm1, %v6410_v60, 0.0  ;;  %v6431_v29 = vadd.f32 %v3060_v16, %v6128_v31 }
 0xbcd   :  { %v3116_v36 = vsel %vm333_vm1, %v6431_v29, 0.0 }
 0xbd0   :  { %v3082_v44 = vpop.f32.mrf.mxu1 }
 0xbd1   :  { %v3083_v62 = vadd.f32 %v3082_v44, %v2999_v2 }
 0xbd3   :  { %v6356_v58 = vadd.f32 %v3083_v62, %v6283_v48  ;;  %v3073_v48 = vadd.f32 %v3072_v17, %v2999_v2 }
 0xbd5   :  { %v3143_v15 = vsel %vm333_vm1, %v6356_v58, 0.0  ;;  %v6371_v63 = vadd.f32 %v3073_v48, %v6225_v10  ;;  %v3128_v10 = vsel %vm333_vm1, %v6381_v47, 0.0 }
 0xbd6   :  { %3144 = vadd.xlane.f32.xlu0 %v3143_v15 }
 0xbd8   :  { %v3084_v41 = vpop.f32.mrf.mxu1 }
 0xbd9   :  { %v3085_v37 = vadd.f32 %v3084_v41, %v2999_v2 }
 0xbdb   :  { %v6361_v24 = vadd.f32 %v3085_v37, %v6286_v7 }
 0xbdd   :  { %v3146_v30 = vsel %vm333_vm1, %v6361_v24, 0.0 }
 0xbde   :  { %3147 = vadd.xlane.f32.xlu1 %v3146_v30 }
 0xbe1   :  { %v3087_v32 = vpop.f32.mrf.mxu1 }
 0xbe2   :  { %v3088_v53 = vadd.f32 %v3087_v32, %v2999_v2 }
 0xbe4   :  { %v6366_v52 = vadd.f32 %v3088_v53, %v6298_v51  ;;  %v3131_v51 = vsel %vm333_vm1, %v6371_v63, 0.0 }
 0xbe6   :  { %v3149_v19 = vsel %vm333_vm1, %v6366_v52, 0.0 }
 0xbe7   :  { %3150 = vadd.xlane.f32.xlu1 %v3149_v19 }
 0xbe9   :  { %v3089_v25 = vpop.f32.mrf.mxu1 }
 0xbea   :  { %v3090_v7 = vadd.f32 %v3089_v25, %v2999_v2 }
 0xbec   :  { %v6374_v5 = vadd.f32 %v3090_v7, %v6301_v11  ;;  %v6387_v11 = vadd.f32 %v3058_v20, %v6125_v55 }
 0xbee   :  { %v3152_v28 = vsel %vm333_vm1, %v6374_v5, 0.0  ;;  %v3113_v26 = vsel %vm333_vm1, %v6387_v11, 0.0 }
 0xbef   :  { %3153 = vadd.xlane.f32.xlu2 %v3152_v28  ;;  %3132 = vadd.xlane.f32.xlu1 %v3131_v51 }
 0xbf7   :  { %3129 = vadd.xlane.f32.xlu1 %v3128_v10 }
 0xbff   :  { %3114 = vadd.xlane.f32.xlu1 %v3113_v26 }
 0xc26   :  { %v3092_v4 = vpop.f32.mrf.mxu1 }
 0xc27   :  { %v3093_v61 = vadd.f32 %v3092_v4, %v2999_v2 }
 0xc29   :  { %v6392_v33 = vadd.f32 %v3093_v61, %v6319_v39  ;;  %v3137_v39 = vsel %vm333_vm1, %v6397_v3, 0.0 }
 0xc2b   :  { %v3155_v42 = vsel %vm333_vm1, %v6392_v33, 0.0 }
 0xc2c   :  { %3156 = vadd.xlane.f32.xlu2 %v3155_v42 }
 0xc2e   :  { %v3094_v12 = vpop.f32.mrf.mxu1 }
 0xc2f   :  { %v3095_v55 = vadd.f32 %v3094_v12, %v2999_v2 }
 0xc31   :  { %v6400_v50 = vadd.f32 %v3095_v55, %v6322_v14  ;;  %v3068_v14 = vadd.f32 %v6346_v27, %v2999_v2 }
 0xc33   :  { %v3158_v8 = vsel %vm333_vm1, %v6400_v50, 0.0  ;;  %v6422_v49 = vadd.f32 %v3068_v14, %v6205_v21 }
 0xc34   :  { %3159 = vadd.xlane.f32.xlu0 %v3158_v8  ;;  %3138 = vadd.xlane.f32.xlu2 %v3137_v39 }
 0xc35   :  { %v3125_v27 = vsel %vm333_vm1, %v6422_v49, 0.0 }
 0xc3c   :  { %3141 = vadd.xlane.f32.xlu0 %v3140_v6  ;;  %3135 = vadd.xlane.f32.xlu2 %v3134_v35 }
 0xc44   :  { %3126 = vadd.xlane.f32.xlu0 %v3125_v27  ;;  %3120 = vadd.xlane.f32.xlu2 %v3119_v45 }
 0xc49   :  { %v3145_v21 = vpop.xlane.xlu0 %3144 }
 0xc4a   :  { %v3171_v17 = vmul.f32 %v3145_v21, %v6000_v38 }
 0xc4c   :  { %v6442_v13 = vsub.f32 %v6356_v58, %v3171_v17  ;;  %3123 = vadd.xlane.f32.xlu0 %v3122_v34  ;;  %3117 = vadd.xlane.f32.xlu2 %v3116_v36 }
 0xc4e   :  { %v3203_v31 = vmul.f32 %v6442_v13, %v6442_v13 }
 0xc50   :  { %v3239_v23 = vsel %vm333_vm1, %v3203_v31, 0.0 }
 0xc51   :  { %v3148_v0 = vpop.xlane.xlu1 %3147  ;;  %3240 = vadd.xlane.f32.xlu1 %v3239_v23 }
 0xc52   :  { %v3172_v43 = vmul.f32 %v3148_v0, %v6000_v38 }
 0xc54   :  { %v6449_v2 = vsub.f32 %v6361_v24, %v3172_v43 }
 0xc56   :  { %v3204_v44 = vmul.f32 %v6449_v2, %v6449_v2 }
 0xc58   :  { %v3242_v62 = vsel %vm333_vm1, %v3204_v44, 0.0 }
 0xc59   :  { %3243 = vadd.xlane.f32.xlu2 %v3242_v62 }
 0xc5a   :  { %v3151_v58 = vpop.xlane.xlu1 %3150 }
 0xc5b   :  { %v3173_v15 = vmul.f32 %v3151_v58, %v6000_v38 }
 0xc5d   :  { %v6456_v41 = vsub.f32 %v6366_v52, %v3173_v15 }
 0xc5f   :  { %v3205_v37 = vmul.f32 %v6456_v41, %v6456_v41 }
 0xc61   :  { %v3245_v30 = vsel %vm333_vm1, %v3205_v37, 0.0 }
 0xc62   :  { %v3154_v32 = vpop.xlane.xlu2 %3153  ;;  %v3133_v24 = vpop.xlane.xlu1 %3132  ;;  %3246 = vadd.xlane.f32.xlu2 %v3245_v30 }
 0xc63   :  { %v3174_v53 = vmul.f32 %v3154_v32, %v6000_v38  ;;  %v3167_v48 = vmul.f32 %v3133_v24, %v6000_v38 }
 0xc65   :  { %v6464_v19 = vsub.f32 %v6374_v5, %v3174_v53  ;;  %v6467_v25 = vsub.f32 %v6371_v63, %v3167_v48 }
 0xc67   :  { %v3206_v52 = vmul.f32 %v6464_v19, %v6464_v19  ;;  %v3199_v7 = vmul.f32 %v6467_v25, %v6467_v25 }
 0xc69   :  { %v3248_v46 = vsel %vm333_vm1, %v3206_v52, 0.0  ;;  %v3227_v28 = vsel %vm333_vm1, %v3199_v7, 0.0 }
 0xc6a   :  { %v3130_v51 = vpop.xlane.xlu1 %3129  ;;  %3249 = vadd.xlane.f32.xlu0 %v3248_v46  ;;  %3228 = vadd.xlane.f32.xlu2 %v3227_v28 }
 0xc6b   :  { %v3166_v20 = vmul.f32 %v3130_v51, %v6000_v38 }
 0xc6d   :  { %v6477_v5 = vsub.f32 %v6381_v47, %v3166_v20 }
 0xc6f   :  { %v3198_v63 = vmul.f32 %v6477_v5, %v6477_v5 }
 0xc71   :  { %v3224_v10 = vsel %vm333_vm1, %v3198_v63, 0.0 }
 0xc72   :  { %v3115_v26 = vpop.xlane.xlu1 %3114  ;;  %3225 = vadd.xlane.f32.xlu2 %v3224_v10 }
 0xc73   :  { %v3161_v4 = vmul.f32 %v3115_v26, %v6000_v38 }
 0xc75   :  { %v6484_v61 = vsub.f32 %v6387_v11, %v3161_v4 }
 0xc77   :  { %v3193_v9 = vmul.f32 %v6484_v61, %v6484_v61 }
 0xc79   :  { %v3209_v42 = vsel %vm333_vm1, %v3193_v9, 0.0 }
 0xc7a   :  { %3210 = vadd.xlane.f32.xlu2 %v3209_v42 }
 0xc9f   :  { %v3157_v47 = vpop.xlane.xlu2 %3156 }
 0xca0   :  { %v3175_v12 = vmul.f32 %v3157_v47, %v6000_v38 }
 0xca2   :  { %v6491_v55 = vsub.f32 %v6392_v33, %v3175_v12 }
 0xca4   :  { %v3207_v54 = vmul.f32 %v6491_v55, %v6491_v55 }
 0xca6   :  { %v3251_v18 = vsel %vm333_vm1, %v3207_v54, 0.0 }
 0xca7   :  { %3252 = vadd.xlane.f32.xlu0 %v3251_v18  ;;  %v3139_v11 = vpop.xlane.xlu2 %3138  ;;  %v3160_v8 = vpop.xlane.xlu0 %3159 }
 0xca8   :  { %v3169_v39 = vmul.f32 %v3139_v11, %v6000_v38  ;;  %v3176_v57 = vmul.f32 %v3160_v8, %v6000_v38 }
 0xcaa   :  { %v6499_v14 = vsub.f32 %v6397_v3, %v3169_v39  ;;  %v6502_v6 = vsub.f32 %v6400_v50, %v3176_v57 }
 0xcac   :  { %v3201_v33 = vmul.f32 %v6499_v14, %v6499_v14  ;;  %v3208_v35 = vmul.f32 %v6502_v6, %v6502_v6 }
 0xcae   :  { %v3233_v16 = vsel %vm333_vm1, %v3201_v33, 0.0  ;;  %v3254_v1 = vsel %vm333_vm1, %v3208_v35, 0.0 }
 0xcaf   :  { %3234 = vadd.xlane.f32.xlu0 %v3233_v16  ;;  %v3136_v27 = vpop.xlane.xlu2 %3135  ;;  %3255 = vadd.xlane.f32.xlu1 %v3254_v1  ;;  %v3142_v45 = vpop.xlane.xlu0 %3141 }
 0xcb0   :  { %v3168_v3 = vmul.f32 %v3136_v27, %v6000_v38  ;;  %v3170_v21 = vmul.f32 %v3142_v45, %v6000_v38 }
 0xcb2   :  { %v6513_v50 = vsub.f32 %v6407_v59, %v3168_v3  ;;  %v6516_v17 = vsub.f32 %v6410_v60, %v3170_v21 }
 0xcb4   :  { %v3200_v34 = vmul.f32 %v6513_v50, %v6513_v50  ;;  %v3202_v36 = vmul.f32 %v6516_v17, %v6516_v17 }
 0xcb6   :  { %v3230_v31 = vsel %vm333_vm1, %v3200_v34, 0.0  ;;  %v3236_v23 = vsel %vm333_vm1, %v3202_v36, 0.0 }
 0xcb7   :  { %3231 = vadd.xlane.f32.xlu0 %v3230_v31  ;;  %v3121_v0 = vpop.xlane.xlu2 %3120  ;;  %3237 = vadd.xlane.f32.xlu1 %v3236_v23  ;;  %v3127_v43 = vpop.xlane.xlu0 %3126 }
 0xcb8   :  { %v3163_v59 = vmul.f32 %v3121_v0, %v6000_v38  ;;  %v3165_v44 = vmul.f32 %v3127_v43, %v6000_v38 }
 0xcba   :  { %v6527_v60 = vsub.f32 %v6419_v40, %v3163_v59  ;;  %v6530_v62 = vsub.f32 %v6422_v49, %v3165_v44 }
 0xcbc   :  { %v3195_v58 = vmul.f32 %v6527_v60, %v6527_v60  ;;  %v3197_v15 = vmul.f32 %v6530_v62, %v6530_v62 }
 0xcbe   :  { %v3215_v37 = vsel %vm333_vm1, %v3195_v58, 0.0  ;;  %v3221_v30 = vsel %vm333_vm1, %v3197_v15, 0.0 }
 0xcbf   :  { %3216 = vadd.xlane.f32.xlu0 %v3215_v37  ;;  %v3118_v32 = vpop.xlane.xlu2 %3117  ;;  %3222 = vadd.xlane.f32.xlu1 %v3221_v30  ;;  %v3124_v24 = vpop.xlane.xlu0 %3123 }
 0xcc0   :  { %v3162_v40 = vmul.f32 %v3118_v32, %v6000_v38  ;;  %v3164_v53 = vmul.f32 %v3124_v24, %v6000_v38 }
 0xcc2   :  { %v6541_v49 = vsub.f32 %v6431_v29, %v3162_v40  ;;  %v6544_v48 = vsub.f32 %v6434_v56, %v3164_v53 }
 0xcc4   :  { %v3194_v52 = vmul.f32 %v6541_v49, %v6541_v49  ;;  %v3196_v7 = vmul.f32 %v6544_v48, %v6544_v48  ;;  %v3241_v20 = vpop.xlane.xlu1 %3240 }
 0xcc5   :  { %v3267_v63 = vmul.f32 %v3241_v20, %v6000_v38 }
 0xcc6   :  { %v3212_v46 = vsel %vm333_vm1, %v3194_v52, 0.0  ;;  %v3218_v28 = vsel %vm333_vm1, %v3196_v7, 0.0 }
 0xcc7   :  { %3213 = vadd.xlane.f32.xlu0 %v3212_v46  ;;  %3219 = vadd.xlane.f32.xlu1 %v3218_v28  ;;  %v3283_v10 = vadd.f32 1e-12, %v3267_v63 }
 0xcc9   :  { %vm3395_vm15 = vweird.f32 %v3283_v10 }
 0xccc   :  { %v3244_v51 = vpop.xlane.xlu2 %3243 }
 0xccd   :  { %v3268_v29 = vmul.f32 %v3244_v51, %v6000_v38 }
 0xccf   :  { %v3284_v56 = vadd.f32 1e-12, %v3268_v29 }
 0xcd1   :  { %4262 = vrsqrt.f32 %v3284_v56  ;;  %vm3405_vm14 = vweird.f32 %v3284_v56 }
 0xcd2   :  { %4264 = vrsqrt.f32 %v3283_v10 }
 0xcd5   :  { %v3247_v26 = vpop.xlane.xlu2 %3246 }
 0xcd6   :  { %v3269_v4 = vmul.f32 %v3247_v26, %v6000_v38 }
 0xcd7   :  { %v4263_v12 = vpop.eup %4262 }
 0xcd8   :  { %v6555_v42 = vadd.f32 1e-12, %v3269_v4  ;;  %v4265_v54 = vpop.eup %4264  ;;  %v3400_v11 = vmul.f32 %v4263_v12, %v3284_v56  ;;  %vm3406_vm2 = vweird.f32 %v4263_v12 }
 0xcd9   :  { %v3390_v39 = vmul.f32 %v4265_v54, %v3283_v10  ;;  %vm3396_vm13 = vweird.f32 %v4265_v54  ;;  %vm6583_vm0 = vmor %vm3405_vm14, %vm3406_vm2 }
 0xcda   :  { %4266 = vrsqrt.f32 %v6555_v42  ;;  %v3401_v57 = vmul.f32 %v4263_v12, %v3400_v11  ;;  %vm3397_vm3 = vmor %vm3395_vm15, %vm3396_vm13  ;;  %v6610_v11 = vperm.slane %v6352_v22, 6  ;;  %vm3415_vm5 = vweird.f32 %v6555_v42 }
 0xcdb   :  { %v3391_v33 = vmul.f32 %v4265_v54, %v3390_v39 }
 0xcdc   :  { %v3402_v1 = vmul.f32 0.5, %v3401_v57 }
 0xcdd   :  { %v3250_v9 = vpop.xlane.xlu0 %3249  ;;  %v3229_v18 = vpop.xlane.xlu2 %3228  ;;  %v3392_v45 = vmul.f32 0.5, %v3391_v33 }
 0xcde   :  { %v3270_v47 = vmul.f32 %v3250_v9, %v6000_v38  ;;  %v3263_v16 = vmul.f32 %v3229_v18, %v6000_v38  ;;  %v3403_v23 = vsub.f32 1.5, %v3402_v1 }
 0xcdf   :  { %v3393_v43 = vsub.f32 1.5, %v3392_v45 }
 0xce0   :  { %v6559_v8 = vadd.f32 1e-12, %v3270_v47  ;;  %v6562_v35 = vpop.eup %4266  ;;  %v6569_v34 = vadd.f32 1e-12, %v3263_v16  ;;  %v3404_v37 = vmul.f32 %v4263_v12, %v3403_v23 }
 0xce1   :  { %v3410_v3 = vmul.f32 %v6562_v35, %v6555_v42  ;;  %v3394_v30 = vmul.f32 %v4265_v54, %v3393_v43  ;;  %vm3416_vm4 = vweird.f32 %v6562_v35 }
 0xce2   :  { %4268 = vrsqrt.f32 %v6559_v8  ;;  %v3408_v28 = vsel %vm6583_vm0, %v4263_v12, %v3404_v37  ;;  %vm6624_vm6 = vmor %vm3415_vm5, %vm3416_vm4  ;;  %vm3425_vm8 = vweird.f32 %v6559_v8  ;;  %vm3355_vm14 = vweird.f32 %v6569_v34 }
 0xce3   :  { %v3411_v59 = vmul.f32 %v6562_v35, %v3410_v3  ;;  %4270 = vrsqrt.f32 %v6569_v34  ;;  %v3398_v29 = vsel %vm3397_vm3, %v4265_v54, %v3394_v30  ;;  %v3460_v47 = vmul.f32 %v3408_v28, %v6449_v2 }
 0xce4   :  { %v3459_v54 = vmul.f32 %v3398_v29, %v6442_v13 }
 0xce5   :  { %v3226_v27 = vpop.xlane.xlu2 %3225  ;;  %v3412_v32 = vmul.f32 0.5, %v3411_v59  ;;  %v3477_v3 = vmul.f32 %v6610_v11, %v3460_v47 }
 0xce6   :  { %v3262_v36 = vmul.f32 %v3226_v27, %v6000_v38 }
 0xce7   :  { %v3413_v63 = vsub.f32 1.5, %v3412_v32 }
 0xce8   :  { %v6567_v21 = vpop.eup %4268  ;;  %v6579_v15 = vadd.f32 1e-12, %v3262_v36 }
 0xce9   :  { %v3420_v44 = vmul.f32 %v6567_v21, %v6559_v8  ;;  %v6588_v46 = vpop.eup %4270  ;;  %v3414_v57 = vmul.f32 %v6562_v35, %v3413_v63  ;;  %vm3426_vm7 = vweird.f32 %v6567_v21 }
 0xcea   :  { %v3350_v12 = vmul.f32 %v6588_v46, %v6569_v34  ;;  %vm6660_vm9 = vmor %vm3425_vm8, %vm3426_vm7  ;;  %vm3356_vm11 = vweird.f32 %v6588_v46  ;;  %vm3345_vm7 = vweird.f32 %v6579_v15 }
 0xceb   :  { %v3421_v24 = vmul.f32 %v6567_v21, %v3420_v44  ;;  %v3418_v43 = vsel %vm6624_vm6, %v6562_v35, %v3414_v57  ;;  %v3476_v44 = vmul.f32 %v6610_v11, %v3459_v54  ;;  %vm6746_vm8 = vmor %vm3355_vm14, %vm3356_vm11 }
 0xcec   :  { %v3351_v13 = vmul.f32 %v6588_v46, %v3350_v12  ;;  %v3461_v28 = vmul.f32 %v3418_v43, %v6456_v41 }
 0xced   :  { %v3211_v40 = vpop.xlane.xlu2 %3210  ;;  %v3422_v56 = vmul.f32 0.5, %v3421_v24 }
 0xcee   :  { %v3257_v26 = vmul.f32 %v3211_v40, %v6000_v38  ;;  %v3352_v40 = vmul.f32 0.5, %v3351_v13 }
 0xcef   :  { %v3423_v2 = vsub.f32 1.5, %v3422_v56 }
 0xcf0   :  { %v6617_v16 = vadd.f32 1e-12, %v3257_v26  ;;  %v3353_v56 = vsub.f32 1.5, %v3352_v40 }
 0xcf1   :  { %v3424_v59 = vmul.f32 %v6567_v21, %v3423_v2 }
 0xcf3   :  { %v3428_v29 = vsel %vm6660_vm9, %v6567_v21, %v3424_v59  ;;  %v6710_v59 = vmul.f32 %v6588_v46, %v3353_v56 }
 0xd1a   :  { %v3253_v31 = vpop.xlane.xlu0 %3252 }
 0xd1b   :  { %v3271_v0 = vmul.f32 %v3253_v31, %v6000_v38 }
 0xd1d   :  { %v6577_v58 = vadd.f32 1e-12, %v3271_v0  ;;  %v6633_v0 = vperm.slane %v6352_v22, 7 }
 0xd1f   :  { %4272 = vrsqrt.f32 %v6577_v58  ;;  %v6650_v35 = vadd.f32 %v6633_v0, %v3477_v3  ;;  %v6666_v8 = vadd.f32 %v6633_v0, %v3476_v44  ;;  %vm3435_vm12 = vweird.f32 %v6577_v58 }
 0xd20   :  { %4274 = vrsqrt.f32 %v6579_v15 }
 0xd22   :  { %v3256_v52 = vpop.xlane.xlu1 %3255  ;;  %v3235_v7 = vpop.xlane.xlu0 %3234 }
 0xd23   :  { %v3272_v51 = vmul.f32 %v3256_v52, %v6000_v38  ;;  %v3265_v20 = vmul.f32 %v3235_v7, %v6000_v38 }
 0xd25   :  { %v6594_v10 = vpop.eup %4272  ;;  %v6597_v4 = vadd.f32 1e-12, %v3272_v51  ;;  %v6599_v9 = vadd.f32 1e-12, %v3265_v20 }
 0xd26   :  { %v3430_v18 = vmul.f32 %v6594_v10, %v6577_v58  ;;  %v6612_v39 = vpop.eup %4274  ;;  %vm3436_vm10 = vweird.f32 %v6594_v10 }
 0xd27   :  { %4276 = vrsqrt.f32 %v6597_v4  ;;  %v3340_v31 = vmul.f32 %v6612_v39, %v6579_v15  ;;  %vm6685_vm2 = vmor %vm3435_vm12, %vm3436_vm10  ;;  %vm3445_vm15 = vweird.f32 %v6597_v4  ;;  %vm3375_vm3 = vweird.f32 %v6599_v9 }
 0xd28   :  { %v3431_v33 = vmul.f32 %v6594_v10, %v3430_v18  ;;  %4278 = vrsqrt.f32 %v6599_v9  ;;  %v3516_v18 = vpack.c.bf16 %v6650_v35, %v6666_v8 }
 0xd29   :  { %4280 = vrsqrt.f32 %v6617_v16  ;;  %v3341_v52 = vmul.f32 %v6612_v39, %v3340_v31 }
 0xd2a   :  { %v3432_v1 = vmul.f32 0.5, %v3431_v33  ;;  %v3238_v27 = vpop.xlane.xlu1 %3237  ;;  %v3232_v45 = vpop.xlane.xlu0 %3231  ;;  %v3462_v33 = vmul.f32 %v3428_v29, %v6464_v19 }
 0xd2b   :  { %v3266_v23 = vmul.f32 %v3238_v27, %v6000_v38  ;;  %v3264_v42 = vmul.f32 %v3232_v45, %v6000_v38  ;;  %v6679_v57 = vmul.f32 0.5, %v3341_v52  ;;  %v6690_v27 = vmul.f32 %v6610_v11, %v3461_v28 }
 0xd2c   :  { %v3433_v30 = vsub.f32 1.5, %v3432_v1  ;;  %v3479_v28 = vmul.f32 %v6610_v11, %v3462_v33 }
 0xd2d   :  { %v4277_v37 = vpop.eup %4276  ;;  %v6642_v32 = vadd.f32 1e-12, %v3266_v23  ;;  %v6644_v24 = vadd.f32 1e-12, %v3264_v42 }
 0xd2e   :  { %v6646_v22 = vpop.eup %4278  ;;  %v3440_v53 = vmul.f32 %v4277_v37, %v6597_v4  ;;  %v3434_v63 = vmul.f32 %v6594_v10, %v3433_v30  ;;  %vm3446_vm13 = vweird.f32 %v4277_v37 }
 0xd2f   :  { %v3370_v7 = vmul.f32 %v6646_v22, %v6599_v9  ;;  %4282 = vrsqrt.f32 %v6642_v32  ;;  %v6676_v54 = vpop.eup %4280  ;;  %vm3447_vm0 = vmor %vm3445_vm15, %vm3446_vm13  ;;  %vm3376_vm4 = vweird.f32 %v6646_v22  ;;  %vm3385_vm5 = vweird.f32 %v6642_v32 }
 0xd30   :  { %v3441_v20 = vmul.f32 %v4277_v37, %v3440_v53  ;;  %4284 = vrsqrt.f32 %v6644_v24  ;;  %v3438_v58 = vsel %vm6685_vm2, %v6594_v10, %v3434_v63  ;;  %v3290_v23 = vmul.f32 %v6676_v54, %v6617_v16  ;;  %vm6766_vm11 = vmor %vm3375_vm3, %vm3376_vm4 }
 0xd31   :  { %v3371_v41 = vmul.f32 %v6646_v22, %v3370_v7  ;;  %v3343_v10 = vsub.f32 1.5, %v6679_v57  ;;  %v3463_v30 = vmul.f32 %v3438_v58, %v6491_v55  ;;  %vm3365_vm12 = vweird.f32 %v6644_v24 }
 0xd32   :  { %v3442_v26 = vmul.f32 0.5, %v3441_v20  ;;  %v3223_v47 = vpop.xlane.xlu1 %3222  ;;  %v3217_v12 = vpop.xlane.xlu0 %3216  ;;  %v3291_v51 = vmul.f32 %v6676_v54, %v3290_v23  ;;  %vm3346_vm13 = vweird.f32 %v6612_v39 }
 0xd33   :  { %v3261_v21 = vmul.f32 %v3223_v47, %v6000_v38  ;;  %v3259_v2 = vmul.f32 %v3217_v12, %v6000_v38  ;;  %v3372_v3 = vmul.f32 0.5, %v3371_v41  ;;  %vm6803_vm15 = vmor %vm3345_vm7, %vm3346_vm13 }
 0xd34   :  { %v3443_v1 = vsub.f32 1.5, %v3442_v26  ;;  %v3480_v26 = vmul.f32 %v6610_v11, %v3463_v30  ;;  %v3496_v30 = vadd.f32 %v6633_v0, %v3479_v28 }
 0xd35   :  { %v6692_v45 = vpop.eup %4282  ;;  %v6698_v36 = vadd.f32 1e-12, %v3261_v21  ;;  %v6700_v19 = vadd.f32 1e-12, %v3259_v2  ;;  %v3373_v52 = vsub.f32 1.5, %v3372_v3 }
 0xd36   :  { %v6702_v31 = vpop.eup %4284  ;;  %v3444_v42 = vmul.f32 %v4277_v37, %v3443_v1  ;;  %v3380_v43 = vmul.f32 %v6692_v45, %v6642_v32  ;;  %vm3386_vm6 = vweird.f32 %v6692_v45 }
 0xd37   :  { %v3360_v44 = vmul.f32 %v6702_v31, %v6644_v24  ;;  %4286 = vrsqrt.f32 %v6698_v36  ;;  %v3374_v12 = vmul.f32 %v6646_v22, %v3373_v52  ;;  %vm3366_vm9 = vweird.f32 %v6702_v31  ;;  %vm3387_vm10 = vmor %vm3385_vm5, %vm3386_vm6 }
 0xd38   :  { %v3448_v40 = vsel %vm3447_vm0, %v4277_v37, %v3444_v42  ;;  %v3381_v4 = vmul.f32 %v6692_v45, %v3380_v43  ;;  %4288 = vrsqrt.f32 %v6700_v19  ;;  %v3497_v24 = vadd.f32 %v6633_v0, %v3480_v26  ;;  %vm6783_vm2 = vmor %vm3365_vm12, %vm3366_vm9 }
 0xd39   :  { %v3464_v53 = vmul.f32 %v3448_v40, %v6502_v6  ;;  %v3361_v7 = vmul.f32 %v6702_v31, %v3360_v44  ;;  %v3358_v43 = vsel %vm6746_vm8, %v6588_v46, %v6710_v59  ;;  %v3378_v9 = vsel %vm6766_vm11, %v6646_v22, %v3374_v12 }
 0xd3a   :  { %v3382_v20 = vmul.f32 0.5, %v3381_v4  ;;  %v3220_v55 = vpop.xlane.xlu1 %3219  ;;  %v3214_v37 = vpop.xlane.xlu0 %3213  ;;  %v3344_v22 = vmul.f32 %v6612_v39, %v3343_v10  ;;  %v3495_v52 = vadd.f32 %v6633_v0, %v6690_v27  ;;  %vm3335_vm0 = vweird.f32 %v6698_v36 }
 0xd3b   :  { %v3362_v29 = vmul.f32 0.5, %v3361_v7  ;;  %v3260_v63 = vmul.f32 %v3220_v55, %v6000_v38  ;;  %v3258_v41 = vmul.f32 %v3214_v37, %v6000_v38  ;;  %v3481_v6 = vmul.f32 %v6610_v11, %v3464_v53 }
 0xd3c   :  { %v3383_v56 = vsub.f32 1.5, %v3382_v20  ;;  %v3292_v7 = vmul.f32 0.5, %v3291_v51  ;;  %v3457_v20 = vmul.f32 %v3378_v9, %v6499_v14  ;;  %v3517_v10 = vpack.c.bf16 %v3496_v30, %v3495_v52 }
 0xd3d   :  { %v6732_v47 = vpop.eup %4286  ;;  %v3363_v57 = vsub.f32 1.5, %v3362_v29  ;;  %v6736_v21 = vadd.f32 1e-12, %v3260_v63  ;;  %v6738_v2 = vadd.f32 1e-12, %v3258_v41  ;;  %v3498_v58 = vadd.f32 %v6633_v0, %v3481_v6  ;;  %v3793_v63 = vld [vmem:[%s6895_s4 + $0x80] sm:$0xff] }
 0xd3e   :  { %v6740_v38 = vpop.eup %4288  ;;  %v3384_v13 = vmul.f32 %v6692_v45, %v3383_v56  ;;  %v3330_v1 = vmul.f32 %v6732_v47, %v6698_v36  ;;  %vm3336_vm14 = vweird.f32 %v6732_v47  ;;  %v3293_v41 = vsub.f32 1.5, %v3292_v7 }
 0xd3f   :  { %v3364_v3 = vmul.f32 %v6702_v31, %v3363_v57  ;;  %v3310_v34 = vmul.f32 %v6740_v38, %v6700_v19  ;;  %4290 = vrsqrt.f32 %v6736_v21  ;;  %v3518_v4 = vpack.c.bf16 %v3498_v58, %v3497_v24  ;;  %vm3337_vm3 = vmor %vm3335_vm0, %vm3336_vm14 }
 0xd40   :  { %v3388_v32 = vsel %vm3387_vm10, %v6692_v45, %v3384_v13  ;;  %v3331_v42 = vmul.f32 %v6732_v47, %v3330_v1  ;;  %4292 = vrsqrt.f32 %v6738_v2  ;;  %vm3316_vm4 = vweird.f32 %v6740_v38 }
 0xd41   :  { %v3311_v45 = vmul.f32 %v6740_v38, %v3310_v34  ;;  %v3458_v40 = vmul.f32 %v3388_v32, %v6516_v17  ;;  %v3368_v46 = vsel %vm6783_vm2, %v6702_v31, %v3364_v3  ;;  %3519 = vmatpush.bf16.msrb.mxu0 %v3518_v4  ;;  %v3455_v31 = vmul.f32 %v3358_v43, %v6467_v25 }
 0xd42   :  { %v3332_v59 = vmul.f32 0.5, %v3331_v42  ;;  %v3456_v55 = vmul.f32 %v3368_v46, %v6513_v50  ;;  %v3348_v25 = vsel %vm6803_vm15, %v6612_v39, %v3344_v22  ;;  %v3474_v36 = vmul.f32 %v6610_v11, %v3457_v20 }
 0xd43   :  { %v3312_v53 = vmul.f32 0.5, %v3311_v45  ;;  %v3475_v51 = vmul.f32 %v6610_v11, %v3458_v40  ;;  %vm3295_vm5 = vweird.f32 %v6617_v16  ;;  %vm3315_vm6 = vweird.f32 %v6700_v19 }
 0xd44   :  { %v3333_v28 = vsub.f32 1.5, %v3332_v59  ;;  %v3473_v39 = vmul.f32 %v6610_v11, %v3456_v55  ;;  %vm6823_vm7 = vmor %vm3315_vm6, %vm3316_vm4  ;;  %v3472_v13 = vmul.f32 %v6610_v11, %v3455_v31  ;;  %v3454_v1 = vmul.f32 %v3348_v25, %v6477_v5  ;;  %v7074_v55 = vld [vmem:[#allocation2_spill] sm:$0xff]  ;;  %v42_v25 = vld [vmem:[%s6897_s5 + $0x8] sm:$0xff] }
 0xd45   :  { %v4291_v17 = vpop.eup %4290  ;;  %v3313_v37 = vsub.f32 1.5, %v3312_v53  ;;  %3520 = vmatpush.bf16.msrb.mxu0 %v3517_v10  ;;  %vm3296_vm8 = vweird.f32 %v6676_v54  ;;  %v3491_v34 = vadd.f32 %v6633_v0, %v3474_v36  ;;  %vm3325_vm10 = vweird.f32 %v6736_v21 }
 0xd46   :  { %v4293_v29 = vpop.eup %4292  ;;  %v3334_v14 = vmul.f32 %v6732_v47, %v3333_v28  ;;  %v3320_v27 = vmul.f32 %v4291_v17, %v6736_v21  ;;  %vm3326_vm9 = vweird.f32 %v4291_v17  ;;  %v3490_v23 = vadd.f32 %v6633_v0, %v3473_v39  ;;  %vm6843_vm11 = vmor %vm3295_vm5, %vm3296_vm8 }
 0xd47   :  { %v3314_v50 = vmul.f32 %v6740_v38, %v3313_v37  ;;  %v3300_v15 = vmul.f32 %v4293_v29, %v6738_v2  ;;  %vm3306_vm12 = vweird.f32 %v4293_v29  ;;  %vm3327_vm2 = vmor %vm3325_vm10, %vm3326_vm9  ;;  %vm3305_vm13 = vweird.f32 %v6738_v2 }
 0xd48   :  { %v3338_v6 = vsel %vm3337_vm3, %v6732_v47, %v3334_v14  ;;  %v3321_v56 = vmul.f32 %v4291_v17, %v3320_v27  ;;  %v3492_v47 = vadd.f32 %v6633_v0, %v3475_v51  ;;  %vm3307_vm14 = vmor %vm3305_vm13, %vm3306_vm12  ;;  %v3489_v21 = vadd.f32 %v6633_v0, %v3472_v13 }
 0xd49   :  { %v3301_v26 = vmul.f32 %v4293_v29, %v3300_v15  ;;  %v3453_v12 = vmul.f32 %v3338_v6, %v6530_v62  ;;  %v3318_v19 = vsel %vm6823_vm7, %v6740_v38, %v3314_v50  ;;  %v3294_v62 = vmul.f32 %v6676_v54, %v3293_v41  ;;  %3521 = vmatpush.bf16.msrb.mxu0 %v3516_v18 }
 0xd4a   :  { %v3322_v33 = vmul.f32 0.5, %v3321_v56  ;;  %v3451_v32 = vmul.f32 %v3318_v19, %v6527_v60  ;;  %v3515_v24 = vpack.c.bf16 %v3492_v47, %v3491_v34  ;;  %v3471_v16 = vmul.f32 %v6610_v11, %v3454_v1 }
 0xd4b   :  { %v3302_v58 = vmul.f32 0.5, %v3301_v26  ;;  %v3470_v35 = vmul.f32 %v6610_v11, %v3453_v12  ;;  %v3298_v43 = vsel %vm6843_vm11, %v6676_v54, %v3294_v62  ;;  %v7073_v44 = vlaneseq }
 0xd4c   :  { %v3323_v3 = vsub.f32 1.5, %v3322_v33  ;;  %v3514_v40 = vpack.c.bf16 %v3490_v23, %v3489_v21  ;;  %v3468_v46 = vmul.f32 %v6610_v11, %v3451_v32  ;;  %v3449_v4 = vmul.f32 %v3298_v43, %v6484_v61 }
 0xd4d   :  { %v3303_v5 = vsub.f32 1.5, %v3302_v58  ;;  %3522 = vmatpush.bf16.msrb.mxu0 %v3515_v24  ;;  %v3500_v45 = vshrl.u32 %v7073_v44, 7  ;;  %v3487_v2 = vadd.f32 %v6633_v0, %v3470_v35  ;;  %v3488_v22 = vadd.f32 %v6633_v0, %v3471_v16 }
 0xd4e   :  { %v3324_v42 = vmul.f32 %v4291_v17, %v3323_v3  ;;  %v3485_v52 = vadd.f32 %v6633_v0, %v3468_v46  ;;  %v3466_v20 = vmul.f32 %v6610_v11, %v3449_v4  ;;  %v4317_v10 = vmov 1.0|1.0  }
 0xd4f   :  { %v3304_v8 = vmul.f32 %v4293_v29, %v3303_v5  ;;  %v3513_v53 = vpack.c.bf16 %v3488_v22, %v3487_v2  ;;  %v3502_v28 = vmul.u32 8, %v3500_v45  ;;  %v3538_v15 = vperm.slane %v42_v25, 0 }
 0xd50   :  { %v3328_v18 = vsel %vm3327_vm2, %v4291_v17, %v3324_v42  ;;  %v3483_v61 = vadd.f32 %v6633_v0, %v3466_v20  ;;  %v3575_v12 = vperm.slane %v42_v25, 1 }
 0xd51   :  { %v3452_v60 = vmul.f32 %v3328_v18, %v6544_v48  ;;  %v3308_v9 = vsel %vm3307_vm14, %v4293_v29, %v3304_v8  ;;  %3523 = vmatpush.bf16.msrb.mxu0 %v3514_v40  ;;  %v3501_v48 = vadd.s32 8, %v3500_v45  ;;  %vm3504_vm15 = vcmp.eq.s32.totalorder %v7074_v55, %v3502_v28  ;;  %v3791_v29 = vld [vmem:[%s6895_s4 + $0x70] sm:$0xff] }
 0xd52   :  { %v3450_v30 = vmul.f32 %v3308_v9, %v6541_v49 }
 0xd53   :  { %v3469_v59 = vmul.f32 %v6610_v11, %v3452_v60  ;;  %v3503_v17 = vmul.u32 8, %v3501_v48 }
 0xd54   :  { %v3467_v49 = vmul.f32 %v6610_v11, %v3450_v30  ;;  %v3792_v11 = vld [vmem:[%s6895_s4 + $0x78] sm:$0xff] }
 0xd55   :  { %v3486_v54 = vadd.f32 %v6633_v0, %v3469_v59  ;;  %3524 = vmatpush.bf16.msrb.mxu0 %v3513_v53  ;;  %vm3505_vm0 = vcmp.eq.s32.totalorder %v7074_v55, %v3503_v17 }
 0xd56   :  { %v3484_v31 = vadd.f32 %v6633_v0, %v3467_v49  ;;  %vm3757_vm3 = vmpackc.low %vm3505_vm0, %vm3504_vm15  ;;  %v3794_v0 = vld [vmem:[%s6895_s4 + $0x88] sm:$0xff] }
 0xd57   :  { %v3512_v7 = vpack.c.bf16 %v3486_v54, %v3485_v52  ;;  %3597 = vmatpush.bf16.msra.mxu3 %v3794_v0 }
 0xd58   :  { %v3511_v37 = vpack.c.bf16 %v3484_v31, %v3483_v61 }
 0xd59   :  { %3525 = vmatpush.bf16.msrb.mxu0 %v3512_v7 }
 0xd5b   :  { %3598 = vmatpush.bf16.msra.mxu3 %v3793_v63 }
 0xd5d   :  { %3526 = vmatpush.bf16.msrb.mxu0 %v3511_v37 }
 0xd60   :  { %3758 = vmatmul.msk.bf16.vlgmr.msrb.gmra.mxu0 %vm3757_vm3, %v4317_v10 }
 0xd61   :  { %3560 = vmatpush.bf16.msra.mxu0 %v3792_v11 }
 0xd65   :  { %3561 = vmatpush.bf16.msra.mxu0 %v3791_v29 }
 0xddd   :  { %v3528_v14 = vpop.f32.mrf.mxu0 }
 0xde5   :  { %v3530_v27 = vpop.f32.mrf.mxu0 }
 0xde6   :  { %v3533_v51 = vpack.c.bf16 %v3530_v27, %v3528_v14 }
 0xde8   :  { %3767 = vmatmul.msk.bf16.vlgmr.msra.gmra.mxu0 %vm333_vm1, %v3533_v51 }
 0xe65   :  { %v3563_v50 = vpop.f32.mrf.mxu0 }
 0xe66   :  { %v3564_v41 = vadd.f32 %v3563_v50, %v3538_v15 }
 0xe68   :  { %4294 = vtanh.f32 %v3564_v41 }
 0xe6d   :  { %v3565_v6 = vpop.f32.mrf.mxu0 }
 0xe6e   :  { %v3566_v56 = vadd.f32 %v3565_v6, %v3538_v15  ;;  %v4295_v36 = vpop.eup %4294 }
 0xe70   :  { %4296 = vtanh.f32 %v3566_v56 }
 0xe76   :  { %v4297_v26 = vpop.eup %4296 }
 0xe77   :  { %v3570_v39 = vpack.c.bf16 %v4297_v26, %v4295_v36 }
 0xe79   :  { %3776 = vmatmul.msk.bf16.vlgmr.msra.gmra.mxu3 %vm333_vm1, %v3570_v39 }
 0xefc   :  { %v3600_v57 = vpop.f32.mrf.mxu3 }
 0xefd   :  { %v3601_v33 = vadd.f32 %v3600_v57, %v3575_v12 }
 0xeff   :  { %3605 = vst [vmem:[%s6900_s6] sm:$0xff] %v3601_v33 }
 0xf04   :  { %v3602_v47 = vpop.f32.mrf.mxu3 }
 0xf05   :  { %v3603_v13 = vadd.f32 %v3602_v47, %v3575_v12 }
 0xf07   :  { %3606 = vst [vmem:[%s6900_s6 + $0x8] sm:$0xff] %v3603_v13 }

</bundles_post_ra>
